<compile_context>
chip_gen: v7x
topology: tpu7x:2x2x1
jax: 0.10.0
libtpu: 0.0.40
codegen_flags: <defaults>
</compile_context>

<pallas_src>
import functools

import jax
import jax.numpy as jnp
from jax.experimental import pallas as pl
from jax.experimental.pallas import tpu as pltpu


def dan_kernel(ids_ref, w1_ref, b1_ref, w2_ref, b2_ref, out_ref, h_ref, *, seq_len):
    """One batch tile of the DAN forward pass.

    ids_ref : SMEM [B_pad * S]  int32   (scalar-prefetched, flat token ids)
    w1_ref  : VMEM [V, H]       f32     (resident, constant index_map)
    b1_ref  : VMEM [1, H]       f32
    w2_ref  : VMEM [H, Tp]      f32
    b2_ref  : VMEM [1, Tp]      f32
    out_ref : VMEM [BT, Tp]     f32
    h_ref   : VMEM [BT, H]      f32     (scratch: pre-activation rows)
    """
    BT = out_ref.shape[0]
    base = pl.program_id(0) * BT

    # --- sparse gather-sum: h_pre[b, :] = sum_s W1[ids[b, s], :] ---
    # (duplicate tokens are counted, exactly like the bag-of-words vector)
    for b in range(BT):
        row_base = (base + b) * seq_len
        tok0 = ids_ref[row_base]
        acc = w1_ref[pl.ds(tok0, 1), :]            # (1, H) f32
        for s in range(1, seq_len):
            tok = ids_ref[row_base + s]
            acc = acc + w1_ref[pl.ds(tok, 1), :]
        h_ref[pl.ds(b, 1), :] = acc

    # --- fc bias + ReLU ---
    h = jnp.maximum(h_ref[...] + b1_ref[...], 0.0)

    # dropout: identity at inference time.
    # TODO(synk): training-mode dropout (stochastic mask via pltpu.prng_random_bits) not implemented.

    # --- weight: Linear(1024, tag_size) on the MXU, f32 accumulation ---
    out_ref[...] = (
        jnp.dot(h, w2_ref[...], preferred_element_type=jnp.float32) + b2_ref[...]
    )


def dan_forward(ids, w1, b1, w2, b2, *, batch_tile=16):
    """ids: [B, S] int; w1: [V, H] f32; b1: [1, H]; w2: [H, T] f32; b2: [1, T]."""
    B, S = ids.shape
    V, H = w1.shape
    T = w2.shape[1]

    # Lane-dense output: pad tag_size to 128; use 256-multiples beyond that
    # (256-wide MXU on v6e/v7x).
    T_pad = 128 if T <= 128 else ((T + 255) // 256) * 256
    # Pad batch to a multiple of the batch tile (padded rows are sliced off below).
    B_pad = ((B + batch_tile - 1) // batch_tile) * batch_tile

    # Clamp ids so an out-of-range token can never index outside W1.
    ids_c = jnp.clip(ids.astype(jnp.int32), 0, V - 1)
    # Flat 1-D ids in SMEM (padded rows read token 0; their outputs are discarded).
    ids_flat = jnp.zeros((B_pad * S,), jnp.int32).at[: B * S].set(ids_c.reshape(-1))

    w1_p = w1.astype(jnp.float32)
    b1_p = b1.astype(jnp.float32).reshape(1, H)
    w2_p = jnp.zeros((H, T_pad), jnp.float32).at[:, :T].set(w2.astype(jnp.float32))
    b2_p = jnp.zeros((1, T_pad), jnp.float32).at[:, :T].set(b2.astype(jnp.float32))

    grid = (B_pad // batch_tile,)

    out = pl.pallas_call(
        functools.partial(dan_kernel, seq_len=S),
        out_shape=jax.ShapeDtypeStruct((B_pad, T_pad), jnp.float32),
        grid_spec=pltpu.PrefetchScalarGridSpec(
            num_scalar_prefetch=1,                                  # flat ids -> SMEM
            grid=grid,
            in_specs=[
                pl.BlockSpec((V, H), lambda i, ids_s: (0, 0)),       # W1 (VMEM resident)
                pl.BlockSpec((1, H), lambda i, ids_s: (0, 0)),       # b1
                pl.BlockSpec((H, T_pad), lambda i, ids_s: (0, 0)),   # W2
                pl.BlockSpec((1, T_pad), lambda i, ids_s: (0, 0)),   # b2
            ],
            out_specs=pl.BlockSpec((batch_tile, T_pad), lambda i, ids_s: (i, 0)),
            scratch_shapes=[
                pltpu.VMEM((batch_tile, H), jnp.float32),            # gathered/summed rows
            ],
        ),
        compiler_params=pltpu.CompilerParams(
            dimension_semantics=("parallel",),       # batch tiles -> megacore sharding
            vmem_limit_bytes=32 * 1024 * 1024,       # fits v5e default-limit & v7x physical VMEM
        ),
    )(ids_flat, w1_p, b1_p, w2_p, b2_p)

    return out[:B, :T]


def init_params(key, vocab_size, hidden, tag_size):
    # Mirror nn.Linear's default U(-1/sqrt(fan_in), 1/sqrt(fan_in)) init.
    k1, k2, k3, k4 = jax.random.split(key, 4)
    bound1 = 1.0 / jnp.sqrt(vocab_size)
    bound2 = 1.0 / jnp.sqrt(hidden)
    w1 = jax.random.uniform(k1, (vocab_size, hidden), jnp.float32, -bound1, bound1)
    b1 = jax.random.uniform(k2, (1, hidden), jnp.float32, -bound1, bound1)
    w2 = jax.random.uniform(k3, (hidden, tag_size), jnp.float32, -bound2, bound2)
    b2 = jax.random.uniform(k4, (1, tag_size), jnp.float32, -bound2, bound2)
    return w1, b1, w2, b2


if __name__ == "__main__":
    # Small shapes consistent with the module's forward:
    #   batch=32, seq_len=8, vocab_size=2048, hidden=1024 (fixed by model), tag_size=16
    # batch=32 with batch_tile=16 keeps the grid at 2 parallel steps (both v7x TCs used).
    B, S, V, H, T = 32, 8, 2048, 1024, 16

    key = jax.random.PRNGKey(0)
    k_ids, k_params = jax.random.split(key)

    ids = jax.random.randint(k_ids, (B, S), 0, V, dtype=jnp.int32)
    w1, b1, w2, b2 = init_params(k_params, V, H, T)

    scores = dan_forward(ids, w1, b1, w2, b2, batch_tile=16)
    jax.block_until_ready(scores)

    # Pure-JAX f32 reference: bag-of-words counts -> relu(linear) -> linear.
    bow_ref = jax.nn.one_hot(ids, V, dtype=jnp.float32).sum(axis=1)            # [B, V]
    h_ref = jnp.maximum(
        jnp.dot(bow_ref, w1, precision=jax.lax.Precision.HIGHEST) + b1, 0.0)   # [B, H]
    scores_ref = jnp.dot(h_ref, w2, precision=jax.lax.Precision.HIGHEST) + b2  # [B, T]

    assert scores.shape == (B, T)
    max_err = float(jnp.max(jnp.abs(scores - scores_ref)))
    assert jnp.allclose(scores, scores_ref, atol=1e-2, rtol=1e-2), max_err

    print("KERNEL_OK")
</pallas_src>

<mosaic_0001>
module attributes {stable_mosaic.version = 11 : i64} {
  func.func @dan_kernel(%arg0: i32, %arg1: memref<256xi32, #tpu.memory_space<smem>>, %arg2: memref<2048x1024xf32, #tpu.memory_space<vmem>>, %arg3: memref<1x1024xf32, #tpu.memory_space<vmem>>, %arg4: memref<1024x128xf32, #tpu.memory_space<vmem>>, %arg5: memref<1x128xf32, #tpu.memory_space<vmem>>, %arg6: memref<16x128xf32, #tpu.memory_space<vmem>>, %arg7: memref<16x1024xf32, #tpu.memory_space<vmem>>) attributes {dimension_semantics = [#tpu.dimension_semantics<parallel>], iteration_bounds = array<i64: 2>, scalar_prefetch = 1 : i64, scratch_operands = 1 : i64, tpu.core_type = #tpu.core_type<tc>, window_params = [{pipeline_mode = #tpu.pipeline_mode<synchronous>, transform_indices = @transform_0, window_bounds = array<i64: 2048, 1024>}, {pipeline_mode = #tpu.pipeline_mode<synchronous>, transform_indices = @transform_1, window_bounds = array<i64: 1, 1024>}, {pipeline_mode = #tpu.pipeline_mode<synchronous>, transform_indices = @transform_2, window_bounds = array<i64: 1024, 128>}, {pipeline_mode = #tpu.pipeline_mode<synchronous>, transform_indices = @transform_3, window_bounds = array<i64: 1, 128>}, {transform_indices = @transform_4, window_bounds = array<i64: 16, 128>}]} {
    %c16_i32 = arith.constant 16 : i32
    %0 = arith.muli %arg0, %c16_i32 : i32
    %c0_i32 = arith.constant 0 : i32
    %1 = arith.addi %0, %c0_i32 : i32
    %c8_i32 = arith.constant 8 : i32
    %2 = arith.muli %1, %c8_i32 : i32
    %3 = arith.index_cast %2 : i32 to index
    %4 = memref.load %arg1[%3] : memref<256xi32, #tpu.memory_space<smem>>
    %5 = arith.index_cast %4 : i32 to index
    %c0 = arith.constant 0 : index
    %6 = vector.load %arg2[%5, %c0] : memref<2048x1024xf32, #tpu.memory_space<vmem>>, vector<1x1024xf32>
    %c1_i32 = arith.constant 1 : i32
    %7 = arith.addi %2, %c1_i32 : i32
    %8 = arith.index_cast %7 : i32 to index
    %9 = memref.load %arg1[%8] : memref<256xi32, #tpu.memory_space<smem>>
    %10 = arith.index_cast %9 : i32 to index
    %c0_0 = arith.constant 0 : index
    %11 = vector.load %arg2[%10, %c0_0] : memref<2048x1024xf32, #tpu.memory_space<vmem>>, vector<1x1024xf32>
    %12 = arith.addf %6, %11 : vector<1x1024xf32>
    %c2_i32 = arith.constant 2 : i32
    %13 = arith.addi %2, %c2_i32 : i32
    %14 = arith.index_cast %13 : i32 to index
    %15 = memref.load %arg1[%14] : memref<256xi32, #tpu.memory_space<smem>>
    %16 = arith.index_cast %15 : i32 to index
    %c0_1 = arith.constant 0 : index
    %17 = vector.load %arg2[%16, %c0_1] : memref<2048x1024xf32, #tpu.memory_space<vmem>>, vector<1x1024xf32>
    %18 = arith.addf %12, %17 : vector<1x1024xf32>
    %c3_i32 = arith.constant 3 : i32
    %19 = arith.addi %2, %c3_i32 : i32
    %20 = arith.index_cast %19 : i32 to index
    %21 = memref.load %arg1[%20] : memref<256xi32, #tpu.memory_space<smem>>
    %22 = arith.index_cast %21 : i32 to index
    %c0_2 = arith.constant 0 : index
    %23 = vector.load %arg2[%22, %c0_2] : memref<2048x1024xf32, #tpu.memory_space<vmem>>, vector<1x1024xf32>
    %24 = arith.addf %18, %23 : vector<1x1024xf32>
    %c4_i32 = arith.constant 4 : i32
    %25 = arith.addi %2, %c4_i32 : i32
    %26 = arith.index_cast %25 : i32 to index
    %27 = memref.load %arg1[%26] : memref<256xi32, #tpu.memory_space<smem>>
    %28 = arith.index_cast %27 : i32 to index
    %c0_3 = arith.constant 0 : index
    %29 = vector.load %arg2[%28, %c0_3] : memref<2048x1024xf32, #tpu.memory_space<vmem>>, vector<1x1024xf32>
    %30 = arith.addf %24, %29 : vector<1x1024xf32>
    %c5_i32 = arith.constant 5 : i32
    %31 = arith.addi %2, %c5_i32 : i32
    %32 = arith.index_cast %31 : i32 to index
    %33 = memref.load %arg1[%32] : memref<256xi32, #tpu.memory_space<smem>>
    %34 = arith.index_cast %33 : i32 to index
    %c0_4 = arith.constant 0 : index
    %35 = vector.load %arg2[%34, %c0_4] : memref<2048x1024xf32, #tpu.memory_space<vmem>>, vector<1x1024xf32>
    %36 = arith.addf %30, %35 : vector<1x1024xf32>
    %c6_i32 = arith.constant 6 : i32
    %37 = arith.addi %2, %c6_i32 : i32
    %38 = arith.index_cast %37 : i32 to index
    %39 = memref.load %arg1[%38] : memref<256xi32, #tpu.memory_space<smem>>
    %40 = arith.index_cast %39 : i32 to index
    %c0_5 = arith.constant 0 : index
    %41 = vector.load %arg2[%40, %c0_5] : memref<2048x1024xf32, #tpu.memory_space<vmem>>, vector<1x1024xf32>
    %42 = arith.addf %36, %41 : vector<1x1024xf32>
    %c7_i32 = arith.constant 7 : i32
    %43 = arith.addi %2, %c7_i32 : i32
    %44 = arith.index_cast %43 : i32 to index
    %45 = memref.load %arg1[%44] : memref<256xi32, #tpu.memory_space<smem>>
    %46 = arith.index_cast %45 : i32 to index
    %c0_6 = arith.constant 0 : index
    %47 = vector.load %arg2[%46, %c0_6] : memref<2048x1024xf32, #tpu.memory_space<vmem>>, vector<1x1024xf32>
    %48 = arith.addf %42, %47 : vector<1x1024xf32>
    %c0_7 = arith.constant 0 : index
    %c0_8 = arith.constant 0 : index
    %49 = vector.load %arg7[%c0_7, %c0_8] : memref<16x1024xf32, #tpu.memory_space<vmem>>, vector<1x1024xf32>
    tpu.vector_store %arg7[%c0_7, %c0_8], %48 {strides = array<i32>} : memref<16x1024xf32, #tpu.memory_space<vmem>>, vector<1x1024xf32>,
    %c1_i32_9 = arith.constant 1 : i32
    %50 = arith.addi %0, %c1_i32_9 : i32
    %c8_i32_10 = arith.constant 8 : i32
    %51 = arith.muli %50, %c8_i32_10 : i32
    %52 = arith.index_cast %51 : i32 to index
    %53 = memref.load %arg1[%52] : memref<256xi32, #tpu.memory_space<smem>>
    %54 = arith.index_cast %53 : i32 to index
    %c0_11 = arith.constant 0 : index
    %55 = vector.load %arg2[%54, %c0_11] : memref<2048x1024xf32, #tpu.memory_space<vmem>>, vector<1x1024xf32>
    %c1_i32_12 = arith.constant 1 : i32
    %56 = arith.addi %51, %c1_i32_12 : i32
    %57 = arith.index_cast %56 : i32 to index
    %58 = memref.load %arg1[%57] : memref<256xi32, #tpu.memory_space<smem>>
    %59 = arith.index_cast %58 : i32 to index
    %c0_13 = arith.constant 0 : index
    %60 = vector.load %arg2[%59, %c0_13] : memref<2048x1024xf32, #tpu.memory_space<vmem>>, vector<1x1024xf32>
    %61 = arith.addf %55, %60 : vector<1x1024xf32>
    %c2_i32_14 = arith.constant 2 : i32
    %62 = arith.addi %51, %c2_i32_14 : i32
    %63 = arith.index_cast %62 : i32 to index
    %64 = memref.load %arg1[%63] : memref<256xi32, #tpu.memory_space<smem>>
    %65 = arith.index_cast %64 : i32 to index
    %c0_15 = arith.constant 0 : index
    %66 = vector.load %arg2[%65, %c0_15] : memref<2048x1024xf32, #tpu.memory_space<vmem>>, vector<1x1024xf32>
    %67 = arith.addf %61, %66 : vector<1x1024xf32>
    %c3_i32_16 = arith.constant 3 : i32
    %68 = arith.addi %51, %c3_i32_16 : i32
    %69 = arith.index_cast %68 : i32 to index
    %70 = memref.load %arg1[%69] : memref<256xi32, #tpu.memory_space<smem>>
    %71 = arith.index_cast %70 : i32 to index
    %c0_17 = arith.constant 0 : index
    %72 = vector.load %arg2[%71, %c0_17] : memref<2048x1024xf32, #tpu.memory_space<vmem>>, vector<1x1024xf32>
    %73 = arith.addf %67, %72 : vector<1x1024xf32>
    %c4_i32_18 = arith.constant 4 : i32
    %74 = arith.addi %51, %c4_i32_18 : i32
    %75 = arith.index_cast %74 : i32 to index
    %76 = memref.load %arg1[%75] : memref<256xi32, #tpu.memory_space<smem>>
    %77 = arith.index_cast %76 : i32 to index
    %c0_19 = arith.constant 0 : index
    %78 = vector.load %arg2[%77, %c0_19] : memref<2048x1024xf32, #tpu.memory_space<vmem>>, vector<1x1024xf32>
    %79 = arith.addf %73, %78 : vector<1x1024xf32>
    %c5_i32_20 = arith.constant 5 : i32
    %80 = arith.addi %51, %c5_i32_20 : i32
    %81 = arith.index_cast %80 : i32 to index
    %82 = memref.load %arg1[%81] : memref<256xi32, #tpu.memory_space<smem>>
    %83 = arith.index_cast %82 : i32 to index
    %c0_21 = arith.constant 0 : index
    %84 = vector.load %arg2[%83, %c0_21] : memref<2048x1024xf32, #tpu.memory_space<vmem>>, vector<1x1024xf32>
    %85 = arith.addf %79, %84 : vector<1x1024xf32>
    %c6_i32_22 = arith.constant 6 : i32
    %86 = arith.addi %51, %c6_i32_22 : i32
    %87 = arith.index_cast %86 : i32 to index
    %88 = memref.load %arg1[%87] : memref<256xi32, #tpu.memory_space<smem>>
    %89 = arith.index_cast %88 : i32 to index
    %c0_23 = arith.constant 0 : index
    %90 = vector.load %arg2[%89, %c0_23] : memref<2048x1024xf32, #tpu.memory_space<vmem>>, vector<1x1024xf32>
    %91 = arith.addf %85, %90 : vector<1x1024xf32>
    %c7_i32_24 = arith.constant 7 : i32
    %92 = arith.addi %51, %c7_i32_24 : i32
    %93 = arith.index_cast %92 : i32 to index
    %94 = memref.load %arg1[%93] : memref<256xi32, #tpu.memory_space<smem>>
    %95 = arith.index_cast %94 : i32 to index
    %c0_25 = arith.constant 0 : index
    %96 = vector.load %arg2[%95, %c0_25] : memref<2048x1024xf32, #tpu.memory_space<vmem>>, vector<1x1024xf32>
    %97 = arith.addf %91, %96 : vector<1x1024xf32>
    %c1 = arith.constant 1 : index
    %c0_26 = arith.constant 0 : index
    %98 = vector.load %arg7[%c1, %c0_26] : memref<16x1024xf32, #tpu.memory_space<vmem>>, vector<1x1024xf32>
    tpu.vector_store %arg7[%c1, %c0_26], %97 {strides = array<i32>} : memref<16x1024xf32, #tpu.memory_space<vmem>>, vector<1x1024xf32>,
    %c2_i32_27 = arith.constant 2 : i32
    %99 = arith.addi %0, %c2_i32_27 : i32
    %c8_i32_28 = arith.constant 8 : i32
    %100 = arith.muli %99, %c8_i32_28 : i32
    %101 = arith.index_cast %100 : i32 to index
    %102 = memref.load %arg1[%101] : memref<256xi32, #tpu.memory_space<smem>>
    %103 = arith.index_cast %102 : i32 to index
    %c0_29 = arith.constant 0 : index
    %104 = vector.load %arg2[%103, %c0_29] : memref<2048x1024xf32, #tpu.memory_space<vmem>>, vector<1x1024xf32>
    %c1_i32_30 = arith.constant 1 : i32
    %105 = arith.addi %100, %c1_i32_30 : i32
    %106 = arith.index_cast %105 : i32 to index
    %107 = memref.load %arg1[%106] : memref<256xi32, #tpu.memory_space<smem>>
    %108 = arith.index_cast %107 : i32 to index
    %c0_31 = arith.constant 0 : index
    %109 = vector.load %arg2[%108, %c0_31] : memref<2048x1024xf32, #tpu.memory_space<vmem>>, vector<1x1024xf32>
    %110 = arith.addf %104, %109 : vector<1x1024xf32>
    %c2_i32_32 = arith.constant 2 : i32
    %111 = arith.addi %100, %c2_i32_32 : i32
    %112 = arith.index_cast %111 : i32 to index
    %113 = memref.load %arg1[%112] : memref<256xi32, #tpu.memory_space<smem>>
    %114 = arith.index_cast %113 : i32 to index
    %c0_33 = arith.constant 0 : index
    %115 = vector.load %arg2[%114, %c0_33] : memref<2048x1024xf32, #tpu.memory_space<vmem>>, vector<1x1024xf32>
    %116 = arith.addf %110, %115 : vector<1x1024xf32>
    %c3_i32_34 = arith.constant 3 : i32
    %117 = arith.addi %100, %c3_i32_34 : i32
    %118 = arith.index_cast %117 : i32 to index
    %119 = memref.load %arg1[%118] : memref<256xi32, #tpu.memory_space<smem>>
    %120 = arith.index_cast %119 : i32 to index
    %c0_35 = arith.constant 0 : index
    %121 = vector.load %arg2[%120, %c0_35] : memref<2048x1024xf32, #tpu.memory_space<vmem>>, vector<1x1024xf32>
    %122 = arith.addf %116, %121 : vector<1x1024xf32>
    %c4_i32_36 = arith.constant 4 : i32
    %123 = arith.addi %100, %c4_i32_36 : i32
    %124 = arith.index_cast %123 : i32 to index
    %125 = memref.load %arg1[%124] : memref<256xi32, #tpu.memory_space<smem>>
    %126 = arith.index_cast %125 : i32 to index
    %c0_37 = arith.constant 0 : index
    %127 = vector.load %arg2[%126, %c0_37] : memref<2048x1024xf32, #tpu.memory_space<vmem>>, vector<1x1024xf32>
    %128 = arith.addf %122, %127 : vector<1x1024xf32>
    %c5_i32_38 = arith.constant 5 : i32
    %129 = arith.addi %100, %c5_i32_38 : i32
    %130 = arith.index_cast %129 : i32 to index
    %131 = memref.load %arg1[%130] : memref<256xi32, #tpu.memory_space<smem>>
    %132 = arith.index_cast %131 : i32 to index
    %c0_39 = arith.constant 0 : index
    %133 = vector.load %arg2[%132, %c0_39] : memref<2048x1024xf32, #tpu.memory_space<vmem>>, vector<1x1024xf32>
    %134 = arith.addf %128, %133 : vector<1x1024xf32>
    %c6_i32_40 = arith.constant 6 : i32
    %135 = arith.addi %100, %c6_i32_40 : i32
    %136 = arith.index_cast %135 : i32 to index
    %137 = memref.load %arg1[%136] : memref<256xi32, #tpu.memory_space<smem>>
    %138 = arith.index_cast %137 : i32 to index
    %c0_41 = arith.constant 0 : index
    %139 = vector.load %arg2[%138, %c0_41] : memref<2048x1024xf32, #tpu.memory_space<vmem>>, vector<1x1024xf32>
    %140 = arith.addf %134, %139 : vector<1x1024xf32>
    %c7_i32_42 = arith.constant 7 : i32
    %141 = arith.addi %100, %c7_i32_42 : i32
    %142 = arith.index_cast %141 : i32 to index
    %143 = memref.load %arg1[%142] : memref<256xi32, #tpu.memory_space<smem>>
    %144 = arith.index_cast %143 : i32 to index
    %c0_43 = arith.constant 0 : index
    %145 = vector.load %arg2[%144, %c0_43] : memref<2048x1024xf32, #tpu.memory_space<vmem>>, vector<1x1024xf32>
    %146 = arith.addf %140, %145 : vector<1x1024xf32>
    %c2 = arith.constant 2 : index
    %c0_44 = arith.constant 0 : index
    %147 = vector.load %arg7[%c2, %c0_44] : memref<16x1024xf32, #tpu.memory_space<vmem>>, vector<1x1024xf32>
    tpu.vector_store %arg7[%c2, %c0_44], %146 {strides = array<i32>} : memref<16x1024xf32, #tpu.memory_space<vmem>>, vector<1x1024xf32>,
    %c3_i32_45 = arith.constant 3 : i32
    %148 = arith.addi %0, %c3_i32_45 : i32
    %c8_i32_46 = arith.constant 8 : i32
    %149 = arith.muli %148, %c8_i32_46 : i32
    %150 = arith.index_cast %149 : i32 to index
    %151 = memref.load %arg1[%150] : memref<256xi32, #tpu.memory_space<smem>>
    %152 = arith.index_cast %151 : i32 to index
    %c0_47 = arith.constant 0 : index
    %153 = vector.load %arg2[%152, %c0_47] : memref<2048x1024xf32, #tpu.memory_space<vmem>>, vector<1x1024xf32>
    %c1_i32_48 = arith.constant 1 : i32
    %154 = arith.addi %149, %c1_i32_48 : i32
    %155 = arith.index_cast %154 : i32 to index
    %156 = memref.load %arg1[%155] : memref<256xi32, #tpu.memory_space<smem>>
    %157 = arith.index_cast %156 : i32 to index
    %c0_49 = arith.constant 0 : index
    %158 = vector.load %arg2[%157, %c0_49] : memref<2048x1024xf32, #tpu.memory_space<vmem>>, vector<1x1024xf32>
    %159 = arith.addf %153, %158 : vector<1x1024xf32>
    %c2_i32_50 = arith.constant 2 : i32
    %160 = arith.addi %149, %c2_i32_50 : i32
    %161 = arith.index_cast %160 : i32 to index
    %162 = memref.load %arg1[%161] : memref<256xi32, #tpu.memory_space<smem>>
    %163 = arith.index_cast %162 : i32 to index
    %c0_51 = arith.constant 0 : index
    %164 = vector.load %arg2[%163, %c0_51] : memref<2048x1024xf32, #tpu.memory_space<vmem>>, vector<1x1024xf32>
    %165 = arith.addf %159, %164 : vector<1x1024xf32>
    %c3_i32_52 = arith.constant 3 : i32
    %166 = arith.addi %149, %c3_i32_52 : i32
    %167 = arith.index_cast %166 : i32 to index
    %168 = memref.load %arg1[%167] : memref<256xi32, #tpu.memory_space<smem>>
    %169 = arith.index_cast %168 : i32 to index
    %c0_53 = arith.constant 0 : index
    %170 = vector.load %arg2[%169, %c0_53] : memref<2048x1024xf32, #tpu.memory_space<vmem>>, vector<1x1024xf32>
    %171 = arith.addf %165, %170 : vector<1x1024xf32>
    %c4_i32_54 = arith.constant 4 : i32
    %172 = arith.addi %149, %c4_i32_54 : i32
    %173 = arith.index_cast %172 : i32 to index
    %174 = memref.load %arg1[%173] : memref<256xi32, #tpu.memory_space<smem>>
    %175 = arith.index_cast %174 : i32 to index
    %c0_55 = arith.constant 0 : index
    %176 = vector.load %arg2[%175, %c0_55] : memref<2048x1024xf32, #tpu.memory_space<vmem>>, vector<1x1024xf32>
    %177 = arith.addf %171, %176 : vector<1x1024xf32>
    %c5_i32_56 = arith.constant 5 : i32
    %178 = arith.addi %149, %c5_i32_56 : i32
    %179 = arith.index_cast %178 : i32 to index
    %180 = memref.load %arg1[%179] : memref<256xi32, #tpu.memory_space<smem>>
    %181 = arith.index_cast %180 : i32 to index
    %c0_57 = arith.constant 0 : index
    %182 = vector.load %arg2[%181, %c0_57] : memref<2048x1024xf32, #tpu.memory_space<vmem>>, vector<1x1024xf32>
    %183 = arith.addf %177, %182 : vector<1x1024xf32>
    %c6_i32_58 = arith.constant 6 : i32
    %184 = arith.addi %149, %c6_i32_58 : i32
    %185 = arith.index_cast %184 : i32 to index
    %186 = memref.load %arg1[%185] : memref<256xi32, #tpu.memory_space<smem>>
    %187 = arith.index_cast %186 : i32 to index
    %c0_59 = arith.constant 0 : index
    %188 = vector.load %arg2[%187, %c0_59] : memref<2048x1024xf32, #tpu.memory_space<vmem>>, vector<1x1024xf32>
    %189 = arith.addf %183, %188 : vector<1x1024xf32>
    %c7_i32_60 = arith.constant 7 : i32
    %190 = arith.addi %149, %c7_i32_60 : i32
    %191 = arith.index_cast %190 : i32 to index
    %192 = memref.load %arg1[%191] : memref<256xi32, #tpu.memory_space<smem>>
    %193 = arith.index_cast %192 : i32 to index
    %c0_61 = arith.constant 0 : index
    %194 = vector.load %arg2[%193, %c0_61] : memref<2048x1024xf32, #tpu.memory_space<vmem>>, vector<1x1024xf32>
    %195 = arith.addf %189, %194 : vector<1x1024xf32>
    %c3 = arith.constant 3 : index
    %c0_62 = arith.constant 0 : index
    %196 = vector.load %arg7[%c3, %c0_62] : memref<16x1024xf32, #tpu.memory_space<vmem>>, vector<1x1024xf32>
    tpu.vector_store %arg7[%c3, %c0_62], %195 {strides = array<i32>} : memref<16x1024xf32, #tpu.memory_space<vmem>>, vector<1x1024xf32>,
    %c4_i32_63 = arith.constant 4 : i32
    %197 = arith.addi %0, %c4_i32_63 : i32
    %c8_i32_64 = arith.constant 8 : i32
    %198 = arith.muli %197, %c8_i32_64 : i32
    %199 = arith.index_cast %198 : i32 to index
    %200 = memref.load %arg1[%199] : memref<256xi32, #tpu.memory_space<smem>>
    %201 = arith.index_cast %200 : i32 to index
    %c0_65 = arith.constant 0 : index
    %202 = vector.load %arg2[%201, %c0_65] : memref<2048x1024xf32, #tpu.memory_space<vmem>>, vector<1x1024xf32>
    %c1_i32_66 = arith.constant 1 : i32
    %203 = arith.addi %198, %c1_i32_66 : i32
    %204 = arith.index_cast %203 : i32 to index
    %205 = memref.load %arg1[%204] : memref<256xi32, #tpu.memory_space<smem>>
    %206 = arith.index_cast %205 : i32 to index
    %c0_67 = arith.constant 0 : index
    %207 = vector.load %arg2[%206, %c0_67] : memref<2048x1024xf32, #tpu.memory_space<vmem>>, vector<1x1024xf32>
    %208 = arith.addf %202, %207 : vector<1x1024xf32>
    %c2_i32_68 = arith.constant 2 : i32
    %209 = arith.addi %198, %c2_i32_68 : i32
    %210 = arith.index_cast %209 : i32 to index
    %211 = memref.load %arg1[%210] : memref<256xi32, #tpu.memory_space<smem>>
    %212 = arith.index_cast %211 : i32 to index
    %c0_69 = arith.constant 0 : index
    %213 = vector.load %arg2[%212, %c0_69] : memref<2048x1024xf32, #tpu.memory_space<vmem>>, vector<1x1024xf32>
    %214 = arith.addf %208, %213 : vector<1x1024xf32>
    %c3_i32_70 = arith.constant 3 : i32
    %215 = arith.addi %198, %c3_i32_70 : i32
    %216 = arith.index_cast %215 : i32 to index
    %217 = memref.load %arg1[%216] : memref<256xi32, #tpu.memory_space<smem>>
    %218 = arith.index_cast %217 : i32 to index
    %c0_71 = arith.constant 0 : index
    %219 = vector.load %arg2[%218, %c0_71] : memref<2048x1024xf32, #tpu.memory_space<vmem>>, vector<1x1024xf32>
    %220 = arith.addf %214, %219 : vector<1x1024xf32>
    %c4_i32_72 = arith.constant 4 : i32
    %221 = arith.addi %198, %c4_i32_72 : i32
    %222 = arith.index_cast %221 : i32 to index
    %223 = memref.load %arg1[%222] : memref<256xi32, #tpu.memory_space<smem>>
    %224 = arith.index_cast %223 : i32 to index
    %c0_73 = arith.constant 0 : index
    %225 = vector.load %arg2[%224, %c0_73] : memref<2048x1024xf32, #tpu.memory_space<vmem>>, vector<1x1024xf32>
    %226 = arith.addf %220, %225 : vector<1x1024xf32>
    %c5_i32_74 = arith.constant 5 : i32
    %227 = arith.addi %198, %c5_i32_74 : i32
    %228 = arith.index_cast %227 : i32 to index
    %229 = memref.load %arg1[%228] : memref<256xi32, #tpu.memory_space<smem>>
    %230 = arith.index_cast %229 : i32 to index
    %c0_75 = arith.constant 0 : index
    %231 = vector.load %arg2[%230, %c0_75] : memref<2048x1024xf32, #tpu.memory_space<vmem>>, vector<1x1024xf32>
    %232 = arith.addf %226, %231 : vector<1x1024xf32>
    %c6_i32_76 = arith.constant 6 : i32
    %233 = arith.addi %198, %c6_i32_76 : i32
    %234 = arith.index_cast %233 : i32 to index
    %235 = memref.load %arg1[%234] : memref<256xi32, #tpu.memory_space<smem>>
    %236 = arith.index_cast %235 : i32 to index
    %c0_77 = arith.constant 0 : index
    %237 = vector.load %arg2[%236, %c0_77] : memref<2048x1024xf32, #tpu.memory_space<vmem>>, vector<1x1024xf32>
    %238 = arith.addf %232, %237 : vector<1x1024xf32>
    %c7_i32_78 = arith.constant 7 : i32
    %239 = arith.addi %198, %c7_i32_78 : i32
    %240 = arith.index_cast %239 : i32 to index
    %241 = memref.load %arg1[%240] : memref<256xi32, #tpu.memory_space<smem>>
    %242 = arith.index_cast %241 : i32 to index
    %c0_79 = arith.constant 0 : index
    %243 = vector.load %arg2[%242, %c0_79] : memref<2048x1024xf32, #tpu.memory_space<vmem>>, vector<1x1024xf32>
    %244 = arith.addf %238, %243 : vector<1x1024xf32>
    %c4 = arith.constant 4 : index
    %c0_80 = arith.constant 0 : index
    %245 = vector.load %arg7[%c4, %c0_80] : memref<16x1024xf32, #tpu.memory_space<vmem>>, vector<1x1024xf32>
    tpu.vector_store %arg7[%c4, %c0_80], %244 {strides = array<i32>} : memref<16x1024xf32, #tpu.memory_space<vmem>>, vector<1x1024xf32>,
    %c5_i32_81 = arith.constant 5 : i32
    %246 = arith.addi %0, %c5_i32_81 : i32
    %c8_i32_82 = arith.constant 8 : i32
    %247 = arith.muli %246, %c8_i32_82 : i32
    %248 = arith.index_cast %247 : i32 to index
    %249 = memref.load %arg1[%248] : memref<256xi32, #tpu.memory_space<smem>>
    %250 = arith.index_cast %249 : i32 to index
    %c0_83 = arith.constant 0 : index
    %251 = vector.load %arg2[%250, %c0_83] : memref<2048x1024xf32, #tpu.memory_space<vmem>>, vector<1x1024xf32>
    %c1_i32_84 = arith.constant 1 : i32
    %252 = arith.addi %247, %c1_i32_84 : i32
    %253 = arith.index_cast %252 : i32 to index
    %254 = memref.load %arg1[%253] : memref<256xi32, #tpu.memory_space<smem>>
    %255 = arith.index_cast %254 : i32 to index
    %c0_85 = arith.constant 0 : index
    %256 = vector.load %arg2[%255, %c0_85] : memref<2048x1024xf32, #tpu.memory_space<vmem>>, vector<1x1024xf32>
    %257 = arith.addf %251, %256 : vector<1x1024xf32>
    %c2_i32_86 = arith.constant 2 : i32
    %258 = arith.addi %247, %c2_i32_86 : i32
    %259 = arith.index_cast %258 : i32 to index
    %260 = memref.load %arg1[%259] : memref<256xi32, #tpu.memory_space<smem>>
    %261 = arith.index_cast %260 : i32 to index
    %c0_87 = arith.constant 0 : index
    %262 = vector.load %arg2[%261, %c0_87] : memref<2048x1024xf32, #tpu.memory_space<vmem>>, vector<1x1024xf32>
    %263 = arith.addf %257, %262 : vector<1x1024xf32>
    %c3_i32_88 = arith.constant 3 : i32
    %264 = arith.addi %247, %c3_i32_88 : i32
    %265 = arith.index_cast %264 : i32 to index
    %266 = memref.load %arg1[%265] : memref<256xi32, #tpu.memory_space<smem>>
    %267 = arith.index_cast %266 : i32 to index
    %c0_89 = arith.constant 0 : index
    %268 = vector.load %arg2[%267, %c0_89] : memref<2048x1024xf32, #tpu.memory_space<vmem>>, vector<1x1024xf32>
    %269 = arith.addf %263, %268 : vector<1x1024xf32>
    %c4_i32_90 = arith.constant 4 : i32
    %270 = arith.addi %247, %c4_i32_90 : i32
    %271 = arith.index_cast %270 : i32 to index
    %272 = memref.load %arg1[%271] : memref<256xi32, #tpu.memory_space<smem>>
    %273 = arith.index_cast %272 : i32 to index
    %c0_91 = arith.constant 0 : index
    %274 = vector.load %arg2[%273, %c0_91] : memref<2048x1024xf32, #tpu.memory_space<vmem>>, vector<1x1024xf32>
    %275 = arith.addf %269, %274 : vector<1x1024xf32>
    %c5_i32_92 = arith.constant 5 : i32
    %276 = arith.addi %247, %c5_i32_92 : i32
    %277 = arith.index_cast %276 : i32 to index
    %278 = memref.load %arg1[%277] : memref<256xi32, #tpu.memory_space<smem>>
    %279 = arith.index_cast %278 : i32 to index
    %c0_93 = arith.constant 0 : index
    %280 = vector.load %arg2[%279, %c0_93] : memref<2048x1024xf32, #tpu.memory_space<vmem>>, vector<1x1024xf32>
    %281 = arith.addf %275, %280 : vector<1x1024xf32>
    %c6_i32_94 = arith.constant 6 : i32
    %282 = arith.addi %247, %c6_i32_94 : i32
    %283 = arith.index_cast %282 : i32 to index
    %284 = memref.load %arg1[%283] : memref<256xi32, #tpu.memory_space<smem>>
    %285 = arith.index_cast %284 : i32 to index
    %c0_95 = arith.constant 0 : index
    %286 = vector.load %arg2[%285, %c0_95] : memref<2048x1024xf32, #tpu.memory_space<vmem>>, vector<1x1024xf32>
    %287 = arith.addf %281, %286 : vector<1x1024xf32>
    %c7_i32_96 = arith.constant 7 : i32
    %288 = arith.addi %247, %c7_i32_96 : i32
    %289 = arith.index_cast %288 : i32 to index
    %290 = memref.load %arg1[%289] : memref<256xi32, #tpu.memory_space<smem>>
    %291 = arith.index_cast %290 : i32 to index
    %c0_97 = arith.constant 0 : index
    %292 = vector.load %arg2[%291, %c0_97] : memref<2048x1024xf32, #tpu.memory_space<vmem>>, vector<1x1024xf32>
    %293 = arith.addf %287, %292 : vector<1x1024xf32>
    %c5 = arith.constant 5 : index
    %c0_98 = arith.constant 0 : index
    %294 = vector.load %arg7[%c5, %c0_98] : memref<16x1024xf32, #tpu.memory_space<vmem>>, vector<1x1024xf32>
    tpu.vector_store %arg7[%c5, %c0_98], %293 {strides = array<i32>} : memref<16x1024xf32, #tpu.memory_space<vmem>>, vector<1x1024xf32>,
    %c6_i32_99 = arith.constant 6 : i32
    %295 = arith.addi %0, %c6_i32_99 : i32
    %c8_i32_100 = arith.constant 8 : i32
    %296 = arith.muli %295, %c8_i32_100 : i32
    %297 = arith.index_cast %296 : i32 to index
    %298 = memref.load %arg1[%297] : memref<256xi32, #tpu.memory_space<smem>>
    %299 = arith.index_cast %298 : i32 to index
    %c0_101 = arith.constant 0 : index
    %300 = vector.load %arg2[%299, %c0_101] : memref<2048x1024xf32, #tpu.memory_space<vmem>>, vector<1x1024xf32>
    %c1_i32_102 = arith.constant 1 : i32
    %301 = arith.addi %296, %c1_i32_102 : i32
    %302 = arith.index_cast %301 : i32 to index
    %303 = memref.load %arg1[%302] : memref<256xi32, #tpu.memory_space<smem>>
    %304 = arith.index_cast %303 : i32 to index
    %c0_103 = arith.constant 0 : index
    %305 = vector.load %arg2[%304, %c0_103] : memref<2048x1024xf32, #tpu.memory_space<vmem>>, vector<1x1024xf32>
    %306 = arith.addf %300, %305 : vector<1x1024xf32>
    %c2_i32_104 = arith.constant 2 : i32
    %307 = arith.addi %296, %c2_i32_104 : i32
    %308 = arith.index_cast %307 : i32 to index
    %309 = memref.load %arg1[%308] : memref<256xi32, #tpu.memory_space<smem>>
    %310 = arith.index_cast %309 : i32 to index
    %c0_105 = arith.constant 0 : index
    %311 = vector.load %arg2[%310, %c0_105] : memref<2048x1024xf32, #tpu.memory_space<vmem>>, vector<1x1024xf32>
    %312 = arith.addf %306, %311 : vector<1x1024xf32>
    %c3_i32_106 = arith.constant 3 : i32
    %313 = arith.addi %296, %c3_i32_106 : i32
    %314 = arith.index_cast %313 : i32 to index
    %315 = memref.load %arg1[%314] : memref<256xi32, #tpu.memory_space<smem>>
    %316 = arith.index_cast %315 : i32 to index
    %c0_107 = arith.constant 0 : index
    %317 = vector.load %arg2[%316, %c0_107] : memref<2048x1024xf32, #tpu.memory_space<vmem>>, vector<1x1024xf32>
    %318 = arith.addf %312, %317 : vector<1x1024xf32>
    %c4_i32_108 = arith.constant 4 : i32
    %319 = arith.addi %296, %c4_i32_108 : i32
    %320 = arith.index_cast %319 : i32 to index
    %321 = memref.load %arg1[%320] : memref<256xi32, #tpu.memory_space<smem>>
    %322 = arith.index_cast %321 : i32 to index
    %c0_109 = arith.constant 0 : index
    %323 = vector.load %arg2[%322, %c0_109] : memref<2048x1024xf32, #tpu.memory_space<vmem>>, vector<1x1024xf32>
    %324 = arith.addf %318, %323 : vector<1x1024xf32>
    %c5_i32_110 = arith.constant 5 : i32
    %325 = arith.addi %296, %c5_i32_110 : i32
    %326 = arith.index_cast %325 : i32 to index
    %327 = memref.load %arg1[%326] : memref<256xi32, #tpu.memory_space<smem>>
    %328 = arith.index_cast %327 : i32 to index
    %c0_111 = arith.constant 0 : index
    %329 = vector.load %arg2[%328, %c0_111] : memref<2048x1024xf32, #tpu.memory_space<vmem>>, vector<1x1024xf32>
    %330 = arith.addf %324, %329 : vector<1x1024xf32>
    %c6_i32_112 = arith.constant 6 : i32
    %331 = arith.addi %296, %c6_i32_112 : i32
    %332 = arith.index_cast %331 : i32 to index
    %333 = memref.load %arg1[%332] : memref<256xi32, #tpu.memory_space<smem>>
    %334 = arith.index_cast %333 : i32 to index
    %c0_113 = arith.constant 0 : index
    %335 = vector.load %arg2[%334, %c0_113] : memref<2048x1024xf32, #tpu.memory_space<vmem>>, vector<1x1024xf32>
    %336 = arith.addf %330, %335 : vector<1x1024xf32>
    %c7_i32_114 = arith.constant 7 : i32
    %337 = arith.addi %296, %c7_i32_114 : i32
    %338 = arith.index_cast %337 : i32 to index
    %339 = memref.load %arg1[%338] : memref<256xi32, #tpu.memory_space<smem>>
    %340 = arith.index_cast %339 : i32 to index
    %c0_115 = arith.constant 0 : index
    %341 = vector.load %arg2[%340, %c0_115] : memref<2048x1024xf32, #tpu.memory_space<vmem>>, vector<1x1024xf32>
    %342 = arith.addf %336, %341 : vector<1x1024xf32>
    %c6 = arith.constant 6 : index
    %c0_116 = arith.constant 0 : index
    %343 = vector.load %arg7[%c6, %c0_116] : memref<16x1024xf32, #tpu.memory_space<vmem>>, vector<1x1024xf32>
    tpu.vector_store %arg7[%c6, %c0_116], %342 {strides = array<i32>} : memref<16x1024xf32, #tpu.memory_space<vmem>>, vector<1x1024xf32>,
    %c7_i32_117 = arith.constant 7 : i32
    %344 = arith.addi %0, %c7_i32_117 : i32
    %c8_i32_118 = arith.constant 8 : i32
    %345 = arith.muli %344, %c8_i32_118 : i32
    %346 = arith.index_cast %345 : i32 to index
    %347 = memref.load %arg1[%346] : memref<256xi32, #tpu.memory_space<smem>>
    %348 = arith.index_cast %347 : i32 to index
    %c0_119 = arith.constant 0 : index
    %349 = vector.load %arg2[%348, %c0_119] : memref<2048x1024xf32, #tpu.memory_space<vmem>>, vector<1x1024xf32>
    %c1_i32_120 = arith.constant 1 : i32
    %350 = arith.addi %345, %c1_i32_120 : i32
    %351 = arith.index_cast %350 : i32 to index
    %352 = memref.load %arg1[%351] : memref<256xi32, #tpu.memory_space<smem>>
    %353 = arith.index_cast %352 : i32 to index
    %c0_121 = arith.constant 0 : index
    %354 = vector.load %arg2[%353, %c0_121] : memref<2048x1024xf32, #tpu.memory_space<vmem>>, vector<1x1024xf32>
    %355 = arith.addf %349, %354 : vector<1x1024xf32>
    %c2_i32_122 = arith.constant 2 : i32
    %356 = arith.addi %345, %c2_i32_122 : i32
    %357 = arith.index_cast %356 : i32 to index
    %358 = memref.load %arg1[%357] : memref<256xi32, #tpu.memory_space<smem>>
    %359 = arith.index_cast %358 : i32 to index
    %c0_123 = arith.constant 0 : index
    %360 = vector.load %arg2[%359, %c0_123] : memref<2048x1024xf32, #tpu.memory_space<vmem>>, vector<1x1024xf32>
    %361 = arith.addf %355, %360 : vector<1x1024xf32>
    %c3_i32_124 = arith.constant 3 : i32
    %362 = arith.addi %345, %c3_i32_124 : i32
    %363 = arith.index_cast %362 : i32 to index
    %364 = memref.load %arg1[%363] : memref<256xi32, #tpu.memory_space<smem>>
    %365 = arith.index_cast %364 : i32 to index
    %c0_125 = arith.constant 0 : index
    %366 = vector.load %arg2[%365, %c0_125] : memref<2048x1024xf32, #tpu.memory_space<vmem>>, vector<1x1024xf32>
    %367 = arith.addf %361, %366 : vector<1x1024xf32>
    %c4_i32_126 = arith.constant 4 : i32
    %368 = arith.addi %345, %c4_i32_126 : i32
    %369 = arith.index_cast %368 : i32 to index
    %370 = memref.load %arg1[%369] : memref<256xi32, #tpu.memory_space<smem>>
    %371 = arith.index_cast %370 : i32 to index
    %c0_127 = arith.constant 0 : index
    %372 = vector.load %arg2[%371, %c0_127] : memref<2048x1024xf32, #tpu.memory_space<vmem>>, vector<1x1024xf32>
    %373 = arith.addf %367, %372 : vector<1x1024xf32>
    %c5_i32_128 = arith.constant 5 : i32
    %374 = arith.addi %345, %c5_i32_128 : i32
    %375 = arith.index_cast %374 : i32 to index
    %376 = memref.load %arg1[%375] : memref<256xi32, #tpu.memory_space<smem>>
    %377 = arith.index_cast %376 : i32 to index
    %c0_129 = arith.constant 0 : index
    %378 = vector.load %arg2[%377, %c0_129] : memref<2048x1024xf32, #tpu.memory_space<vmem>>, vector<1x1024xf32>
    %379 = arith.addf %373, %378 : vector<1x1024xf32>
    %c6_i32_130 = arith.constant 6 : i32
    %380 = arith.addi %345, %c6_i32_130 : i32
    %381 = arith.index_cast %380 : i32 to index
    %382 = memref.load %arg1[%381] : memref<256xi32, #tpu.memory_space<smem>>
    %383 = arith.index_cast %382 : i32 to index
    %c0_131 = arith.constant 0 : index
    %384 = vector.load %arg2[%383, %c0_131] : memref<2048x1024xf32, #tpu.memory_space<vmem>>, vector<1x1024xf32>
    %385 = arith.addf %379, %384 : vector<1x1024xf32>
    %c7_i32_132 = arith.constant 7 : i32
    %386 = arith.addi %345, %c7_i32_132 : i32
    %387 = arith.index_cast %386 : i32 to index
    %388 = memref.load %arg1[%387] : memref<256xi32, #tpu.memory_space<smem>>
    %389 = arith.index_cast %388 : i32 to index
    %c0_133 = arith.constant 0 : index
    %390 = vector.load %arg2[%389, %c0_133] : memref<2048x1024xf32, #tpu.memory_space<vmem>>, vector<1x1024xf32>
    %391 = arith.addf %385, %390 : vector<1x1024xf32>
    %c7 = arith.constant 7 : index
    %c0_134 = arith.constant 0 : index
    %392 = vector.load %arg7[%c7, %c0_134] : memref<16x1024xf32, #tpu.memory_space<vmem>>, vector<1x1024xf32>
    tpu.vector_store %arg7[%c7, %c0_134], %391 {strides = array<i32>} : memref<16x1024xf32, #tpu.memory_space<vmem>>, vector<1x1024xf32>,
    %c8_i32_135 = arith.constant 8 : i32
    %393 = arith.addi %0, %c8_i32_135 : i32
    %c8_i32_136 = arith.constant 8 : i32
    %394 = arith.muli %393, %c8_i32_136 : i32
    %395 = arith.index_cast %394 : i32 to index
    %396 = memref.load %arg1[%395] : memref<256xi32, #tpu.memory_space<smem>>
    %397 = arith.index_cast %396 : i32 to index
    %c0_137 = arith.constant 0 : index
    %398 = vector.load %arg2[%397, %c0_137] : memref<2048x1024xf32, #tpu.memory_space<vmem>>, vector<1x1024xf32>
    %c1_i32_138 = arith.constant 1 : i32
    %399 = arith.addi %394, %c1_i32_138 : i32
    %400 = arith.index_cast %399 : i32 to index
    %401 = memref.load %arg1[%400] : memref<256xi32, #tpu.memory_space<smem>>
    %402 = arith.index_cast %401 : i32 to index
    %c0_139 = arith.constant 0 : index
    %403 = vector.load %arg2[%402, %c0_139] : memref<2048x1024xf32, #tpu.memory_space<vmem>>, vector<1x1024xf32>
    %404 = arith.addf %398, %403 : vector<1x1024xf32>
    %c2_i32_140 = arith.constant 2 : i32
    %405 = arith.addi %394, %c2_i32_140 : i32
    %406 = arith.index_cast %405 : i32 to index
    %407 = memref.load %arg1[%406] : memref<256xi32, #tpu.memory_space<smem>>
    %408 = arith.index_cast %407 : i32 to index
    %c0_141 = arith.constant 0 : index
    %409 = vector.load %arg2[%408, %c0_141] : memref<2048x1024xf32, #tpu.memory_space<vmem>>, vector<1x1024xf32>
    %410 = arith.addf %404, %409 : vector<1x1024xf32>
    %c3_i32_142 = arith.constant 3 : i32
    %411 = arith.addi %394, %c3_i32_142 : i32
    %412 = arith.index_cast %411 : i32 to index
    %413 = memref.load %arg1[%412] : memref<256xi32, #tpu.memory_space<smem>>
    %414 = arith.index_cast %413 : i32 to index
    %c0_143 = arith.constant 0 : index
    %415 = vector.load %arg2[%414, %c0_143] : memref<2048x1024xf32, #tpu.memory_space<vmem>>, vector<1x1024xf32>
    %416 = arith.addf %410, %415 : vector<1x1024xf32>
    %c4_i32_144 = arith.constant 4 : i32
    %417 = arith.addi %394, %c4_i32_144 : i32
    %418 = arith.index_cast %417 : i32 to index
    %419 = memref.load %arg1[%418] : memref<256xi32, #tpu.memory_space<smem>>
    %420 = arith.index_cast %419 : i32 to index
    %c0_145 = arith.constant 0 : index
    %421 = vector.load %arg2[%420, %c0_145] : memref<2048x1024xf32, #tpu.memory_space<vmem>>, vector<1x1024xf32>
    %422 = arith.addf %416, %421 : vector<1x1024xf32>
    %c5_i32_146 = arith.constant 5 : i32
    %423 = arith.addi %394, %c5_i32_146 : i32
    %424 = arith.index_cast %423 : i32 to index
    %425 = memref.load %arg1[%424] : memref<256xi32, #tpu.memory_space<smem>>
    %426 = arith.index_cast %425 : i32 to index
    %c0_147 = arith.constant 0 : index
    %427 = vector.load %arg2[%426, %c0_147] : memref<2048x1024xf32, #tpu.memory_space<vmem>>, vector<1x1024xf32>
    %428 = arith.addf %422, %427 : vector<1x1024xf32>
    %c6_i32_148 = arith.constant 6 : i32
    %429 = arith.addi %394, %c6_i32_148 : i32
    %430 = arith.index_cast %429 : i32 to index
    %431 = memref.load %arg1[%430] : memref<256xi32, #tpu.memory_space<smem>>
    %432 = arith.index_cast %431 : i32 to index
    %c0_149 = arith.constant 0 : index
    %433 = vector.load %arg2[%432, %c0_149] : memref<2048x1024xf32, #tpu.memory_space<vmem>>, vector<1x1024xf32>
    %434 = arith.addf %428, %433 : vector<1x1024xf32>
    %c7_i32_150 = arith.constant 7 : i32
    %435 = arith.addi %394, %c7_i32_150 : i32
    %436 = arith.index_cast %435 : i32 to index
    %437 = memref.load %arg1[%436] : memref<256xi32, #tpu.memory_space<smem>>
    %438 = arith.index_cast %437 : i32 to index
    %c0_151 = arith.constant 0 : index
    %439 = vector.load %arg2[%438, %c0_151] : memref<2048x1024xf32, #tpu.memory_space<vmem>>, vector<1x1024xf32>
    %440 = arith.addf %434, %439 : vector<1x1024xf32>
    %c8 = arith.constant 8 : index
    %c0_152 = arith.constant 0 : index
    %441 = vector.load %arg7[%c8, %c0_152] : memref<16x1024xf32, #tpu.memory_space<vmem>>, vector<1x1024xf32>
    tpu.vector_store %arg7[%c8, %c0_152], %440 {strides = array<i32>} : memref<16x1024xf32, #tpu.memory_space<vmem>>, vector<1x1024xf32>,
    %c9_i32 = arith.constant 9 : i32
    %442 = arith.addi %0, %c9_i32 : i32
    %c8_i32_153 = arith.constant 8 : i32
    %443 = arith.muli %442, %c8_i32_153 : i32
    %444 = arith.index_cast %443 : i32 to index
    %445 = memref.load %arg1[%444] : memref<256xi32, #tpu.memory_space<smem>>
    %446 = arith.index_cast %445 : i32 to index
    %c0_154 = arith.constant 0 : index
    %447 = vector.load %arg2[%446, %c0_154] : memref<2048x1024xf32, #tpu.memory_space<vmem>>, vector<1x1024xf32>
    %c1_i32_155 = arith.constant 1 : i32
    %448 = arith.addi %443, %c1_i32_155 : i32
    %449 = arith.index_cast %448 : i32 to index
    %450 = memref.load %arg1[%449] : memref<256xi32, #tpu.memory_space<smem>>
    %451 = arith.index_cast %450 : i32 to index
    %c0_156 = arith.constant 0 : index
    %452 = vector.load %arg2[%451, %c0_156] : memref<2048x1024xf32, #tpu.memory_space<vmem>>, vector<1x1024xf32>
    %453 = arith.addf %447, %452 : vector<1x1024xf32>
    %c2_i32_157 = arith.constant 2 : i32
    %454 = arith.addi %443, %c2_i32_157 : i32
    %455 = arith.index_cast %454 : i32 to index
    %456 = memref.load %arg1[%455] : memref<256xi32, #tpu.memory_space<smem>>
    %457 = arith.index_cast %456 : i32 to index
    %c0_158 = arith.constant 0 : index
    %458 = vector.load %arg2[%457, %c0_158] : memref<2048x1024xf32, #tpu.memory_space<vmem>>, vector<1x1024xf32>
    %459 = arith.addf %453, %458 : vector<1x1024xf32>
    %c3_i32_159 = arith.constant 3 : i32
    %460 = arith.addi %443, %c3_i32_159 : i32
    %461 = arith.index_cast %460 : i32 to index
    %462 = memref.load %arg1[%461] : memref<256xi32, #tpu.memory_space<smem>>
    %463 = arith.index_cast %462 : i32 to index
    %c0_160 = arith.constant 0 : index
    %464 = vector.load %arg2[%463, %c0_160] : memref<2048x1024xf32, #tpu.memory_space<vmem>>, vector<1x1024xf32>
    %465 = arith.addf %459, %464 : vector<1x1024xf32>
    %c4_i32_161 = arith.constant 4 : i32
    %466 = arith.addi %443, %c4_i32_161 : i32
    %467 = arith.index_cast %466 : i32 to index
    %468 = memref.load %arg1[%467] : memref<256xi32, #tpu.memory_space<smem>>
    %469 = arith.index_cast %468 : i32 to index
    %c0_162 = arith.constant 0 : index
    %470 = vector.load %arg2[%469, %c0_162] : memref<2048x1024xf32, #tpu.memory_space<vmem>>, vector<1x1024xf32>
    %471 = arith.addf %465, %470 : vector<1x1024xf32>
    %c5_i32_163 = arith.constant 5 : i32
    %472 = arith.addi %443, %c5_i32_163 : i32
    %473 = arith.index_cast %472 : i32 to index
    %474 = memref.load %arg1[%473] : memref<256xi32, #tpu.memory_space<smem>>
    %475 = arith.index_cast %474 : i32 to index
    %c0_164 = arith.constant 0 : index
    %476 = vector.load %arg2[%475, %c0_164] : memref<2048x1024xf32, #tpu.memory_space<vmem>>, vector<1x1024xf32>
    %477 = arith.addf %471, %476 : vector<1x1024xf32>
    %c6_i32_165 = arith.constant 6 : i32
    %478 = arith.addi %443, %c6_i32_165 : i32
    %479 = arith.index_cast %478 : i32 to index
    %480 = memref.load %arg1[%479] : memref<256xi32, #tpu.memory_space<smem>>
    %481 = arith.index_cast %480 : i32 to index
    %c0_166 = arith.constant 0 : index
    %482 = vector.load %arg2[%481, %c0_166] : memref<2048x1024xf32, #tpu.memory_space<vmem>>, vector<1x1024xf32>
    %483 = arith.addf %477, %482 : vector<1x1024xf32>
    %c7_i32_167 = arith.constant 7 : i32
    %484 = arith.addi %443, %c7_i32_167 : i32
    %485 = arith.index_cast %484 : i32 to index
    %486 = memref.load %arg1[%485] : memref<256xi32, #tpu.memory_space<smem>>
    %487 = arith.index_cast %486 : i32 to index
    %c0_168 = arith.constant 0 : index
    %488 = vector.load %arg2[%487, %c0_168] : memref<2048x1024xf32, #tpu.memory_space<vmem>>, vector<1x1024xf32>
    %489 = arith.addf %483, %488 : vector<1x1024xf32>
    %c9 = arith.constant 9 : index
    %c0_169 = arith.constant 0 : index
    %490 = vector.load %arg7[%c9, %c0_169] : memref<16x1024xf32, #tpu.memory_space<vmem>>, vector<1x1024xf32>
    tpu.vector_store %arg7[%c9, %c0_169], %489 {strides = array<i32>} : memref<16x1024xf32, #tpu.memory_space<vmem>>, vector<1x1024xf32>,
    %c10_i32 = arith.constant 10 : i32
    %491 = arith.addi %0, %c10_i32 : i32
    %c8_i32_170 = arith.constant 8 : i32
    %492 = arith.muli %491, %c8_i32_170 : i32
    %493 = arith.index_cast %492 : i32 to index
    %494 = memref.load %arg1[%493] : memref<256xi32, #tpu.memory_space<smem>>
    %495 = arith.index_cast %494 : i32 to index
    %c0_171 = arith.constant 0 : index
    %496 = vector.load %arg2[%495, %c0_171] : memref<2048x1024xf32, #tpu.memory_space<vmem>>, vector<1x1024xf32>
    %c1_i32_172 = arith.constant 1 : i32
    %497 = arith.addi %492, %c1_i32_172 : i32
    %498 = arith.index_cast %497 : i32 to index
    %499 = memref.load %arg1[%498] : memref<256xi32, #tpu.memory_space<smem>>
    %500 = arith.index_cast %499 : i32 to index
    %c0_173 = arith.constant 0 : index
    %501 = vector.load %arg2[%500, %c0_173] : memref<2048x1024xf32, #tpu.memory_space<vmem>>, vector<1x1024xf32>
    %502 = arith.addf %496, %501 : vector<1x1024xf32>
    %c2_i32_174 = arith.constant 2 : i32
    %503 = arith.addi %492, %c2_i32_174 : i32
    %504 = arith.index_cast %503 : i32 to index
    %505 = memref.load %arg1[%504] : memref<256xi32, #tpu.memory_space<smem>>
    %506 = arith.index_cast %505 : i32 to index
    %c0_175 = arith.constant 0 : index
    %507 = vector.load %arg2[%506, %c0_175] : memref<2048x1024xf32, #tpu.memory_space<vmem>>, vector<1x1024xf32>
    %508 = arith.addf %502, %507 : vector<1x1024xf32>
    %c3_i32_176 = arith.constant 3 : i32
    %509 = arith.addi %492, %c3_i32_176 : i32
    %510 = arith.index_cast %509 : i32 to index
    %511 = memref.load %arg1[%510] : memref<256xi32, #tpu.memory_space<smem>>
    %512 = arith.index_cast %511 : i32 to index
    %c0_177 = arith.constant 0 : index
    %513 = vector.load %arg2[%512, %c0_177] : memref<2048x1024xf32, #tpu.memory_space<vmem>>, vector<1x1024xf32>
    %514 = arith.addf %508, %513 : vector<1x1024xf32>
    %c4_i32_178 = arith.constant 4 : i32
    %515 = arith.addi %492, %c4_i32_178 : i32
    %516 = arith.index_cast %515 : i32 to index
    %517 = memref.load %arg1[%516] : memref<256xi32, #tpu.memory_space<smem>>
    %518 = arith.index_cast %517 : i32 to index
    %c0_179 = arith.constant 0 : index
    %519 = vector.load %arg2[%518, %c0_179] : memref<2048x1024xf32, #tpu.memory_space<vmem>>, vector<1x1024xf32>
    %520 = arith.addf %514, %519 : vector<1x1024xf32>
    %c5_i32_180 = arith.constant 5 : i32
    %521 = arith.addi %492, %c5_i32_180 : i32
    %522 = arith.index_cast %521 : i32 to index
    %523 = memref.load %arg1[%522] : memref<256xi32, #tpu.memory_space<smem>>
    %524 = arith.index_cast %523 : i32 to index
    %c0_181 = arith.constant 0 : index
    %525 = vector.load %arg2[%524, %c0_181] : memref<2048x1024xf32, #tpu.memory_space<vmem>>, vector<1x1024xf32>
    %526 = arith.addf %520, %525 : vector<1x1024xf32>
    %c6_i32_182 = arith.constant 6 : i32
    %527 = arith.addi %492, %c6_i32_182 : i32
    %528 = arith.index_cast %527 : i32 to index
    %529 = memref.load %arg1[%528] : memref<256xi32, #tpu.memory_space<smem>>
    %530 = arith.index_cast %529 : i32 to index
    %c0_183 = arith.constant 0 : index
    %531 = vector.load %arg2[%530, %c0_183] : memref<2048x1024xf32, #tpu.memory_space<vmem>>, vector<1x1024xf32>
    %532 = arith.addf %526, %531 : vector<1x1024xf32>
    %c7_i32_184 = arith.constant 7 : i32
    %533 = arith.addi %492, %c7_i32_184 : i32
    %534 = arith.index_cast %533 : i32 to index
    %535 = memref.load %arg1[%534] : memref<256xi32, #tpu.memory_space<smem>>
    %536 = arith.index_cast %535 : i32 to index
    %c0_185 = arith.constant 0 : index
    %537 = vector.load %arg2[%536, %c0_185] : memref<2048x1024xf32, #tpu.memory_space<vmem>>, vector<1x1024xf32>
    %538 = arith.addf %532, %537 : vector<1x1024xf32>
    %c10 = arith.constant 10 : index
    %c0_186 = arith.constant 0 : index
    %539 = vector.load %arg7[%c10, %c0_186] : memref<16x1024xf32, #tpu.memory_space<vmem>>, vector<1x1024xf32>
    tpu.vector_store %arg7[%c10, %c0_186], %538 {strides = array<i32>} : memref<16x1024xf32, #tpu.memory_space<vmem>>, vector<1x1024xf32>,
    %c11_i32 = arith.constant 11 : i32
    %540 = arith.addi %0, %c11_i32 : i32
    %c8_i32_187 = arith.constant 8 : i32
    %541 = arith.muli %540, %c8_i32_187 : i32
    %542 = arith.index_cast %541 : i32 to index
    %543 = memref.load %arg1[%542] : memref<256xi32, #tpu.memory_space<smem>>
    %544 = arith.index_cast %543 : i32 to index
    %c0_188 = arith.constant 0 : index
    %545 = vector.load %arg2[%544, %c0_188] : memref<2048x1024xf32, #tpu.memory_space<vmem>>, vector<1x1024xf32>
    %c1_i32_189 = arith.constant 1 : i32
    %546 = arith.addi %541, %c1_i32_189 : i32
    %547 = arith.index_cast %546 : i32 to index
    %548 = memref.load %arg1[%547] : memref<256xi32, #tpu.memory_space<smem>>
    %549 = arith.index_cast %548 : i32 to index
    %c0_190 = arith.constant 0 : index
    %550 = vector.load %arg2[%549, %c0_190] : memref<2048x1024xf32, #tpu.memory_space<vmem>>, vector<1x1024xf32>
    %551 = arith.addf %545, %550 : vector<1x1024xf32>
    %c2_i32_191 = arith.constant 2 : i32
    %552 = arith.addi %541, %c2_i32_191 : i32
    %553 = arith.index_cast %552 : i32 to index
    %554 = memref.load %arg1[%553] : memref<256xi32, #tpu.memory_space<smem>>
    %555 = arith.index_cast %554 : i32 to index
    %c0_192 = arith.constant 0 : index
    %556 = vector.load %arg2[%555, %c0_192] : memref<2048x1024xf32, #tpu.memory_space<vmem>>, vector<1x1024xf32>
    %557 = arith.addf %551, %556 : vector<1x1024xf32>
    %c3_i32_193 = arith.constant 3 : i32
    %558 = arith.addi %541, %c3_i32_193 : i32
    %559 = arith.index_cast %558 : i32 to index
    %560 = memref.load %arg1[%559] : memref<256xi32, #tpu.memory_space<smem>>
    %561 = arith.index_cast %560 : i32 to index
    %c0_194 = arith.constant 0 : index
    %562 = vector.load %arg2[%561, %c0_194] : memref<2048x1024xf32, #tpu.memory_space<vmem>>, vector<1x1024xf32>
    %563 = arith.addf %557, %562 : vector<1x1024xf32>
    %c4_i32_195 = arith.constant 4 : i32
    %564 = arith.addi %541, %c4_i32_195 : i32
    %565 = arith.index_cast %564 : i32 to index
    %566 = memref.load %arg1[%565] : memref<256xi32, #tpu.memory_space<smem>>
    %567 = arith.index_cast %566 : i32 to index
    %c0_196 = arith.constant 0 : index
    %568 = vector.load %arg2[%567, %c0_196] : memref<2048x1024xf32, #tpu.memory_space<vmem>>, vector<1x1024xf32>
    %569 = arith.addf %563, %568 : vector<1x1024xf32>
    %c5_i32_197 = arith.constant 5 : i32
    %570 = arith.addi %541, %c5_i32_197 : i32
    %571 = arith.index_cast %570 : i32 to index
    %572 = memref.load %arg1[%571] : memref<256xi32, #tpu.memory_space<smem>>
    %573 = arith.index_cast %572 : i32 to index
    %c0_198 = arith.constant 0 : index
    %574 = vector.load %arg2[%573, %c0_198] : memref<2048x1024xf32, #tpu.memory_space<vmem>>, vector<1x1024xf32>
    %575 = arith.addf %569, %574 : vector<1x1024xf32>
    %c6_i32_199 = arith.constant 6 : i32
    %576 = arith.addi %541, %c6_i32_199 : i32
    %577 = arith.index_cast %576 : i32 to index
    %578 = memref.load %arg1[%577] : memref<256xi32, #tpu.memory_space<smem>>
    %579 = arith.index_cast %578 : i32 to index
    %c0_200 = arith.constant 0 : index
    %580 = vector.load %arg2[%579, %c0_200] : memref<2048x1024xf32, #tpu.memory_space<vmem>>, vector<1x1024xf32>
    %581 = arith.addf %575, %580 : vector<1x1024xf32>
    %c7_i32_201 = arith.constant 7 : i32
    %582 = arith.addi %541, %c7_i32_201 : i32
    %583 = arith.index_cast %582 : i32 to index
    %584 = memref.load %arg1[%583] : memref<256xi32, #tpu.memory_space<smem>>
    %585 = arith.index_cast %584 : i32 to index
    %c0_202 = arith.constant 0 : index
    %586 = vector.load %arg2[%585, %c0_202] : memref<2048x1024xf32, #tpu.memory_space<vmem>>, vector<1x1024xf32>
    %587 = arith.addf %581, %586 : vector<1x1024xf32>
    %c11 = arith.constant 11 : index
    %c0_203 = arith.constant 0 : index
    %588 = vector.load %arg7[%c11, %c0_203] : memref<16x1024xf32, #tpu.memory_space<vmem>>, vector<1x1024xf32>
    tpu.vector_store %arg7[%c11, %c0_203], %587 {strides = array<i32>} : memref<16x1024xf32, #tpu.memory_space<vmem>>, vector<1x1024xf32>,
    %c12_i32 = arith.constant 12 : i32
    %589 = arith.addi %0, %c12_i32 : i32
    %c8_i32_204 = arith.constant 8 : i32
    %590 = arith.muli %589, %c8_i32_204 : i32
    %591 = arith.index_cast %590 : i32 to index
    %592 = memref.load %arg1[%591] : memref<256xi32, #tpu.memory_space<smem>>
    %593 = arith.index_cast %592 : i32 to index
    %c0_205 = arith.constant 0 : index
    %594 = vector.load %arg2[%593, %c0_205] : memref<2048x1024xf32, #tpu.memory_space<vmem>>, vector<1x1024xf32>
    %c1_i32_206 = arith.constant 1 : i32
    %595 = arith.addi %590, %c1_i32_206 : i32
    %596 = arith.index_cast %595 : i32 to index
    %597 = memref.load %arg1[%596] : memref<256xi32, #tpu.memory_space<smem>>
    %598 = arith.index_cast %597 : i32 to index
    %c0_207 = arith.constant 0 : index
    %599 = vector.load %arg2[%598, %c0_207] : memref<2048x1024xf32, #tpu.memory_space<vmem>>, vector<1x1024xf32>
    %600 = arith.addf %594, %599 : vector<1x1024xf32>
    %c2_i32_208 = arith.constant 2 : i32
    %601 = arith.addi %590, %c2_i32_208 : i32
    %602 = arith.index_cast %601 : i32 to index
    %603 = memref.load %arg1[%602] : memref<256xi32, #tpu.memory_space<smem>>
    %604 = arith.index_cast %603 : i32 to index
    %c0_209 = arith.constant 0 : index
    %605 = vector.load %arg2[%604, %c0_209] : memref<2048x1024xf32, #tpu.memory_space<vmem>>, vector<1x1024xf32>
    %606 = arith.addf %600, %605 : vector<1x1024xf32>
    %c3_i32_210 = arith.constant 3 : i32
    %607 = arith.addi %590, %c3_i32_210 : i32
    %608 = arith.index_cast %607 : i32 to index
    %609 = memref.load %arg1[%608] : memref<256xi32, #tpu.memory_space<smem>>
    %610 = arith.index_cast %609 : i32 to index
    %c0_211 = arith.constant 0 : index
    %611 = vector.load %arg2[%610, %c0_211] : memref<2048x1024xf32, #tpu.memory_space<vmem>>, vector<1x1024xf32>
    %612 = arith.addf %606, %611 : vector<1x1024xf32>
    %c4_i32_212 = arith.constant 4 : i32
    %613 = arith.addi %590, %c4_i32_212 : i32
    %614 = arith.index_cast %613 : i32 to index
    %615 = memref.load %arg1[%614] : memref<256xi32, #tpu.memory_space<smem>>
    %616 = arith.index_cast %615 : i32 to index
    %c0_213 = arith.constant 0 : index
    %617 = vector.load %arg2[%616, %c0_213] : memref<2048x1024xf32, #tpu.memory_space<vmem>>, vector<1x1024xf32>
    %618 = arith.addf %612, %617 : vector<1x1024xf32>
    %c5_i32_214 = arith.constant 5 : i32
    %619 = arith.addi %590, %c5_i32_214 : i32
    %620 = arith.index_cast %619 : i32 to index
    %621 = memref.load %arg1[%620] : memref<256xi32, #tpu.memory_space<smem>>
    %622 = arith.index_cast %621 : i32 to index
    %c0_215 = arith.constant 0 : index
    %623 = vector.load %arg2[%622, %c0_215] : memref<2048x1024xf32, #tpu.memory_space<vmem>>, vector<1x1024xf32>
    %624 = arith.addf %618, %623 : vector<1x1024xf32>
    %c6_i32_216 = arith.constant 6 : i32
    %625 = arith.addi %590, %c6_i32_216 : i32
    %626 = arith.index_cast %625 : i32 to index
    %627 = memref.load %arg1[%626] : memref<256xi32, #tpu.memory_space<smem>>
    %628 = arith.index_cast %627 : i32 to index
    %c0_217 = arith.constant 0 : index
    %629 = vector.load %arg2[%628, %c0_217] : memref<2048x1024xf32, #tpu.memory_space<vmem>>, vector<1x1024xf32>
    %630 = arith.addf %624, %629 : vector<1x1024xf32>
    %c7_i32_218 = arith.constant 7 : i32
    %631 = arith.addi %590, %c7_i32_218 : i32
    %632 = arith.index_cast %631 : i32 to index
    %633 = memref.load %arg1[%632] : memref<256xi32, #tpu.memory_space<smem>>
    %634 = arith.index_cast %633 : i32 to index
    %c0_219 = arith.constant 0 : index
    %635 = vector.load %arg2[%634, %c0_219] : memref<2048x1024xf32, #tpu.memory_space<vmem>>, vector<1x1024xf32>
    %636 = arith.addf %630, %635 : vector<1x1024xf32>
    %c12 = arith.constant 12 : index
    %c0_220 = arith.constant 0 : index
    %637 = vector.load %arg7[%c12, %c0_220] : memref<16x1024xf32, #tpu.memory_space<vmem>>, vector<1x1024xf32>
    tpu.vector_store %arg7[%c12, %c0_220], %636 {strides = array<i32>} : memref<16x1024xf32, #tpu.memory_space<vmem>>, vector<1x1024xf32>,
    %c13_i32 = arith.constant 13 : i32
    %638 = arith.addi %0, %c13_i32 : i32
    %c8_i32_221 = arith.constant 8 : i32
    %639 = arith.muli %638, %c8_i32_221 : i32
    %640 = arith.index_cast %639 : i32 to index
    %641 = memref.load %arg1[%640] : memref<256xi32, #tpu.memory_space<smem>>
    %642 = arith.index_cast %641 : i32 to index
    %c0_222 = arith.constant 0 : index
    %643 = vector.load %arg2[%642, %c0_222] : memref<2048x1024xf32, #tpu.memory_space<vmem>>, vector<1x1024xf32>
    %c1_i32_223 = arith.constant 1 : i32
    %644 = arith.addi %639, %c1_i32_223 : i32
    %645 = arith.index_cast %644 : i32 to index
    %646 = memref.load %arg1[%645] : memref<256xi32, #tpu.memory_space<smem>>
    %647 = arith.index_cast %646 : i32 to index
    %c0_224 = arith.constant 0 : index
    %648 = vector.load %arg2[%647, %c0_224] : memref<2048x1024xf32, #tpu.memory_space<vmem>>, vector<1x1024xf32>
    %649 = arith.addf %643, %648 : vector<1x1024xf32>
    %c2_i32_225 = arith.constant 2 : i32
    %650 = arith.addi %639, %c2_i32_225 : i32
    %651 = arith.index_cast %650 : i32 to index
    %652 = memref.load %arg1[%651] : memref<256xi32, #tpu.memory_space<smem>>
    %653 = arith.index_cast %652 : i32 to index
    %c0_226 = arith.constant 0 : index
    %654 = vector.load %arg2[%653, %c0_226] : memref<2048x1024xf32, #tpu.memory_space<vmem>>, vector<1x1024xf32>
    %655 = arith.addf %649, %654 : vector<1x1024xf32>
    %c3_i32_227 = arith.constant 3 : i32
    %656 = arith.addi %639, %c3_i32_227 : i32
    %657 = arith.index_cast %656 : i32 to index
    %658 = memref.load %arg1[%657] : memref<256xi32, #tpu.memory_space<smem>>
    %659 = arith.index_cast %658 : i32 to index
    %c0_228 = arith.constant 0 : index
    %660 = vector.load %arg2[%659, %c0_228] : memref<2048x1024xf32, #tpu.memory_space<vmem>>, vector<1x1024xf32>
    %661 = arith.addf %655, %660 : vector<1x1024xf32>
    %c4_i32_229 = arith.constant 4 : i32
    %662 = arith.addi %639, %c4_i32_229 : i32
    %663 = arith.index_cast %662 : i32 to index
    %664 = memref.load %arg1[%663] : memref<256xi32, #tpu.memory_space<smem>>
    %665 = arith.index_cast %664 : i32 to index
    %c0_230 = arith.constant 0 : index
    %666 = vector.load %arg2[%665, %c0_230] : memref<2048x1024xf32, #tpu.memory_space<vmem>>, vector<1x1024xf32>
    %667 = arith.addf %661, %666 : vector<1x1024xf32>
    %c5_i32_231 = arith.constant 5 : i32
    %668 = arith.addi %639, %c5_i32_231 : i32
    %669 = arith.index_cast %668 : i32 to index
    %670 = memref.load %arg1[%669] : memref<256xi32, #tpu.memory_space<smem>>
    %671 = arith.index_cast %670 : i32 to index
    %c0_232 = arith.constant 0 : index
    %672 = vector.load %arg2[%671, %c0_232] : memref<2048x1024xf32, #tpu.memory_space<vmem>>, vector<1x1024xf32>
    %673 = arith.addf %667, %672 : vector<1x1024xf32>
    %c6_i32_233 = arith.constant 6 : i32
    %674 = arith.addi %639, %c6_i32_233 : i32
    %675 = arith.index_cast %674 : i32 to index
    %676 = memref.load %arg1[%675] : memref<256xi32, #tpu.memory_space<smem>>
    %677 = arith.index_cast %676 : i32 to index
    %c0_234 = arith.constant 0 : index
    %678 = vector.load %arg2[%677, %c0_234] : memref<2048x1024xf32, #tpu.memory_space<vmem>>, vector<1x1024xf32>
    %679 = arith.addf %673, %678 : vector<1x1024xf32>
    %c7_i32_235 = arith.constant 7 : i32
    %680 = arith.addi %639, %c7_i32_235 : i32
    %681 = arith.index_cast %680 : i32 to index
    %682 = memref.load %arg1[%681] : memref<256xi32, #tpu.memory_space<smem>>
    %683 = arith.index_cast %682 : i32 to index
    %c0_236 = arith.constant 0 : index
    %684 = vector.load %arg2[%683, %c0_236] : memref<2048x1024xf32, #tpu.memory_space<vmem>>, vector<1x1024xf32>
    %685 = arith.addf %679, %684 : vector<1x1024xf32>
    %c13 = arith.constant 13 : index
    %c0_237 = arith.constant 0 : index
    %686 = vector.load %arg7[%c13, %c0_237] : memref<16x1024xf32, #tpu.memory_space<vmem>>, vector<1x1024xf32>
    tpu.vector_store %arg7[%c13, %c0_237], %685 {strides = array<i32>} : memref<16x1024xf32, #tpu.memory_space<vmem>>, vector<1x1024xf32>,
    %c14_i32 = arith.constant 14 : i32
    %687 = arith.addi %0, %c14_i32 : i32
    %c8_i32_238 = arith.constant 8 : i32
    %688 = arith.muli %687, %c8_i32_238 : i32
    %689 = arith.index_cast %688 : i32 to index
    %690 = memref.load %arg1[%689] : memref<256xi32, #tpu.memory_space<smem>>
    %691 = arith.index_cast %690 : i32 to index
    %c0_239 = arith.constant 0 : index
    %692 = vector.load %arg2[%691, %c0_239] : memref<2048x1024xf32, #tpu.memory_space<vmem>>, vector<1x1024xf32>
    %c1_i32_240 = arith.constant 1 : i32
    %693 = arith.addi %688, %c1_i32_240 : i32
    %694 = arith.index_cast %693 : i32 to index
    %695 = memref.load %arg1[%694] : memref<256xi32, #tpu.memory_space<smem>>
    %696 = arith.index_cast %695 : i32 to index
    %c0_241 = arith.constant 0 : index
    %697 = vector.load %arg2[%696, %c0_241] : memref<2048x1024xf32, #tpu.memory_space<vmem>>, vector<1x1024xf32>
    %698 = arith.addf %692, %697 : vector<1x1024xf32>
    %c2_i32_242 = arith.constant 2 : i32
    %699 = arith.addi %688, %c2_i32_242 : i32
    %700 = arith.index_cast %699 : i32 to index
    %701 = memref.load %arg1[%700] : memref<256xi32, #tpu.memory_space<smem>>
    %702 = arith.index_cast %701 : i32 to index
    %c0_243 = arith.constant 0 : index
    %703 = vector.load %arg2[%702, %c0_243] : memref<2048x1024xf32, #tpu.memory_space<vmem>>, vector<1x1024xf32>
    %704 = arith.addf %698, %703 : vector<1x1024xf32>
    %c3_i32_244 = arith.constant 3 : i32
    %705 = arith.addi %688, %c3_i32_244 : i32
    %706 = arith.index_cast %705 : i32 to index
    %707 = memref.load %arg1[%706] : memref<256xi32, #tpu.memory_space<smem>>
    %708 = arith.index_cast %707 : i32 to index
    %c0_245 = arith.constant 0 : index
    %709 = vector.load %arg2[%708, %c0_245] : memref<2048x1024xf32, #tpu.memory_space<vmem>>, vector<1x1024xf32>
    %710 = arith.addf %704, %709 : vector<1x1024xf32>
    %c4_i32_246 = arith.constant 4 : i32
    %711 = arith.addi %688, %c4_i32_246 : i32
    %712 = arith.index_cast %711 : i32 to index
    %713 = memref.load %arg1[%712] : memref<256xi32, #tpu.memory_space<smem>>
    %714 = arith.index_cast %713 : i32 to index
    %c0_247 = arith.constant 0 : index
    %715 = vector.load %arg2[%714, %c0_247] : memref<2048x1024xf32, #tpu.memory_space<vmem>>, vector<1x1024xf32>
    %716 = arith.addf %710, %715 : vector<1x1024xf32>
    %c5_i32_248 = arith.constant 5 : i32
    %717 = arith.addi %688, %c5_i32_248 : i32
    %718 = arith.index_cast %717 : i32 to index
    %719 = memref.load %arg1[%718] : memref<256xi32, #tpu.memory_space<smem>>
    %720 = arith.index_cast %719 : i32 to index
    %c0_249 = arith.constant 0 : index
    %721 = vector.load %arg2[%720, %c0_249] : memref<2048x1024xf32, #tpu.memory_space<vmem>>, vector<1x1024xf32>
    %722 = arith.addf %716, %721 : vector<1x1024xf32>
    %c6_i32_250 = arith.constant 6 : i32
    %723 = arith.addi %688, %c6_i32_250 : i32
    %724 = arith.index_cast %723 : i32 to index
    %725 = memref.load %arg1[%724] : memref<256xi32, #tpu.memory_space<smem>>
    %726 = arith.index_cast %725 : i32 to index
    %c0_251 = arith.constant 0 : index
    %727 = vector.load %arg2[%726, %c0_251] : memref<2048x1024xf32, #tpu.memory_space<vmem>>, vector<1x1024xf32>
    %728 = arith.addf %722, %727 : vector<1x1024xf32>
    %c7_i32_252 = arith.constant 7 : i32
    %729 = arith.addi %688, %c7_i32_252 : i32
    %730 = arith.index_cast %729 : i32 to index
    %731 = memref.load %arg1[%730] : memref<256xi32, #tpu.memory_space<smem>>
    %732 = arith.index_cast %731 : i32 to index
    %c0_253 = arith.constant 0 : index
    %733 = vector.load %arg2[%732, %c0_253] : memref<2048x1024xf32, #tpu.memory_space<vmem>>, vector<1x1024xf32>
    %734 = arith.addf %728, %733 : vector<1x1024xf32>
    %c14 = arith.constant 14 : index
    %c0_254 = arith.constant 0 : index
    %735 = vector.load %arg7[%c14, %c0_254] : memref<16x1024xf32, #tpu.memory_space<vmem>>, vector<1x1024xf32>
    tpu.vector_store %arg7[%c14, %c0_254], %734 {strides = array<i32>} : memref<16x1024xf32, #tpu.memory_space<vmem>>, vector<1x1024xf32>,
    %c15_i32 = arith.constant 15 : i32
    %736 = arith.addi %0, %c15_i32 : i32
    %c8_i32_255 = arith.constant 8 : i32
    %737 = arith.muli %736, %c8_i32_255 : i32
    %738 = arith.index_cast %737 : i32 to index
    %739 = memref.load %arg1[%738] : memref<256xi32, #tpu.memory_space<smem>>
    %740 = arith.index_cast %739 : i32 to index
    %c0_256 = arith.constant 0 : index
    %741 = vector.load %arg2[%740, %c0_256] : memref<2048x1024xf32, #tpu.memory_space<vmem>>, vector<1x1024xf32>
    %c1_i32_257 = arith.constant 1 : i32
    %742 = arith.addi %737, %c1_i32_257 : i32
    %743 = arith.index_cast %742 : i32 to index
    %744 = memref.load %arg1[%743] : memref<256xi32, #tpu.memory_space<smem>>
    %745 = arith.index_cast %744 : i32 to index
    %c0_258 = arith.constant 0 : index
    %746 = vector.load %arg2[%745, %c0_258] : memref<2048x1024xf32, #tpu.memory_space<vmem>>, vector<1x1024xf32>
    %747 = arith.addf %741, %746 : vector<1x1024xf32>
    %c2_i32_259 = arith.constant 2 : i32
    %748 = arith.addi %737, %c2_i32_259 : i32
    %749 = arith.index_cast %748 : i32 to index
    %750 = memref.load %arg1[%749] : memref<256xi32, #tpu.memory_space<smem>>
    %751 = arith.index_cast %750 : i32 to index
    %c0_260 = arith.constant 0 : index
    %752 = vector.load %arg2[%751, %c0_260] : memref<2048x1024xf32, #tpu.memory_space<vmem>>, vector<1x1024xf32>
    %753 = arith.addf %747, %752 : vector<1x1024xf32>
    %c3_i32_261 = arith.constant 3 : i32
    %754 = arith.addi %737, %c3_i32_261 : i32
    %755 = arith.index_cast %754 : i32 to index
    %756 = memref.load %arg1[%755] : memref<256xi32, #tpu.memory_space<smem>>
    %757 = arith.index_cast %756 : i32 to index
    %c0_262 = arith.constant 0 : index
    %758 = vector.load %arg2[%757, %c0_262] : memref<2048x1024xf32, #tpu.memory_space<vmem>>, vector<1x1024xf32>
    %759 = arith.addf %753, %758 : vector<1x1024xf32>
    %c4_i32_263 = arith.constant 4 : i32
    %760 = arith.addi %737, %c4_i32_263 : i32
    %761 = arith.index_cast %760 : i32 to index
    %762 = memref.load %arg1[%761] : memref<256xi32, #tpu.memory_space<smem>>
    %763 = arith.index_cast %762 : i32 to index
    %c0_264 = arith.constant 0 : index
    %764 = vector.load %arg2[%763, %c0_264] : memref<2048x1024xf32, #tpu.memory_space<vmem>>, vector<1x1024xf32>
    %765 = arith.addf %759, %764 : vector<1x1024xf32>
    %c5_i32_265 = arith.constant 5 : i32
    %766 = arith.addi %737, %c5_i32_265 : i32
    %767 = arith.index_cast %766 : i32 to index
    %768 = memref.load %arg1[%767] : memref<256xi32, #tpu.memory_space<smem>>
    %769 = arith.index_cast %768 : i32 to index
    %c0_266 = arith.constant 0 : index
    %770 = vector.load %arg2[%769, %c0_266] : memref<2048x1024xf32, #tpu.memory_space<vmem>>, vector<1x1024xf32>
    %771 = arith.addf %765, %770 : vector<1x1024xf32>
    %c6_i32_267 = arith.constant 6 : i32
    %772 = arith.addi %737, %c6_i32_267 : i32
    %773 = arith.index_cast %772 : i32 to index
    %774 = memref.load %arg1[%773] : memref<256xi32, #tpu.memory_space<smem>>
    %775 = arith.index_cast %774 : i32 to index
    %c0_268 = arith.constant 0 : index
    %776 = vector.load %arg2[%775, %c0_268] : memref<2048x1024xf32, #tpu.memory_space<vmem>>, vector<1x1024xf32>
    %777 = arith.addf %771, %776 : vector<1x1024xf32>
    %c7_i32_269 = arith.constant 7 : i32
    %778 = arith.addi %737, %c7_i32_269 : i32
    %779 = arith.index_cast %778 : i32 to index
    %780 = memref.load %arg1[%779] : memref<256xi32, #tpu.memory_space<smem>>
    %781 = arith.index_cast %780 : i32 to index
    %c0_270 = arith.constant 0 : index
    %782 = vector.load %arg2[%781, %c0_270] : memref<2048x1024xf32, #tpu.memory_space<vmem>>, vector<1x1024xf32>
    %783 = arith.addf %777, %782 : vector<1x1024xf32>
    %c15 = arith.constant 15 : index
    %c0_271 = arith.constant 0 : index
    %784 = vector.load %arg7[%c15, %c0_271] : memref<16x1024xf32, #tpu.memory_space<vmem>>, vector<1x1024xf32>
    tpu.vector_store %arg7[%c15, %c0_271], %783 {strides = array<i32>} : memref<16x1024xf32, #tpu.memory_space<vmem>>, vector<1x1024xf32>,
    %c0_272 = arith.constant 0 : index
    %c0_273 = arith.constant 0 : index
    %785 = vector.load %arg7[%c0_272, %c0_273] : memref<16x1024xf32, #tpu.memory_space<vmem>>, vector<16x1024xf32>
    %c0_274 = arith.constant 0 : index
    %c0_275 = arith.constant 0 : index
    %786 = vector.load %arg3[%c0_274, %c0_275] : memref<1x1024xf32, #tpu.memory_space<vmem>>, vector<1x1024xf32>
    %787 = vector.broadcast %786 : vector<1x1024xf32> to vector<16x1024xf32>
    %788 = arith.addf %785, %787 : vector<16x1024xf32>
    %cst = arith.constant 0.000000e+00 : f32
    %789 = vector.broadcast %cst : f32 to vector<16x1024xf32>
    %790 = arith.maximumf %788, %789 : vector<16x1024xf32>
    %c0_276 = arith.constant 0 : index
    %c0_277 = arith.constant 0 : index
    %791 = vector.load %arg4[%c0_276, %c0_277] : memref<1024x128xf32, #tpu.memory_space<vmem>>, vector<1024x128xf32>
    %cst_278 = arith.constant dense<0.000000e+00> : vector<16x128xf32>
    %792 = tpu.matmul %790, %791, %cst_278 {dimension_numbers = #tpu.dot_dimension_numbers<[1], [0], [0], [1], [0, 0, 1, 1], [], []>} : vector<16x1024xf32>, vector<1024x128xf32>, vector<16x128xf32> -> vector<16x128xf32>
    %c0_279 = arith.constant 0 : index
    %c0_280 = arith.constant 0 : index
    %793 = vector.load %arg5[%c0_279, %c0_280] : memref<1x128xf32, #tpu.memory_space<vmem>>, vector<1x128xf32>
    %794 = vector.broadcast %793 : vector<1x128xf32> to vector<16x128xf32>
    %795 = arith.addf %792, %794 : vector<16x128xf32>
    %c0_281 = arith.constant 0 : index
    %c0_282 = arith.constant 0 : index
    %796 = vector.load %arg6[%c0_281, %c0_282] : memref<16x128xf32, #tpu.memory_space<vmem>>, vector<16x128xf32>
    tpu.vector_store %arg6[%c0_281, %c0_282], %795 {strides = array<i32>} : memref<16x128xf32, #tpu.memory_space<vmem>>, vector<16x128xf32>,
    return
  }
  func.func @transform_0(%arg0: i32, %arg1: memref<256xi32, #tpu.memory_space<smem>>) -> (i32, i32) {
    %c0_i32 = arith.constant 0 : i32
    %c0_i32_0 = arith.constant 0 : i32
    %c0_i32_1 = arith.constant 0 : i32
    return %c0_i32, %c0_i32_0 : i32, i32
  }
  func.func @transform_1(%arg0: i32, %arg1: memref<256xi32, #tpu.memory_space<smem>>) -> (i32, i32) {
    %c0_i32 = arith.constant 0 : i32
    %c0_i32_0 = arith.constant 0 : i32
    %c0_i32_1 = arith.constant 0 : i32
    return %c0_i32, %c0_i32_0 : i32, i32
  }
  func.func @transform_2(%arg0: i32, %arg1: memref<256xi32, #tpu.memory_space<smem>>) -> (i32, i32) {
    %c0_i32 = arith.constant 0 : i32
    %c0_i32_0 = arith.constant 0 : i32
    %c0_i32_1 = arith.constant 0 : i32
    return %c0_i32, %c0_i32_0 : i32, i32
  }
  func.func @transform_3(%arg0: i32, %arg1: memref<256xi32, #tpu.memory_space<smem>>) -> (i32, i32) {
    %c0_i32 = arith.constant 0 : i32
    %c0_i32_0 = arith.constant 0 : i32
    %c0_i32_1 = arith.constant 0 : i32
    return %c0_i32, %c0_i32_0 : i32, i32
  }
  func.func @transform_4(%arg0: i32, %arg1: memref<256xi32, #tpu.memory_space<smem>>) -> (i32, i32) {
    %c0_i32 = arith.constant 0 : i32
    %c0_i32_0 = arith.constant 0 : i32
    return %arg0, %c0_i32 : i32, i32
  }
}

</mosaic_0001>

<bundles_post_ra>
// kernel: tpu_custom_call.1
= control target key start
LH: loop header
LB: loop body
LE: loop exit
PB: predicated region body
PF: predicated region fallthrough
CT: control target
= control target key end

     0   :  { %s4996_s0 = inlined_call_operand.hbm [shape: s32[256], index: 0, kind: input, shape index: {}]   ;;  %s4997_s1 = inlined_call_operand.hbm [shape: f32[2048,1024], index: 1, kind: input, shape index: {}]   ;;  %s4998_s2 = inlined_call_operand.hbm [shape: f32[1,1024], index: 2, kind: input, shape index: {}]   ;;  %s4999_s3 = inlined_call_operand.hbm [shape: f32[1024,128], index: 3, kind: input, shape index: {}]   ;;  %s5000_s4 = inlined_call_operand.hbm [shape: f32[1,128], index: 4, kind: input, shape index: {}]   ;;  %s5001_s5 = inlined_call_operand.hbm [shape: f32[32,128], index: 5, kind: output, shape index: {}]  }
   0x1   :  { %5005 = sst [smem:[#allocation19_spill]] %s4997_s1  ;;  %s3925_s20 = scalar_lea.hbm %s4996_s0, 32 }
   0x2   :  { %5006 = sst [smem:[#allocation20_spill]] %s4998_s2  ;;  %p3926_p0 = scmp.ne.s32.totalorder %s4996_s0, %s3925_s20 }
   0x3   :  { %5007 = sst [smem:[#allocation21_spill]] %s4999_s3  ;;  %p3929_p1 = scmp.lt.u32.totalorder %s3925_s20, %s4996_s0 }
   0x4   :  { %5008 = sst [smem:[#allocation22_spill]] %s5000_s4 }
   0x5   :  { %p3931_p2 = pnand %p3929_p1, %p3926_p0 }
   0x7   :  { %3934 = shalt.err (!%p3931_p2)  }
   0x8   :  { %s4125_s25 = smov [#allocation4]  }
   0x9   :  { %11 = dma.hbm_to_smem %s4996_s0, 32, %s4125_s25, [#allocation3] }
   0xa   :  { %4091 = dma.done.wait [#allocation3], 32 }
   0xb   :  { %4092 = vsyncadd [#allocation3], 4294967264 }
   0xc   :  { %13 = sfence }
   0xd   :  { %14 = vsyncpa [#allocation6], 0 }
   0xe   :  { %15 = vsyncpa [#allocation9], 0 }
   0xf   :  { %16 = vsyncpa [#allocation12], 0 }
  0x10   :  { %17 = vsyncpa [#allocation7], 0 }
  0x11   :  { %19 = vsyncpa [#allocation7 + $0x1], 0  ;;  %s4179_s28 = smov 0   ;;  %s4181_s29 = smov 0  }
  0x12   :  { %s4183_s30 = smov 0   ;;  %s4185_s6 = smov 0  }
  0x13 LB: > { %s4200_s0 = sadd.s32 4294967295, %s4123_s6   ;;  %s3092_s7 = sadd.s32 4294967294, %s4123_s6   ;;  %s4123_s6 = sphi %s4185_s6, %s5033_s6   ;;  %s4119_s30 = sphi %s4183_s30, %s5032_s30   ;;  %s4115_s29 = sphi %s4181_s29, %s5031_s29   ;;  %s4111_s28 = sphi %s4179_s28, %s5030_s28  }
  0x14   : > { %s4204_s8 = sadd.s32 1, %s4123_s6   ;;  %s116_s9 = sadd.s32 1, %s4119_s30 }
  0x15   : > { %s113_s10 = ssub.s32 %s4123_s6, %s4204_s8  ;;  %p126_p3 = scmp.ne.s32.totalorder %s4119_s30, %s4115_s29 }
  0x16   : > { %p114_p4 = scmp.eq.s32.totalorder %s113_s10, 0  ;;  %p127_p5 = scmp.eq.s32.totalorder %s4200_s0, 1 }
  0x17   : > { %p132_p6 = scmp.ne.s32.totalorder %s4115_s29, %s4111_s28  ;;  %p133_p7 = scmp.eq.s32.totalorder %s3092_s7, 1 }
  0x18   : > { %s4215_s11 = scalar_select %p114_p4, %s4119_s30, %s116_s9  }
  0x19   : > { %p4217_p8 = por %p127_p5, %p126_p3  ;;  %p4221_p9 = por %p133_p7, %p132_p6 }
  0x1a   : > { %p3093_p10 = scmp.ge.s32.totalorder %s4123_s6, 1  ;;  %p140_p11 = scmp.lt.s32.totalorder %s4123_s6, 3 }
  0x1b   : > { %s5009_s12 = scalar_select %p4217_p8, 1, 0 }
  0x1c   : > { %s5010_s13 = scalar_select %p4221_p9, 1, 0 }
  0x1d   : > { %p5002_p12 = scmp.eq.s32.totalorder %s4200_s0, 0  ;;  %p4228_p13 = pnand %p3093_p10, %p140_p11 }
  0x1e   : > { %s4126_s15 = smov [#allocation8]   ;;  %s4127_s17 = smov [#allocation5]  }
  0x1f   : > { %s5011_s14 = scalar_select %p4228_p13, 1, 0 }
  0x20   : > { %s166_s16 = sshll.u32 %s4126_s15, 4  ;;  %p3855_p0 = pneg %p4228_p13  ;;  %s167_s16 = int_to_ptr.vmem [resolvable:$true] %s166_s16 }
  0x21   : > { %s152_s18 = sshll.u32 %s4127_s17, 4  ;;  %s4128_s20 = smov [#allocation10]   ;;  %s4240_s18 = int_to_ptr.vmem [resolvable:$true] %s152_s18 }
  0x22   : > { %p4236_p1 = pnand %p5002_p12, %p3855_p0  ;;  %s4242_s21 = sshll.u32 %s4128_s20, 4  ;;  %s177_s21 = int_to_ptr.vmem [resolvable:$true] %s4242_s21 }
  0x23   : > { %s5013_s2 = sld [smem:[#allocation20_spill]] }
  0x24   : > { %p4252_p3 = pneg %p4236_p1 }
  0x29   : > { %s3935_s24 = scalar_lea.hbm %s5013_s2, 128 }
  0x2a   : > { %p3936_p2 = scmp.ne.s32.totalorder %s5013_s2, %s3935_s24  ;;  %p3942_p6 = scmp.lt.u32.totalorder %s3935_s24, %s5013_s2 }
  0x2c   : > { %p3938_p4 = pnand %p4252_p3, %p3936_p2 }
  0x2e   : > { %p3939_p5 = pneg %p3938_p4 }
  0x30   : > { %p3944_p7 = pnand %p3942_p6, %p3939_p5 }
  0x32   : > { %3947 = shalt.err (!%p3944_p7)
}
  0x33   : > { %s3948_s10 = scalar_lea.vmem %s167_s16, 128  ;;  %p3956_p12 = scmp.lt.s32.totalorder %s167_s16, %s167_s16 }
  0x34   : > { %p3949_p10 = scmp.ne.s32.totalorder %s167_s16, %s3948_s10  ;;  %p3957_p9 = scmp.lt.s32.totalorder %s3948_s10, %s3948_s10 }
  0x36   : > { %p3951_p11 = pnand %p3949_p10, %p4252_p3  ;;  %p3958_p8 = por %p3957_p9, %p3956_p12 }
  0x38   : > { %p3952_p0 = pneg %p3951_p11 }
  0x3a   : > { %p3959_p13 = pnand %p3958_p8, %p3952_p0 }
  0x3c   : > { %3962 = shalt.err (!%p3959_p13)
}
  0x3d   : > { %3861 = dma.hbm_to_vmem [thread:$0]  (!%p4236_p1), %s5013_s2, 128, %s167_s16, [#allocation9]  }
  0x3e   : > { %s5015_s1 = sld [smem:[#allocation19_spill]] }
  0x44   : > { %s3963_s23 = scalar_lea.hbm %s5015_s1, 262144 }
  0x45   : > { %p3964_p2 = scmp.ne.s32.totalorder %s5015_s1, %s3963_s23  ;;  %p3970_p8 = scmp.lt.u32.totalorder %s3963_s23, %s5015_s1 }
  0x47   : > { %p3966_p4 = pnand %p3964_p2, %p4252_p3 }
  0x49   : > { %p3967_p9 = pneg %p3966_p4 }
  0x4b   : > { %p3972_p12 = pnand %p3970_p8, %p3967_p9 }
  0x4d   : > { %3975 = shalt.err (!%p3972_p12)
}
  0x4e   : > { %s3976_s16 = scalar_lea.vmem %s4240_s18, 262144  ;;  %p3984_p7 = scmp.lt.s32.totalorder %s4240_s18, %s4240_s18 }
  0x4f   : > { %p3977_p13 = scmp.ne.s32.totalorder %s4240_s18, %s3976_s16  ;;  %p3985_p10 = scmp.lt.s32.totalorder %s3976_s16, %s3976_s16 }
  0x51   : > { %p3979_p5 = pnand %p3977_p13, %p4252_p3  ;;  %p3986_p11 = por %p3985_p10, %p3984_p7 }
  0x53   : > { %p3980_p6 = pneg %p3979_p5 }
  0x55   : > { %p3987_p0 = pnand %p3986_p11, %p3980_p6 }
  0x57   : > { %3990 = shalt.err (!%p3987_p0)
}
  0x58   : > { %s4129_s9 = smov 1024   ;;  %s4130_s10 = smov 64  }
  0x59   : > { %3858 = dma.hbm_to_vmem [thread:$0]  (!%p4236_p1), %s5015_s1, 262144, %s4240_s18, [#allocation6], %s4129_s9, %s4129_s9, %s4130_s10  }
  0x5a   : > { %s5016_s3 = sld [smem:[#allocation21_spill]] }
  0x60   : > { %s3991_s23 = scalar_lea.hbm %s5016_s3, 16384 }
  0x61   : > { %p3992_p2 = scmp.ne.s32.totalorder %s5016_s3, %s3991_s23  ;;  %p3998_p8 = scmp.lt.u32.totalorder %s3991_s23, %s5016_s3 }
  0x63   : > { %p3994_p4 = pnand %p3992_p2, %p4252_p3 }
  0x65   : > { %p3995_p9 = pneg %p3994_p4 }
  0x67   : > { %p4000_p12 = pnand %p3998_p8, %p3995_p9 }
  0x69   : > { %4003 = shalt.err (!%p4000_p12)
}
  0x6a   : > { %s4004_s16 = scalar_lea.vmem %s177_s21, 16384  ;;  %p4012_p7 = scmp.lt.s32.totalorder %s177_s21, %s177_s21 }
  0x6b   : > { %p4005_p13 = scmp.ne.s32.totalorder %s177_s21, %s4004_s16  ;;  %p4013_p10 = scmp.lt.s32.totalorder %s4004_s16, %s4004_s16 }
  0x6d   : > { %p4007_p5 = pnand %p4005_p13, %p4252_p3  ;;  %p4014_p11 = por %p4013_p10, %p4012_p7 }
  0x6f   : > { %p4008_p6 = pneg %p4007_p5 }
  0x71   : > { %p4015_p0 = pnand %p4014_p11, %p4008_p6 }
  0x73   : > { %4018 = shalt.err (!%p4015_p0)
}
  0x74   : > { %s4131_s18 = smov 128   ;;  %s4132_s9 = smov 8  }
  0x75   : > { %3864 = dma.hbm_to_vmem [thread:$0]  (!%p4236_p1), %s5016_s3, 16384, %s177_s21, [#allocation9], %s4131_s18, %s4131_s18, %s4132_s9  }
  0x76   : > { %s4133_s17 = smov [#allocation11]   ;;  %s5017_s4 = sld [smem:[#allocation22_spill]] }
  0x77   : > { %s190_s20 = sshll.u32 %s4133_s17, 4  ;;  %s191_s20 = int_to_ptr.vmem [resolvable:$true] %s190_s20 }
  0x7c   : > { %s4019_s24 = scalar_lea.hbm %s5017_s4, 16 }
  0x7d   : > { %p4020_p2 = scmp.ne.s32.totalorder %s5017_s4, %s4019_s24  ;;  %p4026_p8 = scmp.lt.u32.totalorder %s4019_s24, %s5017_s4 }
  0x7f   : > { %p4022_p4 = pnand %p4020_p2, %p4252_p3 }
  0x81   : > { %p4023_p9 = pneg %p4022_p4 }
  0x83   : > { %p4028_p12 = pnand %p4026_p8, %p4023_p9 }
  0x85   : > { %4031 = shalt.err (!%p4028_p12)
}
  0x86   : > { %s4032_s21 = scalar_lea.vmem %s191_s20, 16  ;;  %s4039_s18 = scalar_lea.vmem %s191_s20, 32 }
  0x87   : > { %p4033_p13 = scmp.ne.s32.totalorder %s191_s20, %s4032_s21  ;;  %p4040_p7 = scmp.lt.s32.totalorder %s191_s20, %s191_s20 }
  0x88   : > { %p4041_p10 = scmp.lt.s32.totalorder %s4039_s18, %s4032_s21 }
  0x89   : > { %p4035_p5 = pnand %p4033_p13, %p4252_p3 }
  0x8a   : > { %p4042_p11 = por %p4041_p10, %p4040_p7 }
  0x8b   : > { %p4036_p6 = pneg %p4035_p5 }
  0x8d   : > { %p4043_p0 = pnand %p4042_p11, %p4036_p6 }
  0x8f   : > { %4046 = shalt.err (!%p4043_p0)
}
  0x90   : > { %3867 = dma.hbm_to_vmem [thread:$0]  (!%p4236_p1), %s5017_s4, 16, %s191_s20, [#allocation12]  }
  0x91   : > { %p5018_p2 = scmp.ne.s32.totalorder %s5011_s14, 0 }
  0x92   : > { %p5019_p4 = scmp.eq.s32.totalorder (!%p5018_p2), %s4200_s0, 0 }
  0x93   : > { %203 = sbr.rel (%p5018_p2) target bundleno = 900 (0x384), region = 36 }
  0x9a   : > { %4094 = dma.done.wait (%p5019_p4), [#allocation6], 262144   ;;  %p5020_p3 = pmov %p5019_p4 }
  0x9c   : > { %4096 = vsyncadd (%p5020_p3), [#allocation6], 4294705152  ;;  %p5021_p9 = pmov %p5020_p3 }
  0x9d   : > { %p5022_p8 = pmov %p5020_p3 }
  0x9e   : > { %4098 = dma.done.wait (%p5021_p9), [#allocation9], 16512  }
  0x9f   : > { %4100 = vsyncadd (%p5022_p8), [#allocation9], 4294950784  ;;  %p5023_p12 = pmov %p5020_p3 }
  0xa0   : > { %p5024_p1 = pmov %p5020_p3 }
  0xa1   : > { %4102 = dma.done.wait (%p5023_p12), [#allocation12], 16  }
  0xa2   : > { %4104 = vsyncadd (%p5024_p1), [#allocation12], 4294967280  ;;  %s4343_s14 = sshll.u32 %s4200_s0, 7  ;;  %v2182_v0 = vld [vmem:[#allocation10 + $0x80] sm:$0xff]  ;;  %v2183_v1 = vld [vmem:[#allocation10 + $0x88] sm:$0xff]  ;;  %p5028_p5 = scmp.ne.s32.totalorder %s5009_s12, 0 }
  0xa3   : > { %s4346_s19 = sld [smem:[#allocation4 + %s4343_s14]]  ;;  %s251_s27 = sadd.s32 1, %s4343_s14  ;;  %v2166_v2 = vld [vmem:[#allocation10] sm:$0xff]  ;;  %v3709_v3 = vpack.c.bf16 %v2183_v1, %v2182_v0  ;;  %v2167_v4 = vld [vmem:[#allocation10 + $0x8] sm:$0xff]  ;;  %v2184_v11 = vld [vmem:[#allocation10 + $0x90] sm:$0xff] }
  0xa4   : > { %s4349_s15 = sld [smem:[#allocation4 + %s251_s27]]  ;;  %s265_s17 = sadd.s32 2, %s4343_s14  ;;  %v2214_v5 = vld [vmem:[#allocation10 + $0x180] sm:$0xff]  ;;  %v2215_v6 = vld [vmem:[#allocation10 + $0x188] sm:$0xff]  ;;  %v3711_v7 = vpack.c.bf16 %v2167_v4, %v2166_v2  ;;  %v2185_v13 = vld [vmem:[#allocation10 + $0x98] sm:$0xff] }
  0xa5   : > { %s4352_s20 = sld [smem:[#allocation4 + %s265_s17]]  ;;  %s279_s22 = sadd.s32 3, %s4343_s14  ;;  %v3741_v8 = vpack.c.bf16 %v2215_v6, %v2214_v5  ;;  %v2198_v9 = vld [vmem:[#allocation10 + $0x100] sm:$0xff]  ;;  %v2199_v10 = vld [vmem:[#allocation10 + $0x108] sm:$0xff]  ;;  %3710 = vmatprep.subr.bf16.mxu0 %v3709_v3  ;;  %v2168_v14 = vld [vmem:[#allocation10 + $0x10] sm:$0xff]  ;;  %v3713_v16 = vpack.c.bf16 %v2185_v13, %v2184_v11 }
  0xa6   : > { %s293_s23 = sadd.s32 4, %s4343_s14  ;;  %s4356_s24 = sld [smem:[#allocation4 + %s279_s22]]  ;;  %v3743_v12 = vpack.c.bf16 %v2199_v10, %v2198_v9  ;;  %v2169_v15 = vld [vmem:[#allocation10 + $0x18] sm:$0xff]  ;;  %3712 = vmatpush3.bf16.msra.mxu0 %v3711_v7  ;;  %v2216_v18 = vld [vmem:[#allocation10 + $0x190] sm:$0xff]  ;;  %v2186_v23 = vld [vmem:[#allocation10 + $0xa0] sm:$0xff] }
  0xa7   : > { %s4358_s25 = sld [smem:[#allocation4 + %s293_s23]]  ;;  %s307_s26 = sadd.s32 5, %s4343_s14  ;;  %3742 = vmatprep.subr.bf16.mxu1 %v3741_v8  ;;  %v3715_v17 = vpack.c.bf16 %v2169_v15, %v2168_v14  ;;  %v2217_v19 = vld [vmem:[#allocation10 + $0x198] sm:$0xff]  ;;  %v2200_v20 = vld [vmem:[#allocation10 + $0x110] sm:$0xff]  ;;  %v2187_v24 = vld [vmem:[#allocation10 + $0xa8] sm:$0xff]  ;;  %3714 = vmatprep.subr.bf16.mxu0 %v3713_v16 }
  0xa8   : > { %s4365_s10 = sld [smem:[#allocation4 + %s307_s26]]  ;;  %s321_s27 = sadd.s32 6, %s4343_s14  ;;  %3744 = vmatpush3.bf16.msra.mxu1 %v3743_v12  ;;  %v3745_v21 = vpack.c.bf16 %v2217_v19, %v2216_v18  ;;  %v2201_v22 = vld [vmem:[#allocation10 + $0x118] sm:$0xff]  ;;  %v3717_v26 = vpack.c.bf16 %v2187_v24, %v2186_v23  ;;  %v2170_v27 = vld [vmem:[#allocation10 + $0x20] sm:$0xff]  ;;  %v2171_v28 = vld [vmem:[#allocation10 + $0x28] sm:$0xff] }
  0xa9   : > { %s240_s7 = sshra.s32 %s4346_s19, 3  ;;  %s243_s16 = sand.u32 7, %s4346_s19  ;;  %v3747_v25 = vpack.c.bf16 %v2201_v22, %v2200_v20  ;;  %v2218_v29 = vld [vmem:[#allocation10 + $0x1a0] sm:$0xff]  ;;  %v2219_v30 = vld [vmem:[#allocation10 + $0x1a8] sm:$0xff]  ;;  %v3719_v33 = vpack.c.bf16 %v2171_v28, %v2170_v27  ;;  %v2188_v35 = vld [vmem:[#allocation10 + $0xb0] sm:$0xff] }
  0xaa   : > { %s3383_s21 = sshll.u32 %s240_s7, 6  ;;  %s253_s18 = sshra.s32 %s4349_s15, 3  ;;  %3746 = vmatprep.subr.bf16.mxu1 %v3745_v21  ;;  %v2202_v31 = vld [vmem:[#allocation10 + $0x120] sm:$0xff]  ;;  %v2203_v32 = vld [vmem:[#allocation10 + $0x128] sm:$0xff]  ;;  %3716 = vmatpush3.bf16.msra.mxu0 %v3715_v17  ;;  %v3749_v34 = vpack.c.bf16 %v2219_v30, %v2218_v29  ;;  %v2189_v36 = vld [vmem:[#allocation10 + $0xb8] sm:$0xff] }
  0xab   : > { %s256_s9 = sand.u32 7, %s4349_s15  ;;  %s3384_s19 = sshll.u32 %s253_s18, 6  ;;  %v2172_v37 = vld [vmem:[#allocation10 + $0x30] sm:$0xff]  ;;  %3718 = vmatprep.subr.bf16.mxu0 %v3717_v26  ;;  %v3751_v38 = vpack.c.bf16 %v2203_v32, %v2202_v31  ;;  %v3721_v39 = vpack.c.bf16 %v2189_v36, %v2188_v35  ;;  %v2173_v40 = vld [vmem:[#allocation10 + $0x38] sm:$0xff]  ;;  %v2190_v46 = vld [vmem:[#allocation10 + $0xc0] sm:$0xff] }
  0xac   : > { %s4368_s17 = sadd.s32 %s3383_s21, %s243_s16  ;;  %s267_s15 = sshra.s32 %s4352_s20, 3  ;;  %3748 = vmatpush3.bf16.msra.mxu1 %v3747_v25  ;;  %v2220_v41 = vld [vmem:[#allocation10 + $0x1b0] sm:$0xff]  ;;  %v2221_v42 = vld [vmem:[#allocation10 + $0x1b8] sm:$0xff]  ;;  %v2191_v47 = vld [vmem:[#allocation10 + $0xc8] sm:$0xff]  ;;  %v3723_v48 = vpack.c.bf16 %v2173_v40, %v2172_v37 }
  0xad   : > { %s4371_s22 = sadd.s32 %s3384_s19, %s256_s9  ;;  %s270_s23 = sand.u32 7, %s4352_s20  ;;  %3750 = vmatprep.subr.bf16.mxu1 %v3749_v34  ;;  %v3753_v43 = vpack.c.bf16 %v2221_v42, %v2220_v41  ;;  %v2204_v44 = vld [vmem:[#allocation10 + $0x130] sm:$0xff]  ;;  %v2205_v45 = vld [vmem:[#allocation10 + $0x138] sm:$0xff]  ;;  %v2222_v49 = vld [vmem:[#allocation10 + $0x1c0] sm:$0xff]  ;;  %v3725_v52 = vpack.c.bf16 %v2191_v47, %v2190_v46 }
  0xae   : > { %s3385_s26 = sshll.u32 %s267_s15, 6  ;;  %s281_s7 = sshra.s32 %s4356_s24, 3  ;;  %3720 = vmatpush3.bf16.msra.mxu0 %v3719_v33  ;;  %v2223_v50 = vld [vmem:[#allocation10 + $0x1c8] sm:$0xff]  ;;  %v3755_v51 = vpack.c.bf16 %v2205_v45, %v2204_v44  ;;  %v2174_v53 = vld [vmem:[#allocation10 + $0x40] sm:$0xff]  ;;  %v2192_v58 = vld [vmem:[#allocation10 + $0xd0] sm:$0xff] }
  0xaf   : > { %s4375_s16 = sadd.s32 %s3385_s26, %s270_s23  ;;  %s284_s20 = sand.u32 7, %s4356_s24  ;;  %3722 = vmatprep.subr.bf16.mxu0 %v3721_v39  ;;  %v2175_v54 = vld [vmem:[#allocation10 + $0x48] sm:$0xff]  ;;  %v2206_v55 = vld [vmem:[#allocation10 + $0x140] sm:$0xff]  ;;  %v3757_v56 = vpack.c.bf16 %v2223_v50, %v2222_v49  ;;  %v2193_v59 = vld [vmem:[#allocation10 + $0xd8] sm:$0xff] }
  0xb0   : > { %s3386_s21 = sshll.u32 %s281_s7, 6  ;;  %s295_s18 = sshra.s32 %s4358_s25, 3  ;;  %3752 = vmatpush3.bf16.msra.mxu1 %v3751_v38  ;;  %v2207_v57 = vld [vmem:[#allocation10 + $0x148] sm:$0xff]  ;;  %v2224_v60 = vld [vmem:[#allocation10 + $0x1d0] sm:$0xff]  ;;  %v2225_v61 = vld [vmem:[#allocation10 + $0x1d8] sm:$0xff]  ;;  %v3727_v62 = vpack.c.bf16 %v2175_v54, %v2174_v53  ;;  %v3729_v0 = vpack.c.bf16 %v2193_v59, %v2192_v58 }
  0xb1   : > { %s298_s9 = sand.u32 7, %s4358_s25  ;;  %s3387_s19 = sshll.u32 %s295_s18, 6  ;;  %3754 = vmatprep.subr.bf16.mxu1 %v3753_v43  ;;  %v3759_v63 = vpack.c.bf16 %v2207_v57, %v2206_v55  ;;  %v2176_v1 = vld [vmem:[#allocation10 + $0x50] sm:$0xff]  ;;  %v2177_v2 = vld [vmem:[#allocation10 + $0x58] sm:$0xff]  ;;  %v3761_v4 = vpack.c.bf16 %v2225_v61, %v2224_v60  ;;  %v2194_v6 = vld [vmem:[#allocation10 + $0xe0] sm:$0xff] }
  0xb2   : > { %s309_s24 = sshra.s32 %s4365_s10, 3  ;;  %s4381_s15 = sadd.s32 %s3386_s21, %s284_s20  ;;  %3724 = vmatpush3.bf16.msra.mxu0 %v3723_v48  ;;  %v2208_v3 = vld [vmem:[#allocation10 + $0x150] sm:$0xff]  ;;  %v2209_v5 = vld [vmem:[#allocation10 + $0x158] sm:$0xff]  ;;  %v2195_v7 = vld [vmem:[#allocation10 + $0xe8] sm:$0xff]  ;;  %v3731_v12 = vpack.c.bf16 %v2177_v2, %v2176_v1 }
  0xb3   : > { %s312_s23 = sand.u32 7, %s4365_s10  ;;  %s4384_s25 = sadd.s32 %s3387_s19, %s298_s9  ;;  %3726 = vmatprep.subr.bf16.mxu0 %v3725_v52  ;;  %v2178_v8 = vld [vmem:[#allocation10 + $0x60] sm:$0xff]  ;;  %v2179_v9 = vld [vmem:[#allocation10 + $0x68] sm:$0xff]  ;;  %v2196_v15 = vld [vmem:[#allocation10 + $0xf0] sm:$0xff]  ;;  %v3763_v17 = vpack.c.bf16 %v2209_v5, %v2208_v3  ;;  %v3733_v18 = vpack.c.bf16 %v2195_v7, %v2194_v6 }
  0xb4   : > { %s3388_s26 = sshll.u32 %s309_s24, 6  ;;  %s4390_s10 = sld [smem:[#allocation4 + %s321_s27]]  ;;  %3756 = vmatpush3.bf16.msra.mxu1 %v3755_v51  ;;  %v2226_v10 = vld [vmem:[#allocation10 + $0x1e0] sm:$0xff]  ;;  %v2227_v11 = vld [vmem:[#allocation10 + $0x1e8] sm:$0xff]  ;;  %v2197_v16 = vld [vmem:[#allocation10 + $0xf8] sm:$0xff]  ;;  %v3735_v30 = vpack.c.bf16 %v2179_v9, %v2178_v8 }
  0xb5   : > { %s4386_s7 = sadd.s32 %s3388_s26, %s312_s23  ;;  %s335_s20 = sadd.s32 7, %s4343_s14  ;;  %3758 = vmatprep.subr.bf16.mxu1 %v3757_v56  ;;  %v2210_v13 = vld [vmem:[#allocation10 + $0x160] sm:$0xff]  ;;  %v2211_v14 = vld [vmem:[#allocation10 + $0x168] sm:$0xff]  ;;  %v2228_v19 = vld [vmem:[#allocation10 + $0x1f0] sm:$0xff]  ;;  %v3765_v22 = vpack.c.bf16 %v2227_v11, %v2226_v10  ;;  %v3737_v37 = vpack.c.bf16 %v2197_v16, %v2196_v15 }
  0xb6   : > { %s4394_s21 = sadd.s32 8, %s4343_s14  ;;  %s4397_s27 = sld [smem:[#allocation4 + %s335_s20]]  ;;  %3728 = vmatpush3.bf16.msra.mxu0 %v3727_v62  ;;  %v2229_v20 = vld [vmem:[#allocation10 + $0x1f8] sm:$0xff]  ;;  %v2180_v25 = vld [vmem:[#allocation10 + $0x70] sm:$0xff]  ;;  %v3767_v36 = vpack.c.bf16 %v2211_v14, %v2210_v13 }
  0xb7   : > { %s365_s18 = sadd.s32 1, %s4394_s21  ;;  %s4400_s9 = sld [smem:[#allocation4 + %s4394_s21]]  ;;  %3730 = vmatprep.subr.bf16.mxu0 %v3729_v0  ;;  %v2181_v26 = vld [vmem:[#allocation10 + $0x78] sm:$0xff]  ;;  %v2212_v31 = vld [vmem:[#allocation10 + $0x170] sm:$0xff]  ;;  %v3769_v41 = vpack.c.bf16 %v2229_v20, %v2228_v19 }
  0xb8   : > { %s4402_s19 = sld [smem:[#allocation4 + %s365_s18]]  ;;  %3760 = vmatpush3.bf16.msra.mxu1 %v3759_v63  ;;  %s247_s20 = scalar_lea.vmem [#allocation5], %s4368_s17  ;;  %v2213_v32 = vld [vmem:[#allocation10 + $0x178] sm:$0xff]  ;;  %v3739_v47 = vpack.c.bf16 %v2181_v26, %v2180_v25 }
  0xb9   : > { %v248_v21 = vld [vmem:[%s247_s20] ss:$8 sm:$0xf]  ;;  %3762 = vmatprep.subr.bf16.mxu1 %v3761_v4  ;;  %s260_s1 = scalar_lea.vmem [#allocation5], %s4371_s22  ;;  %s274_s26 = scalar_lea.vmem [#allocation5], %s4375_s16  ;;  %v3771_v51 = vpack.c.bf16 %v2213_v32, %v2212_v31 }
  0xba   : > { %s323_s23 = sshra.s32 %s4390_s10, 3  ;;  %s326_s18 = sand.u32 7, %s4390_s10  ;;  %v249_v23 = vld [vmem:[%s247_s20] ss:$8 sm:$0xf0]  ;;  %3732 = vmatpush3.bf16.msra.mxu0 %v3731_v12 }
  0xbb   : > { %s3389_s24 = sshll.u32 %s323_s23, 6  ;;  %v261_v24 = vld [vmem:[%s260_s1] ss:$8 sm:$0xf]  ;;  %v250_v27 = vor.u32 %v249_v23, %v248_v21  ;;  %s288_s17 = scalar_lea.vmem [#allocation5], %s4381_s15  ;;  %3734 = vmatprep.subr.bf16.mxu0 %v3733_v18 }
  0xbc   : > { %v262_v28 = vld [vmem:[%s260_s1] ss:$8 sm:$0xf0]  ;;  %s4412_s10 = sadd.s32 %s3389_s24, %s326_s18  ;;  %3764 = vmatpush3.bf16.msra.mxu1 %v3763_v17  ;;  %s302_s1 = scalar_lea.vmem [#allocation5], %s4384_s25 }
  0xbd   : > { %v275_v29 = vld [vmem:[%s274_s26] ss:$8 sm:$0xf]  ;;  %v263_v33 = vor.u32 %v262_v28, %v261_v24  ;;  %3766 = vmatprep.subr.bf16.mxu1 %v3765_v22  ;;  %s316_s22 = scalar_lea.vmem [#allocation5], %s4386_s7  ;;  %s337_s16 = sshra.s32 %s4397_s27, 3 }
  0xbe   : > { %v276_v34 = vld [vmem:[%s274_s26] ss:$8 sm:$0xf0]  ;;  %3736 = vmatpush3.bf16.msra.mxu0 %v3735_v30  ;;  %s330_s15 = scalar_lea.vmem [#allocation5], %s4412_s10  ;;  %s5025_s25 = sadd.s32 2, %s4394_s21 }
  0xbf   : > { %v289_v35 = vld [vmem:[%s288_s17] ss:$8 sm:$0xf]  ;;  %v277_v38 = vor.u32 %v276_v34, %v275_v29  ;;  %v264_v42 = vadd.f32 %v263_v33, %v250_v27  ;;  %s4420_s24 = sld [smem:[#allocation4 + %s5025_s25]]  ;;  %s5026_s23 = sadd.s32 3, %s4394_s21  ;;  %3738 = vmatprep.subr.bf16.mxu0 %v3737_v37 }
  0xc0   : > { %v290_v39 = vld [vmem:[%s288_s17] ss:$8 sm:$0xf0]  ;;  %s4424_s26 = sld [smem:[#allocation4 + %s5026_s23]]  ;;  %3768 = vmatpush3.bf16.msra.mxu1 %v3767_v36  ;;  %s340_s7 = sand.u32 7, %s4397_s27 }
  0xc1   : > { %v303_v40 = vld [vmem:[%s302_s1] ss:$8 sm:$0xf]  ;;  %v291_v43 = vor.u32 %v290_v39, %v289_v35  ;;  %v278_v48 = vadd.f32 %v277_v38, %v264_v42  ;;  %s3390_s20 = sshll.u32 %s337_s16, 6  ;;  %3770 = vmatprep.subr.bf16.mxu1 %v3769_v41  ;;  %s354_s17 = sshra.s32 %s4400_s9, 3 }
  0xc2   : > { %v304_v44 = vld [vmem:[%s302_s1] ss:$8 sm:$0xf0]  ;;  %s343_s18 = sadd.s32 %s3390_s20, %s340_s7  ;;  %s357_s10 = sand.u32 7, %s4400_s9  ;;  %3740 = vmatpush3.bf16.msra.mxu0 %v3739_v47 }
  0xc3   : > { %v317_v45 = vld [vmem:[%s316_s22] ss:$8 sm:$0xf]  ;;  %v305_v49 = vor.u32 %v304_v44, %v303_v40  ;;  %v292_v53 = vadd.f32 %v291_v43, %v278_v48  ;;  %s344_s1 = scalar_lea.vmem [#allocation5], %s343_s18  ;;  %s370_s16 = sand.u32 7, %s4402_s19 }
  0xc4   : > { %v318_v46 = vld [vmem:[%s316_s22] ss:$8 sm:$0xf0]  ;;  %3772 = vmatpush3.bf16.msra.mxu1 %v3771_v51  ;;  %s3393_s22 = sshll.u32 %s354_s17, 6 }
  0xc5   : > { %v331_v50 = vld [vmem:[%s330_s15] ss:$8 sm:$0xf]  ;;  %v319_v54 = vor.u32 %v318_v46, %v317_v45  ;;  %v306_v55 = vadd.f32 %v305_v49, %v292_v53  ;;  %s360_s27 = sadd.s32 %s3393_s22, %s357_s10  ;;  %s381_s7 = sshra.s32 %s4420_s24, 3 }
  0xc6   : > { %v332_v52 = vld [vmem:[%s330_s15] ss:$8 sm:$0xf0]  ;;  %s367_s15 = sshra.s32 %s4402_s19, 3  ;;  %s361_s23 = scalar_lea.vmem [#allocation5], %s360_s27 }
  0xc7   : > { %v333_v56 = vor.u32 %v332_v52, %v331_v50  ;;  %v345_v57 = vld [vmem:[%s344_s1] ss:$8 sm:$0xf]  ;;  %v320_v59 = vadd.f32 %v319_v54, %v306_v55  ;;  %s3394_s25 = sshll.u32 %s367_s15, 6  ;;  %s384_s18 = sand.u32 7, %s4420_s24 }
  0xc8   : > { %v346_v58 = vld [vmem:[%s344_s1] ss:$8 sm:$0xf0]  ;;  %s373_s9 = sadd.s32 %s3394_s25, %s370_s16  ;;  %s3395_s17 = sshll.u32 %s381_s7, 6 }
  0xc9   : > { %v347_v60 = vor.u32 %v346_v58, %v345_v57  ;;  %v334_v61 = vadd.f32 %v333_v56, %v320_v59  ;;  %v362_v62 = vld [vmem:[%s361_s23] ss:$8 sm:$0xf]  ;;  %s374_s20 = scalar_lea.vmem [#allocation5], %s373_s9  ;;  %s387_s10 = sadd.s32 %s3395_s17, %s384_s18 }
  0xca   : > { %v363_v63 = vld [vmem:[%s361_s23] ss:$8 sm:$0xf0]  ;;  %s395_s19 = sshra.s32 %s4424_s26, 3  ;;  %s398_s1 = sand.u32 7, %s4424_s26 }
  0xcb   : > { %v348_v0 = vadd.f32 %v347_v60, %v334_v61  ;;  %v375_v1 = vld [vmem:[%s374_s20] ss:$8 sm:$0xf]  ;;  %v364_v3 = vor.u32 %v363_v63, %v362_v62  ;;  %s388_s22 = scalar_lea.vmem [#allocation5], %s387_s10  ;;  %s3396_s15 = sshll.u32 %s395_s19, 6 }
  0xcc   : > { %v376_v2 = vld [vmem:[%s374_s20] ss:$8 sm:$0xf0]  ;;  %s407_s27 = sadd.s32 4, %s4394_s21  ;;  %s401_s16 = sadd.s32 %s3396_s15, %s398_s1 }
  0xcd   : > { %349 = vst [vmem:[#allocation2] ss:$8 sm:$0xf] %v348_v0  ;;  %350 = vst [vmem:[#allocation2] ss:$8 sm:$0xf0] %v348_v0  ;;  %v377_v4 = vor.u32 %v376_v2, %v375_v1 }
  0xce   : > { %v389_v5 = vld [vmem:[%s388_s22] ss:$8 sm:$0xf]  ;;  %s408_s25 = sld [smem:[#allocation4 + %s407_s27]]  ;;  %s421_s24 = sadd.s32 5, %s4394_s21 }
  0xcf   : > { %v390_v6 = vld [vmem:[%s388_s22] ss:$8 sm:$0xf0]  ;;  %v378_v7 = vadd.f32 %v377_v4, %v364_v3  ;;  %s402_s23 = scalar_lea.vmem [#allocation5], %s401_s16  ;;  %s422_s9 = sld [smem:[#allocation4 + %s421_s24]] }
  0xd0   : > { %v391_v8 = vor.u32 %v390_v6, %v389_v5  ;;  %v403_v9 = vld [vmem:[%s402_s23] ss:$8 sm:$0xf]  ;;  %s435_s7 = sadd.s32 6, %s4394_s21  ;;  %s449_s26 = sadd.s32 7, %s4394_s21 }
  0xd1   : > { %v404_v10 = vld [vmem:[%s402_s23] ss:$8 sm:$0xf0]  ;;  %s4438_s20 = sld [smem:[#allocation4 + %s435_s7]]  ;;  %s4444_s17 = sadd.s32 16, %s4343_s14 }
  0xd2   : > { %v392_v11 = vadd.f32 %v391_v8, %v378_v7  ;;  %v405_v12 = vor.u32 %v404_v10, %v403_v9  ;;  %s4441_s18 = sld [smem:[#allocation4 + %s449_s26]] }
  0xd3   : > { %s4447_s22 = sld [smem:[#allocation4 + %s4444_s17]] }
  0xd4   : > { %s409_s10 = sshra.s32 %s408_s25, 3  ;;  %s412_s19 = sand.u32 7, %s408_s25  ;;  %v406_v13 = vadd.f32 %v405_v12, %v392_v11 }
  0xd5   : > { %s3397_s1 = sshll.u32 %s409_s10, 6  ;;  %s423_s16 = sshra.s32 %s422_s9, 3 }
  0xd6   : > { %s415_s15 = sadd.s32 %s3397_s1, %s412_s19  ;;  %s426_s24 = sand.u32 7, %s422_s9 }
  0xd7   : > { %s416_s21 = scalar_lea.vmem [#allocation5], %s415_s15  ;;  %s3398_s23 = sshll.u32 %s423_s16, 6 }
  0xd8   : > { %v417_v14 = vld [vmem:[%s416_s21] ss:$8 sm:$0xf]  ;;  %s429_s7 = sadd.s32 %s3398_s23, %s426_s24  ;;  %s437_s26 = sshra.s32 %s4438_s20, 3 }
  0xd9   : > { %v418_v15 = vld [vmem:[%s416_s21] ss:$8 sm:$0xf0]  ;;  %s440_s25 = sand.u32 7, %s4438_s20  ;;  %s430_s10 = scalar_lea.vmem [#allocation5], %s429_s7 }
  0xda   : > { %v419_v16 = vor.u32 %v418_v15, %v417_v14  ;;  %v431_v18 = vld [vmem:[%s430_s10] ss:$8 sm:$0xf]  ;;  %s3399_s19 = sshll.u32 %s437_s26, 6  ;;  %s451_s1 = sshra.s32 %s4441_s18, 3 }
  0xdb   : > { %v432_v19 = vld [vmem:[%s430_s10] ss:$8 sm:$0xf0]  ;;  %s443_s27 = sadd.s32 %s3399_s19, %s440_s25  ;;  %s454_s15 = sand.u32 7, %s4441_s18 }
  0xdc   : > { %v420_v17 = vadd.f32 %v419_v16, %v406_v13  ;;  %v433_v20 = vor.u32 %v432_v19, %v431_v18  ;;  %s3400_s21 = sshll.u32 %s451_s1, 6  ;;  %s444_s2 = scalar_lea.vmem [#allocation5], %s443_s27 }
  0xdd   : > { %v445_v22 = vld [vmem:[%s444_s2] ss:$8 sm:$0xf]  ;;  %s457_s9 = sadd.s32 %s3400_s21, %s454_s15  ;;  %s469_s20 = sshra.s32 %s4447_s22, 3 }
  0xde   : > { %v434_v21 = vadd.f32 %v433_v20, %v420_v17  ;;  %v446_v23 = vld [vmem:[%s444_s2] ss:$8 sm:$0xf0]  ;;  %s458_s16 = scalar_lea.vmem [#allocation5], %s457_s9  ;;  %s472_s24 = sand.u32 7, %s4447_s22 }
  0xdf   : > { %v447_v24 = vor.u32 %v446_v23, %v445_v22  ;;  %v459_v25 = vld [vmem:[%s458_s16] ss:$8 sm:$0xf]  ;;  %s3403_s18 = sshll.u32 %s469_s20, 6  ;;  %s5027_s7 = sadd.s32 1, %s4444_s17 }
  0xe0   : > { %v460_v26 = vld [vmem:[%s458_s16] ss:$8 sm:$0xf0]  ;;  %s475_s23 = sadd.s32 %s3403_s18, %s472_s24  ;;  %s481_s26 = sld [smem:[#allocation4 + %s5027_s7]] }
  0xe1   : > { %v448_v27 = vadd.f32 %v447_v24, %v434_v21  ;;  %v461_v28 = vor.u32 %v460_v26, %v459_v25  ;;  %s494_s27 = sadd.s32 2, %s4444_s17  ;;  %s508_s25 = sadd.s32 3, %s4444_s17 }
  0xe2   : > { %s495_s2 = sld [smem:[#allocation4 + %s494_s27]]  ;;  %s522_s19 = sadd.s32 4, %s4444_s17 }
  0xe3   : > { %v462_v29 = vadd.f32 %v461_v28, %v448_v27  ;;  %s4460_s10 = sld [smem:[#allocation4 + %s508_s25]]  ;;  %s536_s15 = sadd.s32 5, %s4444_s17 }
  0xe4   : > { %s4463_s1 = sld [smem:[#allocation4 + %s522_s19]]  ;;  %s476_s22 = scalar_lea.vmem [#allocation5], %s475_s23 }
  0xe5   : > { %464 = vst [vmem:[#allocation2 + $0x1] ss:$8 sm:$0xf] %v462_v29  ;;  %465 = vst [vmem:[#allocation2 + $0x1] ss:$8 sm:$0xf0] %v462_v29 }
  0xe6   : > { %s482_s21 = sshra.s32 %s481_s26, 3  ;;  %s485_s9 = sand.u32 7, %s481_s26  ;;  %v477_v30 = vld [vmem:[%s476_s22] ss:$8 sm:$0xf] }
  0xe7   : > { %s3404_s20 = sshll.u32 %s482_s21, 6  ;;  %s4466_s16 = sld [smem:[#allocation4 + %s536_s15]]  ;;  %v478_v31 = vld [vmem:[%s476_s22] ss:$8 sm:$0xf0] }
  0xe8   : > { %s488_s24 = sadd.s32 %s3404_s20, %s485_s9  ;;  %s550_s18 = sadd.s32 6, %s4444_s17  ;;  %v479_v34 = vor.u32 %v478_v31, %v477_v30 }
  0xe9   : > { %s496_s7 = sshra.s32 %s495_s2, 3  ;;  %s489_s27 = scalar_lea.vmem [#allocation5], %s488_s24 }
  0xea   : > { %v490_v32 = vld [vmem:[%s489_s27] ss:$8 sm:$0xf]  ;;  %s499_s25 = sand.u32 7, %s495_s2  ;;  %s3405_s26 = sshll.u32 %s496_s7, 6 }
  0xeb   : > { %v491_v33 = vld [vmem:[%s489_s27] ss:$8 sm:$0xf0]  ;;  %s502_s23 = sadd.s32 %s3405_s26, %s499_s25  ;;  %s510_s19 = sshra.s32 %s4460_s10, 3 }
  0xec   : > { %v492_v35 = vor.u32 %v491_v33, %v490_v32  ;;  %s513_s3 = sand.u32 7, %s4460_s10  ;;  %s503_s4 = scalar_lea.vmem [#allocation5], %s502_s23 }
  0xed   : > { %v504_v36 = vld [vmem:[%s503_s4] ss:$8 sm:$0xf]  ;;  %s3406_s15 = sshll.u32 %s510_s19, 6  ;;  %s524_s21 = sshra.s32 %s4463_s1, 3 }
  0xee   : > { %v505_v37 = vld [vmem:[%s503_s4] ss:$8 sm:$0xf0]  ;;  %v493_v38 = vadd.f32 %v492_v35, %v479_v34  ;;  %s516_s9 = sadd.s32 %s3406_s15, %s513_s3  ;;  %s527_s22 = sand.u32 7, %s4463_s1 }
  0xef   : > { %v506_v39 = vor.u32 %v505_v37, %v504_v36  ;;  %s3407_s20 = sshll.u32 %s524_s21, 6  ;;  %s517_s24 = scalar_lea.vmem [#allocation5], %s516_s9 }
  0xf0   : > { %v518_v40 = vld [vmem:[%s517_s24] ss:$8 sm:$0xf]  ;;  %s530_s2 = sadd.s32 %s3407_s20, %s527_s22  ;;  %s538_s10 = sshra.s32 %s4466_s16, 3 }
  0xf1   : > { %v519_v41 = vld [vmem:[%s517_s24] ss:$8 sm:$0xf0]  ;;  %v507_v42 = vadd.f32 %v506_v39, %v493_v38  ;;  %s531_s7 = scalar_lea.vmem [#allocation5], %s530_s2  ;;  %s541_s4 = sand.u32 7, %s4466_s16 }
  0xf2   : > { %v520_v43 = vor.u32 %v519_v41, %v518_v40  ;;  %v532_v44 = vld [vmem:[%s531_s7] ss:$8 sm:$0xf]  ;;  %s3408_s27 = sshll.u32 %s538_s10, 6  ;;  %s551_s3 = sld [smem:[#allocation4 + %s550_s18]] }
  0xf3   : > { %v533_v45 = vld [vmem:[%s531_s7] ss:$8 sm:$0xf0]  ;;  %s544_s25 = sadd.s32 %s3408_s27, %s541_s4  ;;  %s564_s1 = sadd.s32 7, %s4444_s17 }
  0xf4   : > { %v521_v46 = vadd.f32 %v520_v43, %v507_v42  ;;  %v534_v47 = vor.u32 %v533_v45, %v532_v44  ;;  %s545_s26 = scalar_lea.vmem [#allocation5], %s544_s25  ;;  %s565_s23 = sld [smem:[#allocation4 + %s564_s1]] }
  0xf5   : > { %v546_v48 = vld [vmem:[%s545_s26] ss:$8 sm:$0xf]  ;;  %s4479_s19 = sadd.s32 24, %s4343_s14 }
  0xf6   : > { %v547_v49 = vld [vmem:[%s545_s26] ss:$8 sm:$0xf0]  ;;  %s4482_s15 = sld [smem:[#allocation4 + %s4479_s19]]  ;;  %s595_s21 = sadd.s32 1, %s4479_s19  ;;  %v535_v50 = vadd.f32 %v534_v47, %v521_v46 }
  0xf7   : > { %v548_v51 = vor.u32 %v547_v49, %v546_v48  ;;  %s609_s16 = sadd.s32 2, %s4479_s19  ;;  %s596_s22 = sld [smem:[#allocation4 + %s595_s21]] }
  0xf8   : > { %s552_s18 = sshra.s32 %s551_s3, 3  ;;  %s555_s9 = sand.u32 7, %s551_s3 }
  0xf9   : > { %s3409_s17 = sshll.u32 %s552_s18, 6  ;;  %s4486_s24 = sld [smem:[#allocation4 + %s609_s16]]  ;;  %v549_v52 = vadd.f32 %v548_v51, %v535_v50  ;;  %v2246_v50 = vld [vmem:[#allocation10 + $0x280] sm:$0xff]  ;;  %v2247_v51 = vld [vmem:[#allocation10 + $0x288] sm:$0xff] }
  0xfa   : > { %s558_s20 = sadd.s32 %s3409_s17, %s555_s9  ;;  %s566_s2 = sshra.s32 %s565_s23, 3 }
  0xfb   : > { %s559_s10 = scalar_lea.vmem [#allocation5], %s558_s20  ;;  %s569_s7 = sand.u32 7, %s565_s23 }
  0xfc   : > { %v560_v53 = vld [vmem:[%s559_s10] ss:$8 sm:$0xf]  ;;  %s3410_s4 = sshll.u32 %s566_s2, 6  ;;  %s584_s25 = sshra.s32 %s4482_s15, 3 }
  0xfd   : > { %v561_v54 = vld [vmem:[%s559_s10] ss:$8 sm:$0xf0]  ;;  %s572_s27 = sadd.s32 %s3410_s4, %s569_s7  ;;  %s587_s1 = sand.u32 7, %s4482_s15 }
  0xfe   : > { %v562_v55 = vor.u32 %v561_v54, %v560_v53  ;;  %s573_s3 = scalar_lea.vmem [#allocation5], %s572_s27  ;;  %s3413_s26 = sshll.u32 %s584_s25, 6  ;;  %v2278_v53 = vld [vmem:[#allocation10 + $0x380] sm:$0xff]  ;;  %v2279_v54 = vld [vmem:[#allocation10 + $0x388] sm:$0xff] }
  0xff   : > { %v574_v57 = vld [vmem:[%s573_s3] ss:$8 sm:$0xf]  ;;  %s597_s21 = sshra.s32 %s596_s22, 3  ;;  %s590_s16 = sadd.s32 %s3413_s26, %s587_s1 }
 0x100   : > { %v563_v56 = vadd.f32 %v562_v55, %v549_v52  ;;  %v575_v58 = vld [vmem:[%s573_s3] ss:$8 sm:$0xf0]  ;;  %s600_s18 = sand.u32 7, %s596_s22  ;;  %s3414_s9 = sshll.u32 %s597_s21, 6  ;;  %v3773_v52 = vpack.c.bf16 %v2247_v51, %v2246_v50 }
 0x101   : > { %v576_v59 = vor.u32 %v575_v58, %v574_v57  ;;  %s591_s17 = scalar_lea.vmem [#allocation5], %s590_s16  ;;  %s603_s23 = sadd.s32 %s3414_s9, %s600_s18 }
 0x102   : > { %v592_v61 = vld [vmem:[%s591_s17] ss:$8 sm:$0xf]  ;;  %s623_s20 = sadd.s32 3, %s4479_s19  ;;  %s611_s15 = sshra.s32 %s4486_s24, 3  ;;  %3774 = vmatprep.subr.bf16.mxu0 %v3773_v52 }
 0x103   : > { %v577_v60 = vadd.f32 %v576_v59, %v563_v56  ;;  %v593_v62 = vld [vmem:[%s591_s17] ss:$8 sm:$0xf0]  ;;  %s604_s2 = scalar_lea.vmem [#allocation5], %s603_s23  ;;  %s614_s10 = sand.u32 7, %s4486_s24  ;;  %v3805_v56 = vpack.c.bf16 %v2279_v54, %v2278_v53 }
 0x104   : > { %v605_v63 = vld [vmem:[%s604_s2] ss:$8 sm:$0xf]  ;;  %s3415_s7 = sshll.u32 %s611_s15, 6  ;;  %s624_s4 = sld [smem:[#allocation4 + %s623_s20]]  ;;  %v594_v1 = vor.u32 %v593_v62, %v592_v61 }
 0x105   : > { %579 = vst [vmem:[#allocation2 + $0x2] ss:$8 sm:$0xf] %v577_v60  ;;  %580 = vst [vmem:[#allocation2 + $0x2] ss:$8 sm:$0xf0] %v577_v60  ;;  %s617_s22 = sadd.s32 %s3415_s7, %s614_s10  ;;  %3806 = vmatprep.subr.bf16.mxu1 %v3805_v56 }
 0x106   : > { %v606_v0 = vld [vmem:[%s604_s2] ss:$8 sm:$0xf0]  ;;  %s637_s27 = sadd.s32 4, %s4479_s19  ;;  %s618_s25 = scalar_lea.vmem [#allocation5], %s617_s22 }
 0x107   : > { %v607_v2 = vor.u32 %v606_v0, %v605_v63  ;;  %v619_v3 = vld [vmem:[%s618_s25] ss:$8 sm:$0xf]  ;;  %s638_s1 = sld [smem:[#allocation4 + %s637_s27]]  ;;  %s651_s3 = sadd.s32 5, %s4479_s19 }
 0x108   : > { %v620_v4 = vld [vmem:[%s618_s25] ss:$8 sm:$0xf0]  ;;  %s4495_s26 = sld [smem:[#allocation4 + %s651_s3]]  ;;  %s665_s21 = sadd.s32 6, %s4479_s19 }
 0x109   : > { %v608_v5 = vadd.f32 %v607_v2, %v594_v1  ;;  %v621_v6 = vor.u32 %v620_v4, %v619_v3  ;;  %s4498_s16 = sld [smem:[#allocation4 + %s665_s21]]  ;;  %s679_s24 = sadd.s32 7, %s4479_s19 }
 0x10a   : > { %s625_s18 = sshra.s32 %s624_s4, 3  ;;  %s628_s9 = sand.u32 7, %s624_s4 }
 0x10b   : > { %s3416_s17 = sshll.u32 %s625_s18, 6  ;;  %s4501_s23 = sld [smem:[#allocation4 + %s679_s24]]  ;;  %v622_v7 = vadd.f32 %v621_v6, %v608_v5 }
 0x10c   : > { %s631_s20 = sadd.s32 %s3416_s17, %s628_s9  ;;  %s4504_s15 = sadd.s32 32, %s4343_s14 }
 0x10d   : > { %s639_s2 = sshra.s32 %s638_s1, 3  ;;  %s632_s10 = scalar_lea.vmem [#allocation5], %s631_s20 }
 0x10e   : > { %v633_v8 = vld [vmem:[%s632_s10] ss:$8 sm:$0xf]  ;;  %s642_s7 = sand.u32 7, %s638_s1  ;;  %s3417_s19 = sshll.u32 %s639_s2, 6 }
 0x10f   : > { %v634_v9 = vld [vmem:[%s632_s10] ss:$8 sm:$0xf0]  ;;  %s645_s22 = sadd.s32 %s3417_s19, %s642_s7  ;;  %s653_s27 = sshra.s32 %s4495_s26, 3 }
 0x110   : > { %v635_v10 = vor.u32 %v634_v9, %v633_v8  ;;  %s656_s4 = sand.u32 7, %s4495_s26  ;;  %s646_s25 = scalar_lea.vmem [#allocation5], %s645_s22 }
 0x111   : > { %v647_v12 = vld [vmem:[%s646_s25] ss:$8 sm:$0xf]  ;;  %s3418_s3 = sshll.u32 %s653_s27, 6  ;;  %s667_s21 = sshra.s32 %s4498_s16, 3 }
 0x112   : > { %v636_v11 = vadd.f32 %v635_v10, %v622_v7  ;;  %v648_v13 = vld [vmem:[%s646_s25] ss:$8 sm:$0xf0]  ;;  %s659_s24 = sadd.s32 %s3418_s3, %s656_s4  ;;  %s670_s18 = sand.u32 7, %s4498_s16 }
 0x113   : > { %v649_v14 = vor.u32 %v648_v13, %v647_v12  ;;  %s3419_s9 = sshll.u32 %s667_s21, 6  ;;  %s660_s17 = scalar_lea.vmem [#allocation5], %s659_s24 }
 0x114   : > { %v661_v16 = vld [vmem:[%s660_s17] ss:$8 sm:$0xf]  ;;  %s673_s1 = sadd.s32 %s3419_s9, %s670_s18  ;;  %s681_s26 = sshra.s32 %s4501_s23, 3 }
 0x115   : > { %v650_v15 = vadd.f32 %v649_v14, %v636_v11  ;;  %v662_v17 = vld [vmem:[%s660_s17] ss:$8 sm:$0xf0]  ;;  %s674_s20 = scalar_lea.vmem [#allocation5], %s673_s1  ;;  %s684_s2 = sand.u32 7, %s4501_s23 }
 0x116   : > { %v663_v18 = vor.u32 %v662_v17, %v661_v16  ;;  %v675_v19 = vld [vmem:[%s674_s20] ss:$8 sm:$0xf]  ;;  %s3420_s10 = sshll.u32 %s681_s26, 6  ;;  %s698_s7 = sld [smem:[#allocation4 + %s4504_s15]] }
 0x117   : > { %v676_v20 = vld [vmem:[%s674_s20] ss:$8 sm:$0xf0]  ;;  %s687_s16 = sadd.s32 %s3420_s10, %s684_s2  ;;  %s710_s19 = sadd.s32 1, %s4504_s15 }
 0x118   : > { %v664_v21 = vadd.f32 %v663_v18, %v650_v15  ;;  %v677_v22 = vor.u32 %v676_v20, %v675_v19  ;;  %s688_s22 = scalar_lea.vmem [#allocation5], %s687_s16  ;;  %s711_s27 = sld [smem:[#allocation4 + %s710_s19]] }
 0x119   : > { %v689_v24 = vld [vmem:[%s688_s22] ss:$8 sm:$0xf]  ;;  %s724_s4 = sadd.s32 2, %s4504_s15  ;;  %s738_s3 = sadd.s32 3, %s4504_s15 }
 0x11a   : > { %v678_v23 = vadd.f32 %v677_v22, %v664_v21  ;;  %v690_v25 = vld [vmem:[%s688_s22] ss:$8 sm:$0xf0]  ;;  %s4515_s25 = sld [smem:[#allocation4 + %s724_s4]]  ;;  %s752_s9 = sadd.s32 4, %s4504_s15 }
 0x11b   : > { %v691_v26 = vor.u32 %v690_v25, %v689_v24  ;;  %s4518_s21 = sld [smem:[#allocation4 + %s738_s3]]  ;;  %s766_s20 = sadd.s32 5, %s4504_s15 }
 0x11c   : > { %s699_s23 = sshra.s32 %s698_s7, 3  ;;  %s702_s24 = sand.u32 7, %s698_s7 }
 0x11d   : > { %v692_v27 = vadd.f32 %v691_v26, %v678_v23  ;;  %s3423_s18 = sshll.u32 %s699_s23, 6  ;;  %s4521_s26 = sld [smem:[#allocation4 + %s752_s9]] }
 0x11e   : > { %s705_s17 = sadd.s32 %s3423_s18, %s702_s24  ;;  %s712_s1 = sshra.s32 %s711_s27, 3 }
 0x11f   : > { %694 = vst [vmem:[#allocation2 + $0x3] ss:$8 sm:$0xf] %v692_v27  ;;  %695 = vst [vmem:[#allocation2 + $0x3] ss:$8 sm:$0xf0] %v692_v27 }
 0x120   : > { %s706_s2 = scalar_lea.vmem [#allocation5], %s705_s17  ;;  %s715_s10 = sand.u32 7, %s711_s27 }
 0x121   : > { %v707_v28 = vld [vmem:[%s706_s2] ss:$8 sm:$0xf]  ;;  %s3424_s16 = sshll.u32 %s712_s1, 6  ;;  %s726_s22 = sshra.s32 %s4515_s25, 3 }
 0x122   : > { %v708_v29 = vld [vmem:[%s706_s2] ss:$8 sm:$0xf0]  ;;  %s718_s19 = sadd.s32 %s3424_s16, %s715_s10  ;;  %s729_s7 = sand.u32 7, %s4515_s25 }
 0x123   : > { %s719_s4 = scalar_lea.vmem [#allocation5], %s718_s19  ;;  %v709_v32 = vor.u32 %v708_v29, %v707_v28  ;;  %s3425_s3 = sshll.u32 %s726_s22, 6 }
 0x124   : > { %v720_v30 = vld [vmem:[%s719_s4] ss:$8 sm:$0xf]  ;;  %s740_s23 = sshra.s32 %s4518_s21, 3  ;;  %s732_s24 = sadd.s32 %s3425_s3, %s729_s7 }
 0x125   : > { %v721_v31 = vld [vmem:[%s719_s4] ss:$8 sm:$0xf0]  ;;  %s743_s18 = sand.u32 7, %s4518_s21  ;;  %s3426_s9 = sshll.u32 %s740_s23, 6 }
 0x126   : > { %v722_v33 = vor.u32 %v721_v31, %v720_v30  ;;  %s733_s17 = scalar_lea.vmem [#allocation5], %s732_s24  ;;  %s746_s27 = sadd.s32 %s3426_s9, %s743_s18 }
 0x127   : > { %v734_v34 = vld [vmem:[%s733_s17] ss:$8 sm:$0xf]  ;;  %s754_s25 = sshra.s32 %s4521_s26, 3  ;;  %s747_s1 = scalar_lea.vmem [#allocation5], %s746_s27 }
 0x128   : > { %v735_v35 = vld [vmem:[%s733_s17] ss:$8 sm:$0xf0]  ;;  %v723_v36 = vadd.f32 %v722_v33, %v709_v32  ;;  %s757_s2 = sand.u32 7, %s4521_s26  ;;  %s3427_s10 = sshll.u32 %s754_s25, 6 }
 0x129   : > { %v736_v37 = vor.u32 %v735_v35, %v734_v34  ;;  %v748_v38 = vld [vmem:[%s747_s1] ss:$8 sm:$0xf]  ;;  %s760_s16 = sadd.s32 %s3427_s10, %s757_s2  ;;  %s767_s19 = sld [smem:[#allocation4 + %s766_s20]] }
 0x12a   : > { %v749_v39 = vld [vmem:[%s747_s1] ss:$8 sm:$0xf0]  ;;  %s780_s21 = sadd.s32 6, %s4504_s15  ;;  %s761_s22 = scalar_lea.vmem [#allocation5], %s760_s16 }
 0x12b   : > { %v737_v40 = vadd.f32 %v736_v37, %v723_v36  ;;  %v750_v41 = vor.u32 %v749_v39, %v748_v38  ;;  %v762_v42 = vld [vmem:[%s761_s22] ss:$8 sm:$0xf]  ;;  %s781_s7 = sld [smem:[#allocation4 + %s780_s21]]  ;;  %s794_s4 = sadd.s32 7, %s4504_s15 }
 0x12c   : > { %v763_v43 = vld [vmem:[%s761_s22] ss:$8 sm:$0xf0]  ;;  %s4534_s3 = sld [smem:[#allocation4 + %s794_s4]]  ;;  %s4537_s23 = sadd.s32 40, %s4343_s14 }
 0x12d   : > { %v751_v44 = vadd.f32 %v750_v41, %v737_v40  ;;  %v764_v45 = vor.u32 %v763_v43, %v762_v42  ;;  %s825_s26 = sadd.s32 1, %s4537_s23  ;;  %s4541_s9 = sld [smem:[#allocation4 + %s4537_s23]] }
 0x12e   : > { %s4543_s27 = sld [smem:[#allocation4 + %s825_s26]] }
 0x12f   : > { %s768_s24 = sshra.s32 %s767_s19, 3  ;;  %s771_s18 = sand.u32 7, %s767_s19  ;;  %v765_v46 = vadd.f32 %v764_v45, %v751_v44 }
 0x130   : > { %s3428_s20 = sshll.u32 %s768_s24, 6 }
 0x131   : > { %s774_s17 = sadd.s32 %s3428_s20, %s771_s18  ;;  %s782_s15 = sshra.s32 %s781_s7, 3 }
 0x132   : > { %s775_s25 = scalar_lea.vmem [#allocation5], %s774_s17  ;;  %s785_s1 = sand.u32 7, %s781_s7 }
 0x133   : > { %v776_v47 = vld [vmem:[%s775_s25] ss:$8 sm:$0xf]  ;;  %s3429_s2 = sshll.u32 %s782_s15, 6  ;;  %s796_s16 = sshra.s32 %s4534_s3, 3 }
 0x134   : > { %v777_v48 = vld [vmem:[%s775_s25] ss:$8 sm:$0xf0]  ;;  %s788_s10 = sadd.s32 %s3429_s2, %s785_s1  ;;  %s799_s19 = sand.u32 7, %s4534_s3 }
 0x135   : > { %v778_v49 = vor.u32 %v777_v48, %v776_v47  ;;  %s789_s21 = scalar_lea.vmem [#allocation5], %s788_s10  ;;  %s3430_s22 = sshll.u32 %s796_s16, 6 }
 0x136   : > { %v790_v57 = vld [vmem:[%s789_s21] ss:$8 sm:$0xf]  ;;  %s814_s7 = sshra.s32 %s4541_s9, 3  ;;  %s802_s4 = sadd.s32 %s3430_s22, %s799_s19 }
 0x137   : > { %v779_v55 = vadd.f32 %v778_v49, %v765_v46  ;;  %v791_v58 = vld [vmem:[%s789_s21] ss:$8 sm:$0xf0]  ;;  %s817_s26 = sand.u32 7, %s4541_s9  ;;  %s3433_s24 = sshll.u32 %s814_s7, 6 }
 0x138   : > { %v792_v59 = vor.u32 %v791_v58, %v790_v57  ;;  %s803_s18 = scalar_lea.vmem [#allocation5], %s802_s4  ;;  %s820_s3 = sadd.s32 %s3433_s24, %s817_s26 }
 0x139   : > { %v804_v61 = vld [vmem:[%s803_s18] ss:$8 sm:$0xf]  ;;  %s827_s20 = sshra.s32 %s4543_s27, 3  ;;  %s839_s17 = sadd.s32 2, %s4537_s23 }
 0x13a   : > { %v793_v60 = vadd.f32 %v792_v59, %v779_v55  ;;  %v805_v62 = vld [vmem:[%s803_s18] ss:$8 sm:$0xf0]  ;;  %s830_s15 = sand.u32 7, %s4543_s27  ;;  %s3434_s25 = sshll.u32 %s827_s20, 6 }
 0x13b   : > { %v806_v63 = vor.u32 %v805_v62, %v804_v61  ;;  %s833_s1 = sadd.s32 %s3434_s25, %s830_s15  ;;  %s840_s2 = sld [smem:[#allocation4 + %s839_s17]] }
 0x13c   : > { %s853_s9 = sadd.s32 3, %s4537_s23  ;;  %s821_s10 = scalar_lea.vmem [#allocation5], %s820_s3 }
 0x13d   : > { %v807_v0 = vadd.f32 %v806_v63, %v793_v60  ;;  %v822_v1 = vld [vmem:[%s821_s10] ss:$8 sm:$0xf]  ;;  %s834_s16 = scalar_lea.vmem [#allocation5], %s833_s1  ;;  %s854_s19 = sld [smem:[#allocation4 + %s853_s9]] }
 0x13e   : > { %v823_v2 = vld [vmem:[%s821_s10] ss:$8 sm:$0xf0]  ;;  %s867_s21 = sadd.s32 4, %s4537_s23  ;;  %s881_s27 = sadd.s32 5, %s4537_s23 }
 0x13f   : > { %809 = vst [vmem:[#allocation2 + $0x4] ss:$8 sm:$0xf] %v807_v0  ;;  %810 = vst [vmem:[#allocation2 + $0x4] ss:$8 sm:$0xf0] %v807_v0  ;;  %v824_v5 = vor.u32 %v823_v2, %v822_v1 }
 0x140   : > { %v835_v3 = vld [vmem:[%s834_s16] ss:$8 sm:$0xf]  ;;  %s4554_s22 = sld [smem:[#allocation4 + %s867_s21]]  ;;  %s895_s4 = sadd.s32 6, %s4537_s23 }
 0x141   : > { %v836_v4 = vld [vmem:[%s834_s16] ss:$8 sm:$0xf0]  ;;  %s4557_s7 = sld [smem:[#allocation4 + %s881_s27]]  ;;  %s841_s26 = sshra.s32 %s840_s2, 3 }
 0x142   : > { %s844_s24 = sand.u32 7, %s840_s2  ;;  %v837_v6 = vor.u32 %v836_v4, %v835_v3  ;;  %s3435_s18 = sshll.u32 %s841_s26, 6 }
 0x143   : > { %s4560_s3 = sld [smem:[#allocation4 + %s895_s4]]  ;;  %s847_s20 = sadd.s32 %s3435_s18, %s844_s24 }
 0x144   : > { %s909_s17 = sadd.s32 7, %s4537_s23  ;;  %s855_s15 = sshra.s32 %s854_s19, 3  ;;  %v838_v9 = vadd.f32 %v837_v6, %v824_v5 }
 0x145   : > { %s848_s25 = scalar_lea.vmem [#allocation5], %s847_s20  ;;  %s858_s1 = sand.u32 7, %s854_s19 }
 0x146   : > { %v849_v7 = vld [vmem:[%s848_s25] ss:$8 sm:$0xf]  ;;  %s3436_s9 = sshll.u32 %s855_s15, 6  ;;  %s869_s10 = sshra.s32 %s4554_s22, 3 }
 0x147   : > { %v850_v8 = vld [vmem:[%s848_s25] ss:$8 sm:$0xf0]  ;;  %s861_s2 = sadd.s32 %s3436_s9, %s858_s1  ;;  %s872_s16 = sand.u32 7, %s4554_s22 }
 0x148   : > { %v851_v10 = vor.u32 %v850_v8, %v849_v7  ;;  %s862_s21 = scalar_lea.vmem [#allocation5], %s861_s2  ;;  %s3437_s27 = sshll.u32 %s869_s10, 6 }
 0x149   : > { %v863_v11 = vld [vmem:[%s862_s21] ss:$8 sm:$0xf]  ;;  %s883_s4 = sshra.s32 %s4557_s7, 3  ;;  %s875_s26 = sadd.s32 %s3437_s27, %s872_s16 }
 0x14a   : > { %v864_v12 = vld [vmem:[%s862_s21] ss:$8 sm:$0xf0]  ;;  %v852_v13 = vadd.f32 %v851_v10, %v838_v9  ;;  %s886_s24 = sand.u32 7, %s4557_s7  ;;  %s3438_s18 = sshll.u32 %s883_s4, 6 }
 0x14b   : > { %v865_v14 = vor.u32 %v864_v12, %v863_v11  ;;  %s876_s20 = scalar_lea.vmem [#allocation5], %s875_s26  ;;  %s889_s19 = sadd.s32 %s3438_s18, %s886_s24 }
 0x14c   : > { %v877_v15 = vld [vmem:[%s876_s20] ss:$8 sm:$0xf]  ;;  %s897_s22 = sshra.s32 %s4560_s3, 3  ;;  %s890_s15 = scalar_lea.vmem [#allocation5], %s889_s19 }
 0x14d   : > { %v878_v16 = vld [vmem:[%s876_s20] ss:$8 sm:$0xf0]  ;;  %v866_v17 = vadd.f32 %v865_v14, %v852_v13  ;;  %s900_s25 = sand.u32 7, %s4560_s3  ;;  %s3439_s1 = sshll.u32 %s897_s22, 6 }
 0x14e   : > { %v879_v18 = vor.u32 %v878_v16, %v877_v15  ;;  %v891_v19 = vld [vmem:[%s890_s15] ss:$8 sm:$0xf]  ;;  %s903_s9 = sadd.s32 %s3439_s1, %s900_s25  ;;  %s910_s2 = sld [smem:[#allocation4 + %s909_s17]] }
 0x14f   : > { %v892_v20 = vld [vmem:[%s890_s15] ss:$8 sm:$0xf0]  ;;  %s4572_s7 = sadd.s32 48, %s4343_s14  ;;  %s904_s10 = scalar_lea.vmem [#allocation5], %s903_s9 }
 0x150   : > { %v880_v21 = vadd.f32 %v879_v18, %v866_v17  ;;  %v893_v22 = vor.u32 %v892_v20, %v891_v19  ;;  %v905_v23 = vld [vmem:[%s904_s10] ss:$8 sm:$0xf]  ;;  %s928_s16 = sld [smem:[#allocation4 + %s4572_s7]]  ;;  %s940_s21 = sadd.s32 1, %s4572_s7 }
 0x151   : > { %v906_v24 = vld [vmem:[%s904_s10] ss:$8 sm:$0xf0]  ;;  %s4576_s27 = sld [smem:[#allocation4 + %s940_s21]]  ;;  %s954_s3 = sadd.s32 2, %s4572_s7 }
 0x152   : > { %v894_v25 = vadd.f32 %v893_v22, %v880_v21  ;;  %v907_v26 = vor.u32 %v906_v24, %v905_v23  ;;  %s968_s23 = sadd.s32 3, %s4572_s7  ;;  %s4580_s24 = sld [smem:[#allocation4 + %s954_s3]]  ;;  %v2094_v22 = vlaneseq }
 0x153   : > { %s4582_s20 = sld [smem:[#allocation4 + %s968_s23]]  ;;  %s982_s10 = sadd.s32 4, %s4572_s7 }
 0x154   : > { %s911_s17 = sshra.s32 %s910_s2, 3  ;;  %s914_s4 = sand.u32 7, %s910_s2  ;;  %v908_v27 = vadd.f32 %v907_v26, %v894_v25 }
 0x155   : > { %s3440_s26 = sshll.u32 %s911_s17, 6 }
 0x156   : > { %s917_s18 = sadd.s32 %s3440_s26, %s914_s4  ;;  %s929_s19 = sshra.s32 %s928_s16, 3 }
 0x157   : > { %s918_s22 = scalar_lea.vmem [#allocation5], %s917_s18  ;;  %s932_s15 = sand.u32 7, %s928_s16 }
 0x158   : > { %v919_v28 = vld [vmem:[%s918_s22] ss:$8 sm:$0xf]  ;;  %s3443_s25 = sshll.u32 %s929_s19, 6  ;;  %s942_s9 = sshra.s32 %s4576_s27, 3 }
 0x159   : > { %v920_v29 = vld [vmem:[%s918_s22] ss:$8 sm:$0xf0]  ;;  %s935_s1 = sadd.s32 %s3443_s25, %s932_s15  ;;  %s945_s2 = sand.u32 7, %s4576_s27 }
 0x15a   : > { %v921_v30 = vor.u32 %v920_v29, %v919_v28  ;;  %s936_s21 = scalar_lea.vmem [#allocation5], %s935_s1  ;;  %s3444_s3 = sshll.u32 %s942_s9, 6 }
 0x15b   : > { %v937_v32 = vld [vmem:[%s936_s21] ss:$8 sm:$0xf]  ;;  %s956_s23 = sshra.s32 %s4580_s24, 3  ;;  %s948_s17 = sadd.s32 %s3444_s3, %s945_s2 }
 0x15c   : > { %v922_v31 = vadd.f32 %v921_v30, %v908_v27  ;;  %v938_v33 = vld [vmem:[%s936_s21] ss:$8 sm:$0xf0]  ;;  %s959_s4 = sand.u32 7, %s4580_s24  ;;  %s3445_s26 = sshll.u32 %s956_s23, 6  ;;  %v4646_v27 = vshrl.u32 %v2094_v22, 7 }
 0x15d   : > { %s949_s18 = scalar_lea.vmem [#allocation5], %s948_s17  ;;  %s962_s16 = sadd.s32 %s3445_s26, %s959_s4  ;;  %v939_v36 = vor.u32 %v938_v33, %v937_v32  ;;  %v2092_v33 = vld [vmem:[#allocation8] sm:$0xff] }
 0x15e   : > { %924 = vst [vmem:[#allocation2 + $0x5] ss:$8 sm:$0xf] %v922_v31  ;;  %925 = vst [vmem:[#allocation2 + $0x5] ss:$8 sm:$0xf0] %v922_v31 }
 0x15f   : > { %v950_v34 = vld [vmem:[%s949_s18] ss:$8 sm:$0xf]  ;;  %s970_s27 = sshra.s32 %s4582_s20, 3  ;;  %s963_s19 = scalar_lea.vmem [#allocation5], %s962_s16  ;;  %v2100_v32 = vsub.s32 1, %v4646_v27 }
 0x160   : > { %v951_v35 = vld [vmem:[%s949_s18] ss:$8 sm:$0xf0]  ;;  %s973_s22 = sand.u32 7, %s4582_s20  ;;  %s3446_s15 = sshll.u32 %s970_s27, 6 }
 0x161   : > { %v952_v37 = vor.u32 %v951_v35, %v950_v34  ;;  %v964_v38 = vld [vmem:[%s963_s19] ss:$8 sm:$0xf]  ;;  %s976_s25 = sadd.s32 %s3446_s15, %s973_s22  ;;  %s983_s1 = sld [smem:[#allocation4 + %s982_s10]]  ;;  %v2096_v34 = vsub.s32 0, %v4646_v27  ;;  %v2108_v35 = vsub.s32 3, %v4646_v27 }
 0x162   : > { %v965_v39 = vld [vmem:[%s963_s19] ss:$8 sm:$0xf0]  ;;  %s996_s24 = sadd.s32 5, %s4572_s7  ;;  %s977_s9 = scalar_lea.vmem [#allocation5], %s976_s25 }
 0x163   : > { %v953_v40 = vadd.f32 %v952_v37, %v939_v36  ;;  %v966_v41 = vor.u32 %v965_v39, %v964_v38  ;;  %v978_v42 = vld [vmem:[%s977_s9] ss:$8 sm:$0xf]  ;;  %s997_s2 = sld [smem:[#allocation4 + %s996_s24]]  ;;  %s1010_s21 = sadd.s32 6, %s4572_s7  ;;  %v2104_v37 = vsub.s32 2, %v4646_v27 }
 0x164   : > { %v979_v43 = vld [vmem:[%s977_s9] ss:$8 sm:$0xf0]  ;;  %s4593_s3 = sld [smem:[#allocation4 + %s1010_s21]]  ;;  %s1024_s23 = sadd.s32 7, %s4572_s7 }
 0x165   : > { %v967_v44 = vadd.f32 %v966_v41, %v953_v40  ;;  %v980_v45 = vor.u32 %v979_v43, %v978_v42  ;;  %s4596_s17 = sld [smem:[#allocation4 + %s1024_s23]]  ;;  %s4599_s20 = sadd.s32 56, %s4343_s14  ;;  %v4660_v43 = vrot.slane %v2092_v33, %v2100_v32  ;;  %v2252_v32 = vld [vmem:[#allocation10 + $0x2b0] sm:$0xff] }
 0x166   : > { %s4602_s18 = sld [smem:[#allocation4 + %s4599_s20]]  ;;  %s1055_s27 = sadd.s32 1, %s4599_s20 }
 0x167   : > { %s984_s10 = sshra.s32 %s983_s1, 3  ;;  %s987_s4 = sand.u32 7, %s983_s1  ;;  %v981_v46 = vadd.f32 %v980_v45, %v967_v44  ;;  %v4662_v44 = vrot.slane %v2092_v33, %v2096_v34  ;;  %v4664_v45 = vrot.slane %v2092_v33, %v2108_v35  ;;  %v2284_v34 = vld [vmem:[#allocation10 + $0x3b0] sm:$0xff]  ;;  %v2285_v35 = vld [vmem:[#allocation10 + $0x3b8] sm:$0xff] }
 0x168   : > { %s3447_s26 = sshll.u32 %s984_s10, 6 }
 0x169   : > { %s990_s16 = sadd.s32 %s3447_s26, %s987_s4  ;;  %s998_s19 = sshra.s32 %s997_s2, 3 }
 0x16a   : > { %s991_s7 = scalar_lea.vmem [#allocation5], %s990_s16  ;;  %s1001_s22 = sand.u32 7, %s997_s2 }
 0x16b   : > { %v992_v47 = vld [vmem:[%s991_s7] ss:$8 sm:$0xf]  ;;  %s3448_s15 = sshll.u32 %s998_s19, 6  ;;  %s1012_s24 = sshra.s32 %s4593_s3, 3 }
 0x16c   : > { %v993_v48 = vld [vmem:[%s991_s7] ss:$8 sm:$0xf0]  ;;  %s1004_s25 = sadd.s32 %s3448_s15, %s1001_s22  ;;  %s1015_s1 = sand.u32 7, %s4593_s3 }
 0x16d   : > { %v994_v49 = vor.u32 %v993_v48, %v992_v47  ;;  %s1005_s9 = scalar_lea.vmem [#allocation5], %s1004_s25  ;;  %s3449_s21 = sshll.u32 %s1012_s24, 6  ;;  %v2231_v47 = vld [vmem:[#allocation10 + $0x208] sm:$0xff]  ;;  %v4667_v48 = vrot.slane %v2092_v33, %v2104_v37  ;;  %v2253_v33 = vld [vmem:[#allocation10 + $0x2b8] sm:$0xff] }
 0x16e   : > { %v1006_v51 = vld [vmem:[%s1005_s9] ss:$8 sm:$0xf]  ;;  %s1026_s23 = sshra.s32 %s4596_s17, 3  ;;  %s1018_s10 = sadd.s32 %s3449_s21, %s1015_s1 }
 0x16f   : > { %v995_v50 = vadd.f32 %v994_v49, %v981_v46  ;;  %v1007_v52 = vld [vmem:[%s1005_s9] ss:$8 sm:$0xf0]  ;;  %s1029_s4 = sand.u32 7, %s4596_s17  ;;  %s3450_s26 = sshll.u32 %s1026_s23, 6 }
 0x170   : > { %v1008_v53 = vor.u32 %v1007_v52, %v1006_v51  ;;  %s1019_s16 = scalar_lea.vmem [#allocation5], %s1018_s10  ;;  %s1032_s2 = sadd.s32 %s3450_s26, %s1029_s4  ;;  %v2230_v46 = vld [vmem:[#allocation10 + $0x200] sm:$0xff]  ;;  %v2263_v52 = vld [vmem:[#allocation10 + $0x308] sm:$0xff] }
 0x171   : > { %v1020_v55 = vld [vmem:[%s1019_s16] ss:$8 sm:$0xf]  ;;  %s1044_s3 = sshra.s32 %s4602_s18, 3  ;;  %s1033_s19 = scalar_lea.vmem [#allocation5], %s1032_s2 }
 0x172   : > { %v1009_v54 = vadd.f32 %v1008_v53, %v995_v50  ;;  %v1021_v56 = vld [vmem:[%s1019_s16] ss:$8 sm:$0xf0]  ;;  %s1047_s7 = sand.u32 7, %s4602_s18  ;;  %s3453_s17 = sshll.u32 %s1044_s3, 6 }
 0x173   : > { %v1022_v57 = vor.u32 %v1021_v56, %v1020_v55  ;;  %v1034_v58 = vld [vmem:[%s1033_s19] ss:$8 sm:$0xf]  ;;  %s1050_s22 = sadd.s32 %s3453_s17, %s1047_s7  ;;  %s1056_s15 = sld [smem:[#allocation4 + %s1055_s27]] }
 0x174   : > { %v1035_v59 = vld [vmem:[%s1033_s19] ss:$8 sm:$0xf0]  ;;  %s1069_s25 = sadd.s32 2, %s4599_s20  ;;  %s1083_s1 = sadd.s32 3, %s4599_s20 }
 0x175   : > { %v1023_v60 = vadd.f32 %v1022_v57, %v1009_v54  ;;  %v1036_v61 = vor.u32 %v1035_v59, %v1034_v58  ;;  %s1070_s24 = sld [smem:[#allocation4 + %s1069_s25]]  ;;  %s1097_s21 = sadd.s32 4, %s4599_s20  ;;  %v2262_v49 = vld [vmem:[#allocation10 + $0x300] sm:$0xff]  ;;  %v2248_v53 = vld [vmem:[#allocation10 + $0x290] sm:$0xff]  ;;  %v2249_v54 = vld [vmem:[#allocation10 + $0x298] sm:$0xff] }
 0x176   : > { %s4615_s9 = sld [smem:[#allocation4 + %s1083_s1]]  ;;  %s1111_s10 = sadd.s32 5, %s4599_s20 }
 0x177   : > { %v1037_v62 = vadd.f32 %v1036_v61, %v1023_v60  ;;  %s4618_s23 = sld [smem:[#allocation4 + %s1097_s21]]  ;;  %s1051_s18 = scalar_lea.vmem [#allocation5], %s1050_s22 }
 0x178   : > { %v1052_v63 = vld [vmem:[%s1051_s18] ss:$8 sm:$0xf]  ;;  %s4621_s16 = sld [smem:[#allocation4 + %s1111_s10]]  ;;  %s1125_s3 = sadd.s32 6, %s4599_s20 }
 0x179   : > { %1039 = vst [vmem:[#allocation2 + $0x6] ss:$8 sm:$0xf] %v1037_v62  ;;  %1040 = vst [vmem:[#allocation2 + $0x6] ss:$8 sm:$0xf0] %v1037_v62 }
 0x17a   : > { %s1057_s4 = sshra.s32 %s1056_s15, 3  ;;  %s1060_s26 = sand.u32 7, %s1056_s15  ;;  %v1053_v0 = vld [vmem:[%s1051_s18] ss:$8 sm:$0xf0] }
 0x17b   : > { %s3454_s27 = sshll.u32 %s1057_s4, 6  ;;  %s1071_s19 = sshra.s32 %s1070_s24, 3  ;;  %v1054_v3 = vor.u32 %v1053_v0, %v1052_v63  ;;  %v2280_v63 = vld [vmem:[#allocation10 + $0x390] sm:$0xff]  ;;  %v2281_v0 = vld [vmem:[#allocation10 + $0x398] sm:$0xff] }
 0x17c   : > { %s1063_s2 = sadd.s32 %s3454_s27, %s1060_s26  ;;  %s1074_s17 = sand.u32 7, %s1070_s24 }
 0x17d   : > { %s1064_s7 = scalar_lea.vmem [#allocation5], %s1063_s2  ;;  %s3455_s15 = sshll.u32 %s1071_s19, 6 }
 0x17e   : > { %v1065_v1 = vld [vmem:[%s1064_s7] ss:$8 sm:$0xf]  ;;  %s1077_s22 = sadd.s32 %s3455_s15, %s1074_s17  ;;  %s1085_s25 = sshra.s32 %s4615_s9, 3 }
 0x17f   : > { %v1066_v2 = vld [vmem:[%s1064_s7] ss:$8 sm:$0xf0]  ;;  %s1088_s1 = sand.u32 7, %s4615_s9  ;;  %s1078_s21 = scalar_lea.vmem [#allocation5], %s1077_s22 }
 0x180   : > { %v1067_v4 = vor.u32 %v1066_v2, %v1065_v1  ;;  %v1079_v5 = vld [vmem:[%s1078_s21] ss:$8 sm:$0xf]  ;;  %s3456_s10 = sshll.u32 %s1085_s25, 6  ;;  %s1099_s4 = sshra.s32 %s4618_s23, 3  ;;  %v3775_v2 = vpack.c.bf16 %v2231_v47, %v2230_v46  ;;  %v3785_v47 = vpack.c.bf16 %v2253_v33, %v2252_v32 }
 0x181   : > { %v1080_v6 = vld [vmem:[%s1078_s21] ss:$8 sm:$0xf0]  ;;  %s1091_s26 = sadd.s32 %s3456_s10, %s1088_s1  ;;  %s1102_s18 = sand.u32 7, %s4618_s23 }
 0x182   : > { %v1068_v7 = vadd.f32 %v1067_v4, %v1054_v3  ;;  %v1081_v8 = vor.u32 %v1080_v6, %v1079_v5  ;;  %s3457_s27 = sshll.u32 %s1099_s4, 6  ;;  %s1092_s2 = scalar_lea.vmem [#allocation5], %s1091_s26  ;;  %v2232_v4 = vld [vmem:[#allocation10 + $0x210] sm:$0xff]  ;;  %v2242_v33 = vld [vmem:[#allocation10 + $0x260] sm:$0xff] }
 0x183   : > { %v1093_v9 = vld [vmem:[%s1092_s2] ss:$8 sm:$0xf]  ;;  %s1105_s24 = sadd.s32 %s3457_s27, %s1102_s18  ;;  %s1113_s9 = sshra.s32 %s4621_s16, 3 }
 0x184   : > { %v1094_v10 = vld [vmem:[%s1092_s2] ss:$8 sm:$0xf0]  ;;  %v1082_v11 = vadd.f32 %v1081_v8, %v1068_v7  ;;  %s1106_s19 = scalar_lea.vmem [#allocation5], %s1105_s24  ;;  %s1116_s7 = sand.u32 7, %s4621_s16  ;;  %v3807_v8 = vpack.c.bf16 %v2263_v52, %v2262_v49  ;;  %v3817_v49 = vpack.c.bf16 %v2285_v35, %v2284_v34 }
 0x185   : > { %v1095_v12 = vor.u32 %v1094_v10, %v1093_v9  ;;  %v1107_v13 = vld [vmem:[%s1106_s19] ss:$8 sm:$0xf]  ;;  %s3458_s17 = sshll.u32 %s1113_s9, 6  ;;  %s1126_s22 = sld [smem:[#allocation4 + %s1125_s3]] }
 0x186   : > { %v1108_v14 = vld [vmem:[%s1106_s19] ss:$8 sm:$0xf0]  ;;  %s1119_s15 = sadd.s32 %s3458_s17, %s1116_s7  ;;  %s1139_s23 = sadd.s32 7, %s4599_s20 }
 0x187   : > { %v1096_v15 = vadd.f32 %v1095_v12, %v1082_v11  ;;  %v1109_v16 = vor.u32 %v1108_v14, %v1107_v13  ;;  %s1120_s25 = scalar_lea.vmem [#allocation5], %s1119_s15  ;;  %s1140_s1 = sld [smem:[#allocation4 + %s1139_s23]]  ;;  %v2233_v9 = vld [vmem:[#allocation10 + $0x218] sm:$0xff]  ;;  %v3777_v11 = vpack.c.bf16 %v2249_v54, %v2248_v53  ;;  %v3809_v12 = vpack.c.bf16 %v2281_v0, %v2280_v63  ;;  %v2264_v13 = vld [vmem:[#allocation10 + $0x310] sm:$0xff]  ;;  %v2254_v52 = vld [vmem:[#allocation10 + $0x2c0] sm:$0xff] }
 0x188   : > { %v1121_v17 = vld [vmem:[%s1120_s25] ss:$8 sm:$0xf]  ;;  %s4634_s21 = sadd.s32 64, %s4343_s14  ;;  %v3779_v22 = vpack.c.bf16 %v2233_v9, %v2232_v4 }
 0x189   : > { %v1122_v18 = vld [vmem:[%s1120_s25] ss:$8 sm:$0xf0]  ;;  %s4637_s10 = sld [smem:[#allocation4 + %s4634_s21]]  ;;  %s1170_s4 = sadd.s32 1, %s4634_s21  ;;  %v1110_v19 = vadd.f32 %v1109_v16, %v1096_v15 }
 0x18a   : > { %v1123_v20 = vor.u32 %v1122_v18, %v1121_v17  ;;  %s1184_s16 = sadd.s32 2, %s4634_s21  ;;  %s4641_s20 = sld [smem:[#allocation4 + %s1170_s4]]  ;;  %v2265_v14 = vld [vmem:[#allocation10 + $0x318] sm:$0xff]  ;;  %v2250_v15 = vld [vmem:[#allocation10 + $0x2a0] sm:$0xff]  ;;  %v2251_v16 = vld [vmem:[#allocation10 + $0x2a8] sm:$0xff] }
 0x18b   : > { %s1127_s26 = sshra.s32 %s1126_s22, 3  ;;  %s1130_s3 = sand.u32 7, %s1126_s22  ;;  %v2282_v17 = vld [vmem:[#allocation10 + $0x3a0] sm:$0xff]  ;;  %v2283_v18 = vld [vmem:[#allocation10 + $0x3a8] sm:$0xff]  ;;  %v2289_v9 = vld [vmem:[#allocation10 + $0x3d8] sm:$0xff] }
 0x18c   : > { %s3459_s18 = sshll.u32 %s1127_s26, 6  ;;  %s4643_s2 = sld [smem:[#allocation4 + %s1184_s16]]  ;;  %v1124_v21 = vadd.f32 %v1123_v20, %v1110_v19  ;;  %v2255_v53 = vld [vmem:[#allocation10 + $0x2c8] sm:$0xff]  ;;  %v2286_v54 = vld [vmem:[#allocation10 + $0x3c0] sm:$0xff] }
 0x18d   : > { %s1133_s27 = sadd.s32 %s3459_s18, %s1130_s3  ;;  %s1141_s24 = sshra.s32 %s1140_s1, 3  ;;  %v2270_v63 = vld [vmem:[#allocation10 + $0x340] sm:$0xff]  ;;  %v2271_v0 = vld [vmem:[#allocation10 + $0x348] sm:$0xff] }
 0x18e   : > { %s1134_s9 = scalar_lea.vmem [#allocation5], %s1133_s27  ;;  %s1144_s19 = sand.u32 7, %s1140_s1  ;;  %v2243_v34 = vld [vmem:[#allocation10 + $0x268] sm:$0xff] }
 0x18f   : > { %v1135_v23 = vld [vmem:[%s1134_s9] ss:$8 sm:$0xf]  ;;  %s3460_s7 = sshll.u32 %s1141_s24, 6  ;;  %s1159_s15 = sshra.s32 %s4637_s10, 3 }
 0x190   : > { %v1136_v24 = vld [vmem:[%s1134_s9] ss:$8 sm:$0xf0]  ;;  %s1147_s17 = sadd.s32 %s3460_s7, %s1144_s19  ;;  %s1162_s22 = sand.u32 7, %s4637_s10 }
 0x191   : > { %v1137_v25 = vor.u32 %v1136_v24, %v1135_v23  ;;  %s1148_s23 = scalar_lea.vmem [#allocation5], %s1147_s17  ;;  %s3463_s25 = sshll.u32 %s1159_s15, 6  ;;  %v3811_v23 = vpack.c.bf16 %v2265_v14, %v2264_v13  ;;  %v2234_v24 = vld [vmem:[#allocation10 + $0x220] sm:$0xff]  ;;  %v2241_v13 = vld [vmem:[#allocation10 + $0x258] sm:$0xff] }
 0x192   : > { %v1149_v28 = vld [vmem:[%s1148_s23] ss:$8 sm:$0xf]  ;;  %s1172_s4 = sshra.s32 %s4641_s20, 3  ;;  %s1165_s16 = sadd.s32 %s3463_s25, %s1162_s22 }
 0x193   : > { %v1138_v26 = vadd.f32 %v1137_v25, %v1124_v21  ;;  %v1150_v29 = vld [vmem:[%s1148_s23] ss:$8 sm:$0xf0]  ;;  %s1175_s26 = sand.u32 7, %s4641_s20  ;;  %s3464_s1 = sshll.u32 %s1172_s4, 6 }
 0x194   : > { %v1151_v30 = vor.u32 %v1150_v29, %v1149_v28  ;;  %s1166_s10 = scalar_lea.vmem [#allocation5], %s1165_s16  ;;  %s1178_s3 = sadd.s32 %s3464_s1, %s1175_s26  ;;  %v2235_v25 = vld [vmem:[#allocation10 + $0x228] sm:$0xff]  ;;  %v3781_v28 = vpack.c.bf16 %v2251_v16, %v2250_v15  ;;  %v3813_v29 = vpack.c.bf16 %v2283_v18, %v2282_v17  ;;  %v3823_v15 = vpack.c.bf16 %v2271_v0, %v2270_v63  ;;  %v2272_v16 = vld [vmem:[#allocation10 + $0x350] sm:$0xff]  ;;  %v2273_v17 = vld [vmem:[#allocation10 + $0x358] sm:$0xff] }
 0x195   : > { %v1167_v36 = vld [vmem:[%s1166_s10] ss:$8 sm:$0xf]  ;;  %s1198_s18 = sadd.s32 3, %s4634_s21  ;;  %s1186_s20 = sshra.s32 %s4643_s2, 3 }
 0x196   : > { %v1152_v31 = vadd.f32 %v1151_v30, %v1138_v26  ;;  %v1168_v38 = vld [vmem:[%s1166_s10] ss:$8 sm:$0xf0]  ;;  %s1179_s27 = scalar_lea.vmem [#allocation5], %s1178_s3  ;;  %s1189_s24 = sand.u32 7, %s4643_s2 }
 0x197   : > { %v1180_v39 = vld [vmem:[%s1179_s27] ss:$8 sm:$0xf]  ;;  %s3465_s9 = sshll.u32 %s1186_s20, 6  ;;  %v1169_v41 = vor.u32 %v1168_v38, %v1167_v36  ;;  %s4658_s7 = sld [smem:[#allocation4 + %s1198_s18]] }
 0x198   : > { %1154 = vst [vmem:[#allocation2 + $0x7] ss:$8 sm:$0xf] %v1152_v31  ;;  %1155 = vst [vmem:[#allocation2 + $0x7] ss:$8 sm:$0xf0] %v1152_v31  ;;  %s1192_s19 = sadd.s32 %s3465_s9, %s1189_s24 }
 0x199   : > { %v1181_v40 = vld [vmem:[%s1179_s27] ss:$8 sm:$0xf0]  ;;  %s1212_s17 = sadd.s32 4, %s4634_s21  ;;  %s1193_s2 = scalar_lea.vmem [#allocation5], %s1192_s19 }
 0x19a   : > { %v1182_v42 = vor.u32 %v1181_v40, %v1180_v39  ;;  %v1194_v50 = vld [vmem:[%s1193_s2] ss:$8 sm:$0xf]  ;;  %s4669_s15 = sld [smem:[#allocation4 + %s1212_s17]]  ;;  %s1226_s22 = sadd.s32 5, %s4634_s21  ;;  %v3783_v39 = vpack.c.bf16 %v2235_v25, %v2234_v24 }
 0x19b   : > { %v1195_v51 = vld [vmem:[%s1193_s2] ss:$8 sm:$0xf0]  ;;  %s4672_s23 = sld [smem:[#allocation4 + %s1226_s22]]  ;;  %s1240_s25 = sadd.s32 6, %s4634_s21 }
 0x19c   : > { %v1183_v58 = vadd.f32 %v1182_v42, %v1169_v41  ;;  %v1196_v1 = vor.u32 %v1195_v51, %v1194_v50  ;;  %s4678_s4 = sld [smem:[#allocation4 + %s1240_s25]]  ;;  %s1254_s16 = sadd.s32 7, %s4634_s21  ;;  %v2266_v30 = vld [vmem:[#allocation10 + $0x320] sm:$0xff]  ;;  %v2267_v31 = vld [vmem:[#allocation10 + $0x328] sm:$0xff]  ;;  %v2236_v41 = vld [vmem:[#allocation10 + $0x230] sm:$0xff] }
 0x19d   : > { %s1200_s26 = sshra.s32 %s4658_s7, 3  ;;  %s1203_s1 = sand.u32 7, %s4658_s7  ;;  %v3815_v40 = vpack.c.bf16 %v2267_v31, %v2266_v30  ;;  %v2237_v42 = vld [vmem:[#allocation10 + $0x238] sm:$0xff]  ;;  %v2268_v50 = vld [vmem:[#allocation10 + $0x330] sm:$0xff]  ;;  %v2258_v18 = vld [vmem:[#allocation10 + $0x2e0] sm:$0xff]  ;;  %v3827_v30 = vpack.c.bf16 %v2273_v17, %v2272_v16 }
 0x19e   : > { %s3466_s10 = sshll.u32 %s1200_s26, 6  ;;  %s4684_s3 = sld [smem:[#allocation4 + %s1254_s16]]  ;;  %v1197_v19 = vadd.f32 %v1196_v1, %v1183_v58  ;;  %v2269_v51 = vld [vmem:[#allocation10 + $0x338] sm:$0xff]  ;;  %v2239_v58 = vld [vmem:[#allocation10 + $0x248] sm:$0xff]  ;;  %v2256_v1 = vld [vmem:[#allocation10 + $0x2d0] sm:$0xff] }
 0x19f   : > { %v2077_v55 = vld [vmem:[#allocation2 + $0x8] sm:$0xff]  ;;  %v2076_v56 = vld [vmem:[#allocation2] sm:$0xff]  ;;  %v2079_v57 = vld [vmem:[#allocation2 + $0x18] sm:$0xff]  ;;  %s1206_s21 = sadd.s32 %s3466_s10, %s1203_s1  ;;  %s4687_s18 = sadd.s32 72, %s4343_s14 }
 0x1a0   : > { %v2135_v59 = vadd.f32 %v4660_v43, %v2077_v55  ;;  %v2134_v60 = vadd.f32 %v4662_v44, %v2076_v56  ;;  %v2137_v61 = vadd.f32 %v4664_v45, %v2079_v57  ;;  %v2078_v62 = vld [vmem:[#allocation2 + $0x10] sm:$0xff]  ;;  %s1214_s20 = sshra.s32 %s4669_s15, 3  ;;  %s1207_s27 = scalar_lea.vmem [#allocation5], %s1206_s21  ;;  %v2238_v57 = vld [vmem:[#allocation10 + $0x240] sm:$0xff] }
 0x1a1   : > { %v2136_v3 = vadd.f32 %v4667_v48, %v2078_v62  ;;  %v1208_v20 = vld [vmem:[%s1207_s27] ss:$8 sm:$0xf]  ;;  %s1217_s24 = sand.u32 7, %s4669_s15  ;;  %s3467_s9 = sshll.u32 %s1214_s20, 6  ;;  %v3819_v62 = vpack.c.bf16 %v2269_v51, %v2268_v50  ;;  %v3791_v14 = vpack.c.bf16 %v2239_v58, %v2238_v57 }
 0x1a2   : > { %v2151_v5 = vmax.f32 %v2135_v59, 0.0  ;;  %v2150_v6 = vmax.f32 %v2134_v60, 0.0  ;;  %v2153_v7 = vmax.f32 %v2137_v61, 0.0  ;;  %v1209_v21 = vld [vmem:[%s1207_s27] ss:$8 sm:$0xf0]  ;;  %s1220_s19 = sadd.s32 %s3467_s9, %s1217_s24  ;;  %v3787_v61 = vpack.c.bf16 %v2237_v42, %v2236_v41 }
 0x1a3   : > { %v2152_v10 = vmax.f32 %v2136_v3, 0.0  ;;  %v1210_v26 = vor.u32 %v1209_v21, %v1208_v20  ;;  %s1228_s7 = sshra.s32 %s4672_s23, 3  ;;  %s1231_s17 = sand.u32 7, %s4672_s23  ;;  %v2287_v55 = vld [vmem:[#allocation10 + $0x3c8] sm:$0xff]  ;;  %v3789_v3 = vpack.c.bf16 %v2255_v53, %v2254_v52  ;;  %v2290_v25 = vld [vmem:[#allocation10 + $0x3e0] sm:$0xff] }
 0x1a4   : > { %2365 = vmatprep.mubr.f32.mxu0 %v2151_v5  ;;  %2440 = vmatprep.mubr.f32.mxu1 %v2153_v7  ;;  %s1221_s2 = scalar_lea.vmem [#allocation5], %s1220_s19  ;;  %s3468_s15 = sshll.u32 %s1228_s7, 6  ;;  %v3821_v4 = vpack.c.bf16 %v2287_v55, %v2286_v54  ;;  %v2257_v7 = vld [vmem:[#allocation10 + $0x2d8] sm:$0xff]  ;;  %v2259_v24 = vld [vmem:[#allocation10 + $0x2e8] sm:$0xff] }
 0x1a5   : > { %2366 = vmatmul.mubr.f32.vlgmr.msra.gmra.mrb[0].mxu0 %v2150_v6  ;;  %2441 = vmatmul.mubr.f32.vlgmr.msra.gmra.mrb[0].mxu1 %v2152_v10  ;;  %v1211_v36 = vadd.f32 %v1210_v26, %v1197_v19  ;;  %v1222_v37 = vld [vmem:[%s1221_s2] ss:$8 sm:$0xf]  ;;  %s1242_s22 = sshra.s32 %s4678_s4, 3  ;;  %s1234_s23 = sadd.s32 %s3468_s15, %s1231_s17  ;;  %v3793_v20 = vpack.c.bf16 %v2257_v7, %v2256_v1  ;;  %v3797_v32 = vpack.c.bf16 %v2259_v24, %v2258_v18 }
 0x1a6   : > { %3776 = vmatpush3.bf16.msra.mxu0 %v3775_v2  ;;  %3808 = vmatpush3.bf16.msra.mxu1 %v3807_v8  ;;  %v1223_v38 = vld [vmem:[%s1221_s2] ss:$8 sm:$0xf0]  ;;  %s1245_s25 = sand.u32 7, %s4678_s4  ;;  %s3469_s16 = sshll.u32 %s1242_s22, 6 }
 0x1a7   : > { %3778 = vmatprep.subr.bf16.mxu0 %v3777_v11  ;;  %3810 = vmatprep.subr.bf16.mxu1 %v3809_v12  ;;  %v1224_v46 = vor.u32 %v1223_v38, %v1222_v37  ;;  %s1235_s26 = scalar_lea.vmem [#allocation5], %s1234_s23  ;;  %s1248_s1 = sadd.s32 %s3469_s16, %s1245_s25  ;;  %v2288_v8 = vld [vmem:[#allocation10 + $0x3d0] sm:$0xff]  ;;  %v2291_v26 = vld [vmem:[#allocation10 + $0x3e8] sm:$0xff] }
 0x1a8   : > { %v1236_v59 = vld [vmem:[%s1235_s26] ss:$8 sm:$0xf]  ;;  %s1256_s4 = sshra.s32 %s4684_s3, 3  ;;  %s1249_s10 = scalar_lea.vmem [#allocation5], %s1248_s1  ;;  %v3825_v21 = vpack.c.bf16 %v2289_v9, %v2288_v8  ;;  %v3829_v35 = vpack.c.bf16 %v2291_v26, %v2290_v25 }
 0x1a9   : > { %v1225_v56 = vadd.f32 %v1224_v46, %v1211_v36  ;;  %v1237_v60 = vld [vmem:[%s1235_s26] ss:$8 sm:$0xf0]  ;;  %s1259_s21 = sand.u32 7, %s4684_s3  ;;  %s3470_s20 = sshll.u32 %s1256_s4, 6  ;;  %v3799_v36 = vpack.c.bf16 %v2243_v34, %v2242_v33 }
 0x1aa   : > { %3780 = vmatpush3.bf16.msra.mxu0 %v3779_v22  ;;  %3812 = vmatpush3.bf16.msra.mxu1 %v3811_v23  ;;  %v1238_v2 = vor.u32 %v1237_v60, %v1236_v59  ;;  %v1250_v5 = vld [vmem:[%s1249_s10] ss:$8 sm:$0xf]  ;;  %s1262_s27 = sadd.s32 %s3470_s20, %s1259_s21  ;;  %s4698_s24 = sld [smem:[#allocation4 + %s4687_s18]] }
 0x1ab   : > { %3782 = vmatprep.subr.bf16.mxu0 %v3781_v28  ;;  %3814 = vmatprep.subr.bf16.mxu1 %v3813_v29  ;;  %v1251_v6 = vld [vmem:[%s1249_s10] ss:$8 sm:$0xf0]  ;;  %s1285_s9 = sadd.s32 1, %s4687_s18  ;;  %s1263_s3 = scalar_lea.vmem [#allocation5], %s1262_s27 }
 0x1ac   : > { %v1239_v10 = vadd.f32 %v1238_v2, %v1225_v56  ;;  %v1252_v11 = vor.u32 %v1251_v6, %v1250_v5  ;;  %v2240_v12 = vld [vmem:[#allocation10 + $0x250] sm:$0xff]  ;;  %s4701_s19 = sld [smem:[#allocation4 + %s1285_s9]]  ;;  %s1299_s7 = sadd.s32 2, %s4687_s18 }
 0x1ad   : > { %v1264_v22 = vld [vmem:[%s1263_s3] ss:$8 sm:$0xf]  ;;  %s4704_s17 = sld [smem:[#allocation4 + %s1299_s7]]  ;;  %s1313_s2 = sadd.s32 3, %s4687_s18  ;;  %v3795_v29 = vpack.c.bf16 %v2241_v13, %v2240_v12 }
 0x1ae   : > { %3784 = vmatpush3.bf16.msra.mxu0 %v3783_v39  ;;  %3816 = vmatpush3.bf16.msra.mxu1 %v3815_v40  ;;  %v1253_v19 = vadd.f32 %v1252_v11, %v1239_v10  ;;  %v1265_v23 = vld [vmem:[%s1263_s3] ss:$8 sm:$0xf0]  ;;  %s4707_s15 = sld [smem:[#allocation4 + %s1313_s2]]  ;;  %s1327_s16 = sadd.s32 4, %s4687_s18 }
 0x1af   : > { %3786 = vmatprep.subr.bf16.mxu0 %v3785_v47  ;;  %3818 = vmatprep.subr.bf16.mxu1 %v3817_v49  ;;  %v1266_v28 = vor.u32 %v1265_v23, %v1264_v22  ;;  %s4713_s4 = sld [smem:[#allocation4 + %s1327_s16]]  ;;  %s1341_s10 = sadd.s32 5, %s4687_s18 }
 0x1b0   : > { %s1274_s22 = sshra.s32 %s4698_s24, 3  ;;  %s1277_s23 = sand.u32 7, %s4698_s24 }
 0x1b1   : > { %v1267_v31 = vadd.f32 %v1266_v28, %v1253_v19  ;;  %s3473_s25 = sshll.u32 %s1274_s22, 6 }
 0x1b2   : > { %3788 = vmatpush3.bf16.msra.mxu0 %v3787_v61  ;;  %3820 = vmatpush3.bf16.msra.mxu1 %v3819_v62  ;;  %s1280_s26 = sadd.s32 %s3473_s25, %s1277_s23  ;;  %s1287_s1 = sshra.s32 %s4701_s19, 3 }
 0x1b3   : > { %3790 = vmatprep.subr.bf16.mxu0 %v3789_v3  ;;  %3822 = vmatprep.subr.bf16.mxu1 %v3821_v4  ;;  %1269 = vst [vmem:[#allocation2 + $0x40] ss:$8 sm:$0xf] %v1267_v31  ;;  %1270 = vst [vmem:[#allocation2 + $0x40] ss:$8 sm:$0xf0] %v1267_v31 }
 0x1b4   : > { %s1281_s21 = scalar_lea.vmem [#allocation5], %s1280_s26  ;;  %s1290_s20 = sand.u32 7, %s4701_s19 }
 0x1b5   : > { %v1282_v37 = vld [vmem:[%s1281_s21] ss:$8 sm:$0xf]  ;;  %s3474_s27 = sshll.u32 %s1287_s1, 6  ;;  %s1301_s9 = sshra.s32 %s4704_s17, 3 }
 0x1b6   : > { %3792 = vmatpush3.bf16.msra.mxu0 %v3791_v14  ;;  %3824 = vmatpush3.bf16.msra.mxu1 %v3823_v15  ;;  %v1283_v38 = vld [vmem:[%s1281_s21] ss:$8 sm:$0xf0]  ;;  %s1293_s24 = sadd.s32 %s3474_s27, %s1290_s20  ;;  %s1304_s3 = sand.u32 7, %s4704_s17 }
 0x1b7   : > { %3794 = vmatprep.subr.bf16.mxu0 %v3793_v20  ;;  %3826 = vmatprep.subr.bf16.mxu1 %v3825_v21  ;;  %s1294_s7 = scalar_lea.vmem [#allocation5], %s1293_s24  ;;  %v1284_v41 = vor.u32 %v1283_v38, %v1282_v37  ;;  %s3475_s2 = sshll.u32 %s1301_s9, 6 }
 0x1b8   : > { %v1295_v39 = vld [vmem:[%s1294_s7] ss:$8 sm:$0xf]  ;;  %s1315_s22 = sshra.s32 %s4707_s15, 3  ;;  %s1307_s23 = sadd.s32 %s3475_s2, %s1304_s3 }
 0x1b9   : > { %v1296_v40 = vld [vmem:[%s1294_s7] ss:$8 sm:$0xf0]  ;;  %s1318_s25 = sand.u32 7, %s4707_s15  ;;  %s3476_s16 = sshll.u32 %s1315_s22, 6 }
 0x1ba   : > { %3796 = vmatpush3.bf16.msra.mxu0 %v3795_v29  ;;  %3828 = vmatpush3.bf16.msra.mxu1 %v3827_v30  ;;  %v1297_v42 = vor.u32 %v1296_v40, %v1295_v39  ;;  %s1308_s19 = scalar_lea.vmem [#allocation5], %s1307_s23  ;;  %s1321_s26 = sadd.s32 %s3476_s16, %s1318_s25 }
 0x1bb   : > { %3798 = vmatprep.subr.bf16.mxu0 %v3797_v32  ;;  %3830 = vmatprep.subr.bf16.mxu1 %v3829_v35  ;;  %v1309_v46 = vld [vmem:[%s1308_s19] ss:$8 sm:$0xf]  ;;  %s1329_s17 = sshra.s32 %s4713_s4, 3  ;;  %s1322_s1 = scalar_lea.vmem [#allocation5], %s1321_s26 }
 0x1bc   : > { %v1310_v47 = vld [vmem:[%s1308_s19] ss:$8 sm:$0xf0]  ;;  %v1298_v49 = vadd.f32 %v1297_v42, %v1284_v41  ;;  %s1332_s21 = sand.u32 7, %s4713_s4  ;;  %s3477_s20 = sshll.u32 %s1329_s17, 6 }
 0x1bd   : > { %v1311_v50 = vor.u32 %v1310_v47, %v1309_v46  ;;  %v1323_v51 = vld [vmem:[%s1322_s1] ss:$8 sm:$0xf]  ;;  %s1335_s27 = sadd.s32 %s3477_s20, %s1332_s21  ;;  %s1342_s24 = sld [smem:[#allocation4 + %s1341_s10]] }
 0x1be   : > { %3800 = vmatpush3.bf16.msra.mxu0 %v3799_v36  ;;  %v1324_v52 = vld [vmem:[%s1322_s1] ss:$8 sm:$0xf0]  ;;  %s1355_s15 = sadd.s32 6, %s4687_s18  ;;  %s1336_s9 = scalar_lea.vmem [#allocation5], %s1335_s27 }
 0x1bf   : > { %v1312_v53 = vadd.f32 %v1311_v50, %v1298_v49  ;;  %v1325_v54 = vor.u32 %v1324_v52, %v1323_v51  ;;  %v1337_v55 = vld [vmem:[%s1336_s9] ss:$8 sm:$0xf]  ;;  %s1356_s3 = sld [smem:[#allocation4 + %s1355_s15]]  ;;  %s1369_s7 = sadd.s32 7, %s4687_s18 }
 0x1c0   : > { %v1338_v56 = vld [vmem:[%s1336_s9] ss:$8 sm:$0xf0]  ;;  %s4727_s2 = sld [smem:[#allocation4 + %s1369_s7]]  ;;  %s4730_s22 = sadd.s32 80, %s4343_s14 }
 0x1c1   : > { %v1326_v57 = vadd.f32 %v1325_v54, %v1312_v53  ;;  %v1339_v58 = vor.u32 %v1338_v56, %v1337_v55  ;;  %s1400_s4 = sadd.s32 1, %s4730_s22  ;;  %s4734_s16 = sld [smem:[#allocation4 + %s4730_s22]] }
 0x1c2   : > { %s4736_s26 = sld [smem:[#allocation4 + %s1400_s4]] }
 0x1c3   : > { %s1343_s23 = sshra.s32 %s1342_s24, 3  ;;  %s1346_s10 = sand.u32 7, %s1342_s24  ;;  %v1340_v59 = vadd.f32 %v1339_v58, %v1326_v57 }
 0x1c4   : > { %s3478_s25 = sshll.u32 %s1343_s23, 6 }
 0x1c5   : > { %s1349_s19 = sadd.s32 %s3478_s25, %s1346_s10  ;;  %s1357_s18 = sshra.s32 %s1356_s3, 3 }
 0x1c6   : > { %s1350_s17 = scalar_lea.vmem [#allocation5], %s1349_s19  ;;  %s1360_s1 = sand.u32 7, %s1356_s3 }
 0x1c7   : > { %v1351_v60 = vld [vmem:[%s1350_s17] ss:$8 sm:$0xf]  ;;  %s3479_s21 = sshll.u32 %s1357_s18, 6  ;;  %s1371_s27 = sshra.s32 %s4727_s2, 3 }
 0x1c8   : > { %v1352_v61 = vld [vmem:[%s1350_s17] ss:$8 sm:$0xf0]  ;;  %s1363_s20 = sadd.s32 %s3479_s21, %s1360_s1  ;;  %s1374_s24 = sand.u32 7, %s4727_s2 }
 0x1c9   : > { %v1353_v62 = vor.u32 %v1352_v61, %v1351_v60  ;;  %s1364_s15 = scalar_lea.vmem [#allocation5], %s1363_s20  ;;  %s3480_s9 = sshll.u32 %s1371_s27, 6 }
 0x1ca   : > { %v1365_v0 = vld [vmem:[%s1364_s15] ss:$8 sm:$0xf]  ;;  %s1389_s7 = sshra.s32 %s4734_s16, 3  ;;  %s1377_s4 = sadd.s32 %s3480_s9, %s1374_s24 }
 0x1cb   : > { %v1354_v63 = vadd.f32 %v1353_v62, %v1340_v59  ;;  %v1366_v1 = vld [vmem:[%s1364_s15] ss:$8 sm:$0xf0]  ;;  %s1392_s23 = sand.u32 7, %s4734_s16  ;;  %s3483_s10 = sshll.u32 %s1389_s7, 6 }
 0x1cc   : > { %v1367_v2 = vor.u32 %v1366_v1, %v1365_v0  ;;  %s1378_s3 = scalar_lea.vmem [#allocation5], %s1377_s4  ;;  %s1395_s25 = sadd.s32 %s3483_s10, %s1392_s23 }
 0x1cd   : > { %v1379_v4 = vld [vmem:[%s1378_s3] ss:$8 sm:$0xf]  ;;  %s1402_s2 = sshra.s32 %s4736_s26, 3  ;;  %s1414_s19 = sadd.s32 2, %s4730_s22 }
 0x1ce   : > { %v1368_v3 = vadd.f32 %v1367_v2, %v1354_v63  ;;  %v1380_v5 = vld [vmem:[%s1378_s3] ss:$8 sm:$0xf0]  ;;  %s1405_s18 = sand.u32 7, %s4736_s26  ;;  %s3484_s17 = sshll.u32 %s1402_s2, 6 }
 0x1cf   : > { %v1381_v6 = vor.u32 %v1380_v5, %v1379_v4  ;;  %s1408_s1 = sadd.s32 %s3484_s17, %s1405_s18  ;;  %s1415_s21 = sld [smem:[#allocation4 + %s1414_s19]] }
 0x1d0   : > { %s1428_s16 = sadd.s32 3, %s4730_s22  ;;  %s1396_s20 = scalar_lea.vmem [#allocation5], %s1395_s25 }
 0x1d1   : > { %v1382_v7 = vadd.f32 %v1381_v6, %v1368_v3  ;;  %v1397_v8 = vld [vmem:[%s1396_s20] ss:$8 sm:$0xf]  ;;  %s1409_s27 = scalar_lea.vmem [#allocation5], %s1408_s1  ;;  %s1429_s24 = sld [smem:[#allocation4 + %s1428_s16]] }
 0x1d2   : > { %v1398_v9 = vld [vmem:[%s1396_s20] ss:$8 sm:$0xf0]  ;;  %s1442_s15 = sadd.s32 4, %s4730_s22  ;;  %s1456_s26 = sadd.s32 5, %s4730_s22 }
 0x1d3   : > { %1384 = vst [vmem:[#allocation2 + $0x41] ss:$8 sm:$0xf] %v1382_v7  ;;  %1385 = vst [vmem:[#allocation2 + $0x41] ss:$8 sm:$0xf0] %v1382_v7  ;;  %v1399_v12 = vor.u32 %v1398_v9, %v1397_v8 }
 0x1d4   : > { %v1410_v10 = vld [vmem:[%s1409_s27] ss:$8 sm:$0xf]  ;;  %s4747_s9 = sld [smem:[#allocation4 + %s1442_s15]]  ;;  %s1470_s4 = sadd.s32 6, %s4730_s22 }
 0x1d5   : > { %v1411_v11 = vld [vmem:[%s1409_s27] ss:$8 sm:$0xf0]  ;;  %s4750_s7 = sld [smem:[#allocation4 + %s1456_s26]]  ;;  %s1416_s23 = sshra.s32 %s1415_s21, 3 }
 0x1d6   : > { %s1419_s10 = sand.u32 7, %s1415_s21  ;;  %v1412_v13 = vor.u32 %v1411_v11, %v1410_v10  ;;  %s3485_s3 = sshll.u32 %s1416_s23, 6 }
 0x1d7   : > { %s4753_s25 = sld [smem:[#allocation4 + %s1470_s4]]  ;;  %s1422_s2 = sadd.s32 %s3485_s3, %s1419_s10 }
 0x1d8   : > { %s1484_s19 = sadd.s32 7, %s4730_s22  ;;  %s1430_s18 = sshra.s32 %s1429_s24, 3  ;;  %v1413_v16 = vadd.f32 %v1412_v13, %v1399_v12 }
 0x1d9   : > { %s1423_s17 = scalar_lea.vmem [#allocation5], %s1422_s2  ;;  %s1433_s1 = sand.u32 7, %s1429_s24 }
 0x1da   : > { %v1424_v14 = vld [vmem:[%s1423_s17] ss:$8 sm:$0xf]  ;;  %s3486_s16 = sshll.u32 %s1430_s18, 6  ;;  %s1444_s20 = sshra.s32 %s4747_s9, 3 }
 0x1db   : > { %v1425_v15 = vld [vmem:[%s1423_s17] ss:$8 sm:$0xf0]  ;;  %s1436_s21 = sadd.s32 %s3486_s16, %s1433_s1  ;;  %s1447_s27 = sand.u32 7, %s4747_s9 }
 0x1dc   : > { %v1426_v17 = vor.u32 %v1425_v15, %v1424_v14  ;;  %s1437_s15 = scalar_lea.vmem [#allocation5], %s1436_s21  ;;  %s3487_s26 = sshll.u32 %s1444_s20, 6 }
 0x1dd   : > { %v1438_v18 = vld [vmem:[%s1437_s15] ss:$8 sm:$0xf]  ;;  %s1458_s4 = sshra.s32 %s4750_s7, 3  ;;  %s1450_s23 = sadd.s32 %s3487_s26, %s1447_s27 }
 0x1de   : > { %v1439_v19 = vld [vmem:[%s1437_s15] ss:$8 sm:$0xf0]  ;;  %v1427_v20 = vadd.f32 %v1426_v17, %v1413_v16  ;;  %s1461_s10 = sand.u32 7, %s4750_s7  ;;  %s3488_s3 = sshll.u32 %s1458_s4, 6 }
 0x1df   : > { %v1440_v21 = vor.u32 %v1439_v19, %v1438_v18  ;;  %s1451_s2 = scalar_lea.vmem [#allocation5], %s1450_s23  ;;  %s1464_s24 = sadd.s32 %s3488_s3, %s1461_s10 }
 0x1e0   : > { %v1452_v22 = vld [vmem:[%s1451_s2] ss:$8 sm:$0xf]  ;;  %s1472_s9 = sshra.s32 %s4753_s25, 3  ;;  %s1465_s18 = scalar_lea.vmem [#allocation5], %s1464_s24 }
 0x1e1   : > { %v1453_v23 = vld [vmem:[%s1451_s2] ss:$8 sm:$0xf0]  ;;  %v1441_v24 = vadd.f32 %v1440_v21, %v1427_v20  ;;  %s1475_s17 = sand.u32 7, %s4753_s25  ;;  %s3489_s1 = sshll.u32 %s1472_s9, 6 }
 0x1e2   : > { %v1454_v25 = vor.u32 %v1453_v23, %v1452_v22  ;;  %v1466_v26 = vld [vmem:[%s1465_s18] ss:$8 sm:$0xf]  ;;  %s1478_s16 = sadd.s32 %s3489_s1, %s1475_s17  ;;  %s1485_s21 = sld [smem:[#allocation4 + %s1484_s19]] }
 0x1e3   : > { %v1467_v28 = vld [vmem:[%s1465_s18] ss:$8 sm:$0xf0]  ;;  %s4765_s7 = sadd.s32 88, %s4343_s14  ;;  %s1479_s20 = scalar_lea.vmem [#allocation5], %s1478_s16 }
 0x1e4   : > { %v1455_v29 = vadd.f32 %v1454_v25, %v1441_v24  ;;  %v1468_v30 = vor.u32 %v1467_v28, %v1466_v26  ;;  %v1480_v31 = vld [vmem:[%s1479_s20] ss:$8 sm:$0xf]  ;;  %s1503_s27 = sld [smem:[#allocation4 + %s4765_s7]]  ;;  %s1515_s15 = sadd.s32 1, %s4765_s7 }
 0x1e5   : > { %v1481_v32 = vld [vmem:[%s1479_s20] ss:$8 sm:$0xf0]  ;;  %s4769_s26 = sld [smem:[#allocation4 + %s1515_s15]]  ;;  %s1529_s25 = sadd.s32 2, %s4765_s7 }
 0x1e6   : > { %v1469_v33 = vadd.f32 %v1468_v30, %v1455_v29  ;;  %v1482_v34 = vor.u32 %v1481_v32, %v1480_v31  ;;  %s1543_s22 = sadd.s32 3, %s4765_s7  ;;  %s4773_s10 = sld [smem:[#allocation4 + %s1529_s25]] }
 0x1e7   : > { %s4775_s2 = sld [smem:[#allocation4 + %s1543_s22]]  ;;  %s1557_s20 = sadd.s32 4, %s4765_s7 }
 0x1e8   : > { %s1486_s19 = sshra.s32 %s1485_s21, 3  ;;  %s1489_s4 = sand.u32 7, %s1485_s21  ;;  %v1483_v35 = vadd.f32 %v1482_v34, %v1469_v33  ;;  %v2274_v34 = vld [vmem:[#allocation10 + $0x360] sm:$0xff] }
 0x1e9   : > { %s3490_s23 = sshll.u32 %s1486_s19, 6 }
 0x1ea   : > { %s1492_s3 = sadd.s32 %s3490_s23, %s1489_s4  ;;  %s1504_s24 = sshra.s32 %s1503_s27, 3 }
 0x1eb   : > { %s1493_s9 = scalar_lea.vmem [#allocation5], %s1492_s3  ;;  %s1507_s18 = sand.u32 7, %s1503_s27 }
 0x1ec   : > { %v1494_v36 = vld [vmem:[%s1493_s9] ss:$8 sm:$0xf]  ;;  %s3493_s17 = sshll.u32 %s1504_s24, 6  ;;  %s1517_s16 = sshra.s32 %s4769_s26, 3 }
 0x1ed   : > { %v1495_v37 = vld [vmem:[%s1493_s9] ss:$8 sm:$0xf0]  ;;  %s1510_s1 = sadd.s32 %s3493_s17, %s1507_s18  ;;  %s1520_s21 = sand.u32 7, %s4769_s26 }
 0x1ee   : > { %v1496_v38 = vor.u32 %v1495_v37, %v1494_v36  ;;  %s1511_s15 = scalar_lea.vmem [#allocation5], %s1510_s1  ;;  %s3494_s25 = sshll.u32 %s1517_s16, 6  ;;  %v2260_v37 = vld [vmem:[#allocation10 + $0x2f0] sm:$0xff] }
 0x1ef   : > { %v1512_v40 = vld [vmem:[%s1511_s15] ss:$8 sm:$0xf]  ;;  %s1531_s22 = sshra.s32 %s4773_s10, 3  ;;  %s1523_s19 = sadd.s32 %s3494_s25, %s1520_s21 }
 0x1f0   : > { %v1497_v39 = vadd.f32 %v1496_v38, %v1483_v35  ;;  %v1513_v41 = vld [vmem:[%s1511_s15] ss:$8 sm:$0xf0]  ;;  %s1534_s4 = sand.u32 7, %s4773_s10  ;;  %s3495_s23 = sshll.u32 %s1531_s22, 6 }
 0x1f1   : > { %s1524_s3 = scalar_lea.vmem [#allocation5], %s1523_s19  ;;  %s1537_s27 = sadd.s32 %s3495_s23, %s1534_s4  ;;  %v1514_v47 = vor.u32 %v1513_v41, %v1512_v40  ;;  %v2275_v35 = vld [vmem:[#allocation10 + $0x368] sm:$0xff]  ;;  %v2261_v38 = vld [vmem:[#allocation10 + $0x2f8] sm:$0xff]  ;;  %v2244_v41 = vld [vmem:[#allocation10 + $0x270] sm:$0xff] }
 0x1f2   : > { %1499 = vst [vmem:[#allocation2 + $0x42] ss:$8 sm:$0xf] %v1497_v39  ;;  %1500 = vst [vmem:[#allocation2 + $0x42] ss:$8 sm:$0xf0] %v1497_v39  ;;  %v3831_v36 = vpack.c.bf16 %v2275_v35, %v2274_v34  ;;  %v3801_v40 = vpack.c.bf16 %v2261_v38, %v2260_v37 }
 0x1f3   : > { %v1525_v42 = vld [vmem:[%s1524_s3] ss:$8 sm:$0xf]  ;;  %s1545_s26 = sshra.s32 %s4775_s2, 3  ;;  %s1538_s24 = scalar_lea.vmem [#allocation5], %s1537_s27 }
 0x1f4   : > { %v1526_v46 = vld [vmem:[%s1524_s3] ss:$8 sm:$0xf0]  ;;  %s1548_s9 = sand.u32 7, %s4775_s2  ;;  %s3496_s18 = sshll.u32 %s1545_s26, 6  ;;  %3832 = vmatpush3.bf16.msra.mxu1 %v3831_v36  ;;  %3802 = vmatprep.subr.bf16.mxu0 %v3801_v40 }
 0x1f5   : > { %v1527_v49 = vor.u32 %v1526_v46, %v1525_v42  ;;  %v1539_v50 = vld [vmem:[%s1538_s24] ss:$8 sm:$0xf]  ;;  %s1551_s17 = sadd.s32 %s3496_s18, %s1548_s9  ;;  %s1558_s1 = sld [smem:[#allocation4 + %s1557_s20]] }
 0x1f6   : > { %v1540_v51 = vld [vmem:[%s1538_s24] ss:$8 sm:$0xf0]  ;;  %s1571_s10 = sadd.s32 5, %s4765_s7  ;;  %s1552_s16 = scalar_lea.vmem [#allocation5], %s1551_s17 }
 0x1f7   : > { %v1528_v52 = vadd.f32 %v1527_v49, %v1514_v47  ;;  %v1541_v53 = vor.u32 %v1540_v51, %v1539_v50  ;;  %v1553_v54 = vld [vmem:[%s1552_s16] ss:$8 sm:$0xf]  ;;  %s1572_s21 = sld [smem:[#allocation4 + %s1571_s10]]  ;;  %s1585_s15 = sadd.s32 6, %s4765_s7 }
 0x1f8   : > { %v1554_v55 = vld [vmem:[%s1552_s16] ss:$8 sm:$0xf0]  ;;  %s4786_s25 = sld [smem:[#allocation4 + %s1585_s15]]  ;;  %s1599_s22 = sadd.s32 7, %s4765_s7 }
 0x1f9   : > { %v1542_v56 = vadd.f32 %v1541_v53, %v1528_v52  ;;  %v1555_v57 = vor.u32 %v1554_v55, %v1553_v54  ;;  %s4789_s19 = sld [smem:[#allocation4 + %s1599_s22]]  ;;  %s4792_s2 = sadd.s32 96, %s4343_s14  ;;  %v2245_v42 = vld [vmem:[#allocation10 + $0x278] sm:$0xff]  ;;  %v2292_v46 = vld [vmem:[#allocation10 + $0x3f0] sm:$0xff] }
 0x1fa   : > { %s4795_s3 = sld [smem:[#allocation4 + %s4792_s2]]  ;;  %s1630_s26 = sadd.s32 1, %s4792_s2  ;;  %v3803_v50 = vpack.c.bf16 %v2245_v42, %v2244_v41  ;;  %v2293_v52 = vld [vmem:[#allocation10 + $0x3f8] sm:$0xff]  ;;  %v2276_v53 = vld [vmem:[#allocation10 + $0x370] sm:$0xff] }
 0x1fb   : > { %s1559_s20 = sshra.s32 %s1558_s1, 3  ;;  %s1562_s4 = sand.u32 7, %s1558_s1  ;;  %v1556_v58 = vadd.f32 %v1555_v57, %v1542_v56  ;;  %v2277_v54 = vld [vmem:[#allocation10 + $0x378] sm:$0xff]  ;;  %v3833_v55 = vpack.c.bf16 %v2293_v52, %v2292_v46  ;;  %v4892_v52 = vld [vmem:[#allocation11] ss:$0 sm:$0xff] }
 0x1fc   : > { %s3497_s23 = sshll.u32 %s1559_s20, 6  ;;  %3804 = vmatpush3.bf16.msra.mxu0 %v3803_v50  ;;  %v3835_v56 = vpack.c.bf16 %v2277_v54, %v2276_v53 }
 0x1fd   : > { %s1565_s27 = sadd.s32 %s3497_s23, %s1562_s4  ;;  %s1573_s24 = sshra.s32 %s1572_s21, 3  ;;  %3834 = vmatprep.subr.bf16.mxu1 %v3833_v55 }
 0x1fe   : > { %s1566_s7 = scalar_lea.vmem [#allocation5], %s1565_s27  ;;  %s1576_s9 = sand.u32 7, %s1572_s21  ;;  %3836 = vmatpush3.bf16.msra.mxu1 %v3835_v56 }
 0x1ff   : > { %v1567_v59 = vld [vmem:[%s1566_s7] ss:$8 sm:$0xf]  ;;  %s3498_s18 = sshll.u32 %s1573_s24, 6  ;;  %s1587_s10 = sshra.s32 %s4786_s25, 3 }
 0x200   : > { %v1568_v60 = vld [vmem:[%s1566_s7] ss:$8 sm:$0xf0]  ;;  %s1579_s17 = sadd.s32 %s3498_s18, %s1576_s9  ;;  %s1590_s1 = sand.u32 7, %s4786_s25 }
 0x201   : > { %v1569_v61 = vor.u32 %v1568_v60, %v1567_v59  ;;  %s1580_s16 = scalar_lea.vmem [#allocation5], %s1579_s17  ;;  %s3499_s15 = sshll.u32 %s1587_s10, 6 }
 0x202   : > { %v1581_v63 = vld [vmem:[%s1580_s16] ss:$8 sm:$0xf]  ;;  %s1601_s22 = sshra.s32 %s4789_s19, 3  ;;  %s1593_s20 = sadd.s32 %s3499_s15, %s1590_s1 }
 0x203   : > { %v1570_v62 = vadd.f32 %v1569_v61, %v1556_v58  ;;  %v1582_v0 = vld [vmem:[%s1580_s16] ss:$8 sm:$0xf0]  ;;  %s1604_s4 = sand.u32 7, %s4789_s19  ;;  %s3500_s23 = sshll.u32 %s1601_s22, 6 }
 0x204   : > { %v1583_v1 = vor.u32 %v1582_v0, %v1581_v63  ;;  %s1594_s27 = scalar_lea.vmem [#allocation5], %s1593_s20  ;;  %s1607_s21 = sadd.s32 %s3500_s23, %s1604_s4 }
 0x205   : > { %v1595_v3 = vld [vmem:[%s1594_s27] ss:$8 sm:$0xf]  ;;  %s1619_s25 = sshra.s32 %s4795_s3, 3  ;;  %s1608_s24 = scalar_lea.vmem [#allocation5], %s1607_s21 }
 0x206   : > { %v1584_v2 = vadd.f32 %v1583_v1, %v1570_v62  ;;  %v1596_v4 = vld [vmem:[%s1594_s27] ss:$8 sm:$0xf0]  ;;  %s1622_s7 = sand.u32 7, %s4795_s3  ;;  %s3503_s19 = sshll.u32 %s1619_s25, 6 }
 0x207   : > { %v1597_v5 = vor.u32 %v1596_v4, %v1595_v3  ;;  %v1609_v6 = vld [vmem:[%s1608_s24] ss:$8 sm:$0xf]  ;;  %s1625_s9 = sadd.s32 %s3503_s19, %s1622_s7  ;;  %s1631_s18 = sld [smem:[#allocation4 + %s1630_s26]] }
 0x208   : > { %v1610_v7 = vld [vmem:[%s1608_s24] ss:$8 sm:$0xf0]  ;;  %s1644_s17 = sadd.s32 2, %s4792_s2  ;;  %s1658_s1 = sadd.s32 3, %s4792_s2 }
 0x209   : > { %v1598_v8 = vadd.f32 %v1597_v5, %v1584_v2  ;;  %v1611_v9 = vor.u32 %v1610_v7, %v1609_v6  ;;  %s1645_s10 = sld [smem:[#allocation4 + %s1644_s17]]  ;;  %s1672_s15 = sadd.s32 4, %s4792_s2 }
 0x20a   : > { %s4808_s16 = sld [smem:[#allocation4 + %s1658_s1]]  ;;  %s1686_s20 = sadd.s32 5, %s4792_s2 }
 0x20b   : > { %v1612_v10 = vadd.f32 %v1611_v9, %v1598_v8  ;;  %s4811_s22 = sld [smem:[#allocation4 + %s1672_s15]]  ;;  %s1626_s3 = scalar_lea.vmem [#allocation5], %s1625_s9 }
 0x20c   : > { %v1627_v11 = vld [vmem:[%s1626_s3] ss:$8 sm:$0xf]  ;;  %s4814_s27 = sld [smem:[#allocation4 + %s1686_s20]]  ;;  %s1700_s25 = sadd.s32 6, %s4792_s2 }
 0x20d   : > { %1614 = vst [vmem:[#allocation2 + $0x43] ss:$8 sm:$0xf] %v1612_v10  ;;  %1615 = vst [vmem:[#allocation2 + $0x43] ss:$8 sm:$0xf0] %v1612_v10 }
 0x20e   : > { %s1632_s4 = sshra.s32 %s1631_s18, 3  ;;  %s1635_s23 = sand.u32 7, %s1631_s18  ;;  %v1628_v12 = vld [vmem:[%s1626_s3] ss:$8 sm:$0xf0] }
 0x20f   : > { %s3504_s26 = sshll.u32 %s1632_s4, 6  ;;  %s1646_s24 = sshra.s32 %s1645_s10, 3  ;;  %v1629_v15 = vor.u32 %v1628_v12, %v1627_v11 }
 0x210   : > { %s1638_s21 = sadd.s32 %s3504_s26, %s1635_s23  ;;  %s1649_s19 = sand.u32 7, %s1645_s10 }
 0x211   : > { %s1639_s7 = scalar_lea.vmem [#allocation5], %s1638_s21  ;;  %s3505_s18 = sshll.u32 %s1646_s24, 6 }
 0x212   : > { %v1640_v13 = vld [vmem:[%s1639_s7] ss:$8 sm:$0xf]  ;;  %s1652_s9 = sadd.s32 %s3505_s18, %s1649_s19  ;;  %s1660_s17 = sshra.s32 %s4808_s16, 3 }
 0x213   : > { %v1641_v14 = vld [vmem:[%s1639_s7] ss:$8 sm:$0xf0]  ;;  %s1663_s1 = sand.u32 7, %s4808_s16  ;;  %s1653_s15 = scalar_lea.vmem [#allocation5], %s1652_s9 }
 0x214   : > { %v1642_v16 = vor.u32 %v1641_v14, %v1640_v13  ;;  %v1654_v17 = vld [vmem:[%s1653_s15] ss:$8 sm:$0xf]  ;;  %s3506_s20 = sshll.u32 %s1660_s17, 6  ;;  %s1674_s4 = sshra.s32 %s4811_s22, 3 }
 0x215   : > { %v1655_v18 = vld [vmem:[%s1653_s15] ss:$8 sm:$0xf0]  ;;  %s1666_s23 = sadd.s32 %s3506_s20, %s1663_s1  ;;  %s1677_s3 = sand.u32 7, %s4811_s22 }
 0x216   : > { %v1643_v19 = vadd.f32 %v1642_v16, %v1629_v15  ;;  %v1656_v20 = vor.u32 %v1655_v18, %v1654_v17  ;;  %s3507_s26 = sshll.u32 %s1674_s4, 6  ;;  %s1667_s21 = scalar_lea.vmem [#allocation5], %s1666_s23 }
 0x217   : > { %v1668_v21 = vld [vmem:[%s1667_s21] ss:$8 sm:$0xf]  ;;  %s1680_s10 = sadd.s32 %s3507_s26, %s1677_s3  ;;  %s1688_s16 = sshra.s32 %s4814_s27, 3 }
 0x218   : > { %v1669_v22 = vld [vmem:[%s1667_s21] ss:$8 sm:$0xf0]  ;;  %v1657_v23 = vadd.f32 %v1656_v20, %v1643_v19  ;;  %s1681_s24 = scalar_lea.vmem [#allocation5], %s1680_s10  ;;  %s1691_s7 = sand.u32 7, %s4814_s27 }
 0x219   : > { %v1670_v24 = vor.u32 %v1669_v22, %v1668_v21  ;;  %v1682_v25 = vld [vmem:[%s1681_s24] ss:$8 sm:$0xf]  ;;  %s3508_s19 = sshll.u32 %s1688_s16, 6  ;;  %s1701_s9 = sld [smem:[#allocation4 + %s1700_s25]] }
 0x21a   : > { %v1683_v26 = vld [vmem:[%s1681_s24] ss:$8 sm:$0xf0]  ;;  %s1694_s18 = sadd.s32 %s3508_s19, %s1691_s7  ;;  %s1714_s22 = sadd.s32 7, %s4792_s2 }
 0x21b   : > { %v1671_v28 = vadd.f32 %v1670_v24, %v1657_v23  ;;  %v1684_v29 = vor.u32 %v1683_v26, %v1682_v25  ;;  %s1695_s17 = scalar_lea.vmem [#allocation5], %s1694_s18  ;;  %s4826_s1 = sld [smem:[#allocation4 + %s1714_s22]] }
 0x21c   : > { %v1696_v30 = vld [vmem:[%s1695_s17] ss:$8 sm:$0xf]  ;;  %s4829_s15 = sadd.s32 104, %s4343_s14 }
 0x21d   : > { %v1697_v31 = vld [vmem:[%s1695_s17] ss:$8 sm:$0xf0]  ;;  %s4832_s20 = sld [smem:[#allocation4 + %s4829_s15]]  ;;  %s1745_s27 = sadd.s32 1, %s4829_s15  ;;  %v1685_v32 = vadd.f32 %v1684_v29, %v1671_v28 }
 0x21e   : > { %v1698_v33 = vor.u32 %v1697_v31, %v1696_v30  ;;  %s1759_s25 = sadd.s32 2, %s4829_s15  ;;  %s4836_s3 = sld [smem:[#allocation4 + %s1745_s27]] }
 0x21f   : > { %s1702_s4 = sshra.s32 %s1701_s9, 3  ;;  %s1705_s23 = sand.u32 7, %s1701_s9 }
 0x220   : > { %s3509_s2 = sshll.u32 %s1702_s4, 6  ;;  %s4838_s21 = sld [smem:[#allocation4 + %s1759_s25]]  ;;  %v1699_v39 = vadd.f32 %v1698_v33, %v1685_v32 }
 0x221   : > { %s1708_s26 = sadd.s32 %s3509_s2, %s1705_s23  ;;  %s1716_s10 = sshra.s32 %s4826_s1, 3 }
 0x222   : > { %s1709_s16 = scalar_lea.vmem [#allocation5], %s1708_s26  ;;  %s1719_s24 = sand.u32 7, %s4826_s1 }
 0x223   : > { %v1710_v47 = vld [vmem:[%s1709_s16] ss:$8 sm:$0xf]  ;;  %s3510_s7 = sshll.u32 %s1716_s10, 6  ;;  %s1734_s18 = sshra.s32 %s4832_s20, 3 }
 0x224   : > { %v1711_v49 = vld [vmem:[%s1709_s16] ss:$8 sm:$0xf0]  ;;  %s1722_s19 = sadd.s32 %s3510_s7, %s1719_s24  ;;  %s1737_s9 = sand.u32 7, %s4832_s20 }
 0x225   : > { %v1712_v51 = vor.u32 %v1711_v49, %v1710_v47  ;;  %s1723_s22 = scalar_lea.vmem [#allocation5], %s1722_s19  ;;  %s3513_s17 = sshll.u32 %s1734_s18, 6 }
 0x226   : > { %v1724_v58 = vld [vmem:[%s1723_s22] ss:$8 sm:$0xf]  ;;  %s1747_s1 = sshra.s32 %s4836_s3, 3  ;;  %s1740_s27 = sadd.s32 %s3513_s17, %s1737_s9 }
 0x227   : > { %v1713_v57 = vadd.f32 %v1712_v51, %v1699_v39  ;;  %v1725_v59 = vld [vmem:[%s1723_s22] ss:$8 sm:$0xf0]  ;;  %s1750_s25 = sand.u32 7, %s4836_s3  ;;  %s3514_s4 = sshll.u32 %s1747_s1, 6 }
 0x228   : > { %v1726_v60 = vor.u32 %v1725_v59, %v1724_v58  ;;  %s1741_s23 = scalar_lea.vmem [#allocation5], %s1740_s27  ;;  %s1753_s2 = sadd.s32 %s3514_s4, %s1750_s25 }
 0x229   : > { %v1742_v62 = vld [vmem:[%s1741_s23] ss:$8 sm:$0xf]  ;;  %s1773_s20 = sadd.s32 3, %s4829_s15  ;;  %s1761_s26 = sshra.s32 %s4838_s21, 3 }
 0x22a   : > { %v1727_v61 = vadd.f32 %v1726_v60, %v1713_v57  ;;  %v1743_v63 = vld [vmem:[%s1741_s23] ss:$8 sm:$0xf0]  ;;  %s1754_s10 = scalar_lea.vmem [#allocation5], %s1753_s2  ;;  %s1764_s16 = sand.u32 7, %s4838_s21 }
 0x22b   : > { %v1755_v0 = vld [vmem:[%s1754_s10] ss:$8 sm:$0xf]  ;;  %s3515_s24 = sshll.u32 %s1761_s26, 6  ;;  %s1774_s7 = sld [smem:[#allocation4 + %s1773_s20]]  ;;  %v1744_v2 = vor.u32 %v1743_v63, %v1742_v62 }
 0x22c   : > { %1729 = vst [vmem:[#allocation2 + $0x44] ss:$8 sm:$0xf] %v1727_v61  ;;  %1730 = vst [vmem:[#allocation2 + $0x44] ss:$8 sm:$0xf0] %v1727_v61  ;;  %s1767_s3 = sadd.s32 %s3515_s24, %s1764_s16 }
 0x22d   : > { %v1756_v1 = vld [vmem:[%s1754_s10] ss:$8 sm:$0xf0]  ;;  %s1787_s19 = sadd.s32 4, %s4829_s15  ;;  %s1768_s18 = scalar_lea.vmem [#allocation5], %s1767_s3 }
 0x22e   : > { %v1757_v3 = vor.u32 %v1756_v1, %v1755_v0  ;;  %v1769_v4 = vld [vmem:[%s1768_s18] ss:$8 sm:$0xf]  ;;  %s1788_s9 = sld [smem:[#allocation4 + %s1787_s19]]  ;;  %s1801_s22 = sadd.s32 5, %s4829_s15 }
 0x22f   : > { %v1770_v5 = vld [vmem:[%s1768_s18] ss:$8 sm:$0xf0]  ;;  %s4851_s17 = sld [smem:[#allocation4 + %s1801_s22]]  ;;  %s1815_s1 = sadd.s32 6, %s4829_s15 }
 0x230   : > { %v1758_v6 = vadd.f32 %v1757_v3, %v1744_v2  ;;  %v1771_v7 = vor.u32 %v1770_v5, %v1769_v4  ;;  %s4854_s27 = sld [smem:[#allocation4 + %s1815_s1]]  ;;  %s1829_s21 = sadd.s32 7, %s4829_s15 }
 0x231   : > { %s1775_s25 = sshra.s32 %s1774_s7, 3  ;;  %s1778_s4 = sand.u32 7, %s1774_s7 }
 0x232   : > { %s3516_s23 = sshll.u32 %s1775_s25, 6  ;;  %s4857_s2 = sld [smem:[#allocation4 + %s1829_s21]]  ;;  %v1772_v8 = vadd.f32 %v1771_v7, %v1758_v6 }
 0x233   : > { %s1781_s20 = sadd.s32 %s3516_s23, %s1778_s4  ;;  %s4860_s26 = sadd.s32 112, %s4343_s14 }
 0x234   : > { %s1789_s10 = sshra.s32 %s1788_s9, 3  ;;  %s1782_s16 = scalar_lea.vmem [#allocation5], %s1781_s20 }
 0x235   : > { %v1783_v9 = vld [vmem:[%s1782_s16] ss:$8 sm:$0xf]  ;;  %s1792_s24 = sand.u32 7, %s1788_s9  ;;  %s3517_s15 = sshll.u32 %s1789_s10, 6 }
 0x236   : > { %v1784_v10 = vld [vmem:[%s1782_s16] ss:$8 sm:$0xf0]  ;;  %s1795_s3 = sadd.s32 %s3517_s15, %s1792_s24  ;;  %s1803_s19 = sshra.s32 %s4851_s17, 3 }
 0x237   : > { %v1785_v11 = vor.u32 %v1784_v10, %v1783_v9  ;;  %s1806_s7 = sand.u32 7, %s4851_s17  ;;  %s1796_s18 = scalar_lea.vmem [#allocation5], %s1795_s3 }
 0x238   : > { %v1797_v13 = vld [vmem:[%s1796_s18] ss:$8 sm:$0xf]  ;;  %s3518_s22 = sshll.u32 %s1803_s19, 6  ;;  %s1817_s1 = sshra.s32 %s4854_s27, 3 }
 0x239   : > { %v1786_v12 = vadd.f32 %v1785_v11, %v1772_v8  ;;  %v1798_v14 = vld [vmem:[%s1796_s18] ss:$8 sm:$0xf0]  ;;  %s1809_s21 = sadd.s32 %s3518_s22, %s1806_s7  ;;  %s1820_s25 = sand.u32 7, %s4854_s27 }
 0x23a   : > { %v1799_v15 = vor.u32 %v1798_v14, %v1797_v13  ;;  %s3519_s4 = sshll.u32 %s1817_s1, 6  ;;  %s1810_s23 = scalar_lea.vmem [#allocation5], %s1809_s21 }
 0x23b   : > { %v1811_v17 = vld [vmem:[%s1810_s23] ss:$8 sm:$0xf]  ;;  %s1823_s9 = sadd.s32 %s3519_s4, %s1820_s25  ;;  %s1831_s17 = sshra.s32 %s4857_s2, 3 }
 0x23c   : > { %v1800_v16 = vadd.f32 %v1799_v15, %v1786_v12  ;;  %v1812_v18 = vld [vmem:[%s1810_s23] ss:$8 sm:$0xf0]  ;;  %s1824_s20 = scalar_lea.vmem [#allocation5], %s1823_s9  ;;  %s1834_s10 = sand.u32 7, %s4857_s2 }
 0x23d   : > { %v1813_v19 = vor.u32 %v1812_v18, %v1811_v17  ;;  %v1825_v20 = vld [vmem:[%s1824_s20] ss:$8 sm:$0xf]  ;;  %s3520_s16 = sshll.u32 %s1831_s17, 6  ;;  %s1848_s24 = sld [smem:[#allocation4 + %s4860_s26]] }
 0x23e   : > { %v1826_v21 = vld [vmem:[%s1824_s20] ss:$8 sm:$0xf0]  ;;  %s1837_s27 = sadd.s32 %s3520_s16, %s1834_s10  ;;  %s1860_s15 = sadd.s32 1, %s4860_s26 }
 0x23f   : > { %v1814_v22 = vadd.f32 %v1813_v19, %v1800_v16  ;;  %v1827_v23 = vor.u32 %v1826_v21, %v1825_v20  ;;  %s1838_s3 = scalar_lea.vmem [#allocation5], %s1837_s27  ;;  %s1861_s19 = sld [smem:[#allocation4 + %s1860_s15]] }
 0x240   : > { %v1839_v25 = vld [vmem:[%s1838_s3] ss:$8 sm:$0xf]  ;;  %s1874_s7 = sadd.s32 2, %s4860_s26  ;;  %s1888_s22 = sadd.s32 3, %s4860_s26 }
 0x241   : > { %v1828_v24 = vadd.f32 %v1827_v23, %v1814_v22  ;;  %v1840_v26 = vld [vmem:[%s1838_s3] ss:$8 sm:$0xf0]  ;;  %s4871_s18 = sld [smem:[#allocation4 + %s1874_s7]]  ;;  %s1902_s4 = sadd.s32 4, %s4860_s26 }
 0x242   : > { %v1841_v28 = vor.u32 %v1840_v26, %v1839_v25  ;;  %s4874_s1 = sld [smem:[#allocation4 + %s1888_s22]]  ;;  %s1916_s20 = sadd.s32 5, %s4860_s26 }
 0x243   : > { %s1849_s2 = sshra.s32 %s1848_s24, 3  ;;  %s1852_s21 = sand.u32 7, %s1848_s24 }
 0x244   : > { %v1842_v29 = vadd.f32 %v1841_v28, %v1828_v24  ;;  %s3523_s25 = sshll.u32 %s1849_s2, 6  ;;  %s4877_s17 = sld [smem:[#allocation4 + %s1902_s4]] }
 0x245   : > { %s1855_s23 = sadd.s32 %s3523_s25, %s1852_s21  ;;  %s1862_s9 = sshra.s32 %s1861_s19, 3 }
 0x246   : > { %1844 = vst [vmem:[#allocation2 + $0x45] ss:$8 sm:$0xf] %v1842_v29  ;;  %1845 = vst [vmem:[#allocation2 + $0x45] ss:$8 sm:$0xf0] %v1842_v29 }
 0x247   : > { %s1856_s10 = scalar_lea.vmem [#allocation5], %s1855_s23  ;;  %s1865_s16 = sand.u32 7, %s1861_s19 }
 0x248   : > { %v1857_v30 = vld [vmem:[%s1856_s10] ss:$8 sm:$0xf]  ;;  %s3524_s27 = sshll.u32 %s1862_s9, 6  ;;  %s1876_s3 = sshra.s32 %s4871_s18, 3 }
 0x249   : > { %v1858_v31 = vld [vmem:[%s1856_s10] ss:$8 sm:$0xf0]  ;;  %s1868_s15 = sadd.s32 %s3524_s27, %s1865_s16  ;;  %s1879_s24 = sand.u32 7, %s4871_s18 }
 0x24a   : > { %s1869_s7 = scalar_lea.vmem [#allocation5], %s1868_s15  ;;  %v1859_v34 = vor.u32 %v1858_v31, %v1857_v30  ;;  %s3525_s22 = sshll.u32 %s1876_s3, 6 }
 0x24b   : > { %v1870_v32 = vld [vmem:[%s1869_s7] ss:$8 sm:$0xf]  ;;  %s1890_s2 = sshra.s32 %s4874_s1, 3  ;;  %s1882_s21 = sadd.s32 %s3525_s22, %s1879_s24 }
 0x24c   : > { %v1871_v33 = vld [vmem:[%s1869_s7] ss:$8 sm:$0xf0]  ;;  %s1893_s25 = sand.u32 7, %s4874_s1  ;;  %s3526_s4 = sshll.u32 %s1890_s2, 6 }
 0x24d   : > { %v1872_v35 = vor.u32 %v1871_v33, %v1870_v32  ;;  %s1883_s23 = scalar_lea.vmem [#allocation5], %s1882_s21  ;;  %s1896_s19 = sadd.s32 %s3526_s4, %s1893_s25 }
 0x24e   : > { %v1884_v36 = vld [vmem:[%s1883_s23] ss:$8 sm:$0xf]  ;;  %s1904_s18 = sshra.s32 %s4877_s17, 3  ;;  %s1897_s9 = scalar_lea.vmem [#allocation5], %s1896_s19 }
 0x24f   : > { %v1885_v37 = vld [vmem:[%s1883_s23] ss:$8 sm:$0xf0]  ;;  %v1873_v38 = vadd.f32 %v1872_v35, %v1859_v34  ;;  %s1907_s10 = sand.u32 7, %s4877_s17  ;;  %s3527_s16 = sshll.u32 %s1904_s18, 6 }
 0x250   : > { %v1886_v39 = vor.u32 %v1885_v37, %v1884_v36  ;;  %v1898_v40 = vld [vmem:[%s1897_s9] ss:$8 sm:$0xf]  ;;  %s1910_s27 = sadd.s32 %s3527_s16, %s1907_s10  ;;  %s1917_s15 = sld [smem:[#allocation4 + %s1916_s20]] }
 0x251   : > { %v1899_v41 = vld [vmem:[%s1897_s9] ss:$8 sm:$0xf0]  ;;  %s1930_s1 = sadd.s32 6, %s4860_s26  ;;  %s1911_s3 = scalar_lea.vmem [#allocation5], %s1910_s27 }
 0x252   : > { %v1887_v42 = vadd.f32 %v1886_v39, %v1873_v38  ;;  %v1900_v46 = vor.u32 %v1899_v41, %v1898_v40  ;;  %v1912_v50 = vld [vmem:[%s1911_s3] ss:$8 sm:$0xf]  ;;  %s4889_s24 = sld [smem:[#allocation4 + %s1930_s1]]  ;;  %s1944_s7 = sadd.s32 7, %s4860_s26  ;;  %v2116_v41 = vsub.s32 5, %v4646_v27 }
 0x253   : > { %v1913_v51 = vld [vmem:[%s1911_s3] ss:$8 sm:$0xf0]  ;;  %s4894_s17 = sld [smem:[#allocation4 + %s1944_s7]]  ;;  %s4897_s22 = sadd.s32 120, %s4343_s14 }
 0x254   : > { %v1901_v57 = vadd.f32 %v1900_v46, %v1887_v42  ;;  %v1914_v58 = vor.u32 %v1913_v51, %v1912_v50  ;;  %s1975_s20 = sadd.s32 1, %s4897_s22  ;;  %s4902_s25 = sld [smem:[#allocation4 + %s4897_s22]]  ;;  %v2124_v42 = vsub.s32 7, %v4646_v27  ;;  %v3924_v50 = vld [vmem:[#allocation8] sm:$0xff] }
 0x255   : > { %s4904_s14 = sld [smem:[#allocation4 + %s1975_s20]]  ;;  %v2117_v51 = vrot.slane %v3924_v50, %v2116_v41 }
 0x256   : > { %s1918_s2 = sshra.s32 %s1917_s15, 3  ;;  %s1921_s21 = sand.u32 7, %s1917_s15  ;;  %v1915_v61 = vadd.f32 %v1914_v58, %v1901_v57  ;;  %v2080_v57 = vld [vmem:[#allocation2 + $0x20] sm:$0xff] }
 0x257   : > { %s3528_s26 = sshll.u32 %s1918_s2, 6 }
 0x258   : > { %s1924_s4 = sadd.s32 %s3528_s26, %s1921_s21  ;;  %s1932_s23 = sshra.s32 %s4889_s24, 3 }
 0x259   : > { %s1925_s19 = scalar_lea.vmem [#allocation5], %s1924_s4  ;;  %s1935_s18 = sand.u32 7, %s4889_s24 }
 0x25a   : > { %v1926_v62 = vld [vmem:[%s1925_s19] ss:$8 sm:$0xf]  ;;  %s3529_s9 = sshll.u32 %s1932_s23, 6  ;;  %s1946_s16 = sshra.s32 %s4894_s17, 3 }
 0x25b   : > { %v1927_v63 = vld [vmem:[%s1925_s19] ss:$8 sm:$0xf0]  ;;  %s1938_s10 = sadd.s32 %s3529_s9, %s1935_s18  ;;  %s1949_s27 = sand.u32 7, %s4894_s17 }
 0x25c   : > { %v1928_v0 = vor.u32 %v1927_v63, %v1926_v62  ;;  %s1939_s15 = scalar_lea.vmem [#allocation5], %s1938_s10  ;;  %s3530_s1 = sshll.u32 %s1946_s16, 6  ;;  %v2082_v62 = vld [vmem:[#allocation2 + $0x30] sm:$0xff] }
 0x25d   : > { %v1940_v2 = vld [vmem:[%s1939_s15] ss:$8 sm:$0xf]  ;;  %s1964_s3 = sshra.s32 %s4902_s25, 3  ;;  %s1952_s7 = sadd.s32 %s3530_s1, %s1949_s27 }
 0x25e   : > { %v1929_v1 = vadd.f32 %v1928_v0, %v1915_v61  ;;  %v1941_v3 = vld [vmem:[%s1939_s15] ss:$8 sm:$0xf0]  ;;  %s1967_s20 = sand.u32 7, %s4902_s25  ;;  %s3533_s2 = sshll.u32 %s1964_s3, 6 }
 0x25f   : > { %v1942_v4 = vor.u32 %v1941_v3, %v1940_v2  ;;  %s1953_s24 = scalar_lea.vmem [#allocation5], %s1952_s7  ;;  %s1970_s21 = sadd.s32 %s3533_s2, %s1967_s20 }
 0x260   : > { %v1954_v6 = vld [vmem:[%s1953_s24] ss:$8 sm:$0xf]  ;;  %s1977_s17 = sshra.s32 %s4904_s14, 3  ;;  %s1989_s26 = sadd.s32 2, %s4897_s22 }
 0x261   : > { %v1943_v5 = vadd.f32 %v1942_v4, %v1929_v1  ;;  %v1955_v7 = vld [vmem:[%s1953_s24] ss:$8 sm:$0xf0]  ;;  %s1980_s4 = sand.u32 7, %s4904_s14  ;;  %s3534_s23 = sshll.u32 %s1977_s17, 6 }
 0x262   : > { %v1956_v8 = vor.u32 %v1955_v7, %v1954_v6  ;;  %s1983_s19 = sadd.s32 %s3534_s23, %s1980_s4  ;;  %s1990_s18 = sld [smem:[#allocation4 + %s1989_s26]] }
 0x263   : > { %s2003_s25 = sadd.s32 3, %s4897_s22  ;;  %s1971_s9 = scalar_lea.vmem [#allocation5], %s1970_s21 }
 0x264   : > { %v1957_v9 = vadd.f32 %v1956_v8, %v1943_v5  ;;  %v1972_v10 = vld [vmem:[%s1971_s9] ss:$8 sm:$0xf]  ;;  %s1984_s10 = scalar_lea.vmem [#allocation5], %s1983_s19  ;;  %s2004_s16 = sld [smem:[#allocation4 + %s2003_s25]] }
 0x265   : > { %v1973_v11 = vld [vmem:[%s1971_s9] ss:$8 sm:$0xf0]  ;;  %s2017_s27 = sadd.s32 4, %s4897_s22  ;;  %s2031_s14 = sadd.s32 5, %s4897_s22 }
 0x266   : > { %1959 = vst [vmem:[#allocation2 + $0x46] ss:$8 sm:$0xf] %v1957_v9  ;;  %1960 = vst [vmem:[#allocation2 + $0x46] ss:$8 sm:$0xf0] %v1957_v9  ;;  %v1974_v14 = vor.u32 %v1973_v11, %v1972_v10 }
 0x267   : > { %v1985_v12 = vld [vmem:[%s1984_s10] ss:$8 sm:$0xf]  ;;  %s4919_s15 = sld [smem:[#allocation4 + %s2017_s27]]  ;;  %s2045_s3 = sadd.s32 6, %s4897_s22 }
 0x268   : > { %v1986_v13 = vld [vmem:[%s1984_s10] ss:$8 sm:$0xf0]  ;;  %s4922_s1 = sld [smem:[#allocation4 + %s2031_s14]]  ;;  %s1991_s7 = sshra.s32 %s1990_s18, 3 }
 0x269   : > { %s1994_s20 = sand.u32 7, %s1990_s18  ;;  %v1987_v15 = vor.u32 %v1986_v13, %v1985_v12  ;;  %s3535_s2 = sshll.u32 %s1991_s7, 6 }
 0x26a   : > { %s4925_s24 = sld [smem:[#allocation4 + %s2045_s3]]  ;;  %s1997_s21 = sadd.s32 %s3535_s2, %s1994_s20 }
 0x26b   : > { %s2059_s17 = sadd.s32 7, %s4897_s22  ;;  %s2005_s26 = sshra.s32 %s2004_s16, 3  ;;  %v1988_v18 = vadd.f32 %v1987_v15, %v1974_v14 }
 0x26c   : > { %s1998_s4 = scalar_lea.vmem [#allocation5], %s1997_s21  ;;  %s2008_s23 = sand.u32 7, %s2004_s16 }
 0x26d   : > { %v1999_v16 = vld [vmem:[%s1998_s4] ss:$8 sm:$0xf]  ;;  %s3536_s19 = sshll.u32 %s2005_s26, 6  ;;  %s2019_s25 = sshra.s32 %s4919_s15, 3 }
 0x26e   : > { %v2000_v17 = vld [vmem:[%s1998_s4] ss:$8 sm:$0xf0]  ;;  %s2011_s18 = sadd.s32 %s3536_s19, %s2008_s23  ;;  %s2022_s9 = sand.u32 7, %s4919_s15 }
 0x26f   : > { %v2001_v19 = vor.u32 %v2000_v17, %v1999_v16  ;;  %s2012_s10 = scalar_lea.vmem [#allocation5], %s2011_s18  ;;  %s3537_s27 = sshll.u32 %s2019_s25, 6 }
 0x270   : > { %v2013_v20 = vld [vmem:[%s2012_s10] ss:$8 sm:$0xf]  ;;  %s2033_s14 = sshra.s32 %s4922_s1, 3  ;;  %s2025_s3 = sadd.s32 %s3537_s27, %s2022_s9 }
 0x271   : > { %v2014_v21 = vld [vmem:[%s2012_s10] ss:$8 sm:$0xf0]  ;;  %v2002_v22 = vadd.f32 %v2001_v19, %v1988_v18  ;;  %s2036_s7 = sand.u32 7, %s4922_s1  ;;  %s3538_s20 = sshll.u32 %s2033_s14, 6 }
 0x272   : > { %v2015_v23 = vor.u32 %v2014_v21, %v2013_v20  ;;  %s2026_s2 = scalar_lea.vmem [#allocation5], %s2025_s3  ;;  %s2039_s16 = sadd.s32 %s3538_s20, %s2036_s7 }
 0x273   : > { %v2027_v24 = vld [vmem:[%s2026_s2] ss:$8 sm:$0xf]  ;;  %s2047_s15 = sshra.s32 %s4925_s24, 3  ;;  %s2040_s21 = scalar_lea.vmem [#allocation5], %s2039_s16 }
 0x274   : > { %v2028_v25 = vld [vmem:[%s2026_s2] ss:$8 sm:$0xf0]  ;;  %v2016_v26 = vadd.f32 %v2015_v23, %v2002_v22  ;;  %s2050_s26 = sand.u32 7, %s4925_s24  ;;  %s3539_s4 = sshll.u32 %s2047_s15, 6 }
 0x275   : > { %v2029_v28 = vor.u32 %v2028_v25, %v2027_v24  ;;  %v2041_v29 = vld [vmem:[%s2040_s21] ss:$8 sm:$0xf]  ;;  %s2053_s23 = sadd.s32 %s3539_s4, %s2050_s26  ;;  %s2060_s19 = sld [smem:[#allocation4 + %s2059_s17]] }
 0x276   : > { %v2042_v30 = vld [vmem:[%s2040_s21] ss:$8 sm:$0xf0]  ;;  %s2054_s18 = scalar_lea.vmem [#allocation5], %s2053_s23  ;;  %s233_s22 = sand.u32 1, %s4115_s29  }
 0x277   : > { %v2030_v31 = vadd.f32 %v2029_v28, %v2016_v26  ;;  %v2043_v32 = vor.u32 %v2042_v30, %v2041_v29  ;;  %v2055_v33 = vld [vmem:[%s2054_s18] ss:$8 sm:$0xf]  ;;  %s3103_s24 = sshll.u32 %s233_s22, 4  ;;  %s3541_s3 = sshll.u32 %s4200_s0, 8 }
 0x278   : > { %v3589_v47 = vpop.f32.mrb[0].mxu0  ;;  %v3627_v49 = vpop.f32.mrb[0].mxu1  ;;  %v2056_v34 = vld [vmem:[%s2054_s18] ss:$8 sm:$0xf0]  ;;  %s235_s17 = scalar_lea.vmem [#allocation13], %s3103_s24  ;;  %s4953_s2 = scalar_lea.hbm %s5001_s5, %s3541_s3 }
 0x279   : > { %v3590_v53 = vpop.f32.mrb[1].mxu0  ;;  %v3628_v54 = vpop.f32.mrb[1].mxu1  ;;  %v2044_v35 = vadd.f32 %v2043_v32, %v2030_v31  ;;  %v2057_v36 = vor.u32 %v2056_v34, %v2055_v33  ;;  %s2617_s14 = sshll.u32 %s235_s17, 4  ;;  %s4955_s16 = scalar_lea.sflag [#allocation7], %s233_s22  ;;  %s4948_s14 = int_to_ptr.vmem [resolvable:$true] %s2617_s14 }
 0x27a   : > { %v3591_v55 = vadd.f32 %v3590_v53, %v3589_v47  ;;  %v3629_v56 = vadd.f32 %v3628_v54, %v3627_v49  ;;  %v2112_v47 = vsub.s32 4, %v4646_v27  ;;  %v2120_v49 = vsub.s32 6, %v4646_v27  ;;  %v2081_v54 = vld [vmem:[#allocation2 + $0x28] sm:$0xff]  ;;  %s4047_s15 = scalar_lea.vmem %s4948_s14, 256  ;;  %s4134_s0 = smov [#allocation13]  }
 0x27b   : > { %s2061_s1 = sshra.s32 %s2060_s19, 3  ;;  %s2064_s25 = sand.u32 7, %s2060_s19  ;;  %v2058_v37 = vadd.f32 %v2057_v36, %v2044_v35  ;;  %v2125_v53 = vrot.slane %v3924_v50, %v2124_v42 }
 0x27c   : > { %v2368_v59 = vadd.f32 %v3591_v55, %v4892_v52  ;;  %s3540_s9 = sshll.u32 %s2061_s1, 6  ;;  %v2083_v55 = vld [vmem:[#allocation2 + $0x38] sm:$0xff]  ;;  %v2121_v58 = vrot.slane %v3924_v50, %v2120_v49  ;;  %p4048_p13 = scmp.ne.s32.totalorder %s4948_s14, %s4047_s15 }
 0x27d   : > { %s2067_s10 = sadd.s32 %s3540_s9, %s2064_s25  ;;  %v2141_v61 = vadd.f32 %v2125_v53, %v2083_v55  ;;  %s4051_s21 = sshll.u32 %s4134_s0, 4  ;;  %s4052_s21 = int_to_ptr.vmem [resolvable:$false] %s4051_s21 }
 0x27e   : > { %v4906_v60 = vadd.f32 %v3629_v56, %v2368_v59  ;;  %s2068_s27 = scalar_lea.vmem [#allocation5], %s2067_s10  ;;  %v2113_v56 = vrot.slane %v3924_v50, %v2112_v47  ;;  %v2139_v59 = vadd.f32 %v2117_v51, %v2081_v54  ;;  %v2140_v6 = vadd.f32 %v2121_v58, %v2082_v62  ;;  %p4049_p6 = pnand %p4048_p13, %p5028_p5 }
 0x27f   : > { %v2069_v38 = vld [vmem:[%s2068_s27] ss:$8 sm:$0xf]  ;;  %v2157_v10 = vmax.f32 %v2141_v61, 0.0  ;;  %s4053_s26 = scalar_lea.vmem %s4052_s21, 512  ;;  %p4054_p10 = scmp.lt.s32.totalorder %s4948_s14, %s4052_s21 }
 0x280   : > { %v2070_v39 = vld [vmem:[%s2068_s27] ss:$8 sm:$0xf0]  ;;  %v2138_v2 = vadd.f32 %v2113_v56, %v2080_v57  ;;  %v2155_v9 = vmax.f32 %v2139_v59, 0.0  ;;  %p4050_p7 = pneg %p4049_p6  ;;  %p4055_p11 = scmp.lt.s32.totalorder %s4053_s26, %s4047_s15 }
 0x281   : > { %v2071_v40 = vor.u32 %v2070_v39, %v2069_v38 }
 0x282   : > { %p4056_p0 = por %p4055_p11, %p4054_p10 }
 0x283   : > { %v2072_v46 = vadd.f32 %v2071_v40, %v2058_v37 }
 0x284   : > { %p4057_p2 = pnand %p4056_p0, %p4050_p7 }
 0x285   : > { %2074 = vst [vmem:[#allocation2 + $0x47] ss:$8 sm:$0xf] %v2072_v46  ;;  %2075 = vst [vmem:[#allocation2 + $0x47] ss:$8 sm:$0xf0] %v2072_v46 }
 0x28c   : > { %v2085_v63 = vld [vmem:[#allocation2 + $0x48] sm:$0xff]  ;;  %v2084_v0 = vld [vmem:[#allocation2 + $0x40] sm:$0xff]  ;;  %v2087_v1 = vld [vmem:[#allocation2 + $0x58] sm:$0xff] }
 0x28d   : > { %v2143_v3 = vadd.f32 %v4660_v43, %v2085_v63  ;;  %v2142_v4 = vadd.f32 %v4662_v44, %v2084_v0  ;;  %v2145_v27 = vadd.f32 %v4664_v45, %v2087_v1  ;;  %v2086_v5 = vld [vmem:[#allocation2 + $0x50] sm:$0xff]  ;;  %v2089_v7 = vld [vmem:[#allocation2 + $0x68] sm:$0xff]  ;;  %v2091_v12 = vld [vmem:[#allocation2 + $0x78] sm:$0xff]  ;;  %v2154_v44 = vmax.f32 %v2138_v2, 0.0 }
 0x28e   : > { %v2144_v8 = vadd.f32 %v4667_v48, %v2086_v5  ;;  %v2147_v11 = vadd.f32 %v2117_v51, %v2089_v7  ;;  %v2088_v16 = vld [vmem:[#allocation2 + $0x60] sm:$0xff]  ;;  %v2149_v17 = vadd.f32 %v2125_v53, %v2091_v12  ;;  %v2090_v18 = vld [vmem:[#allocation2 + $0x70] sm:$0xff]  ;;  %v2156_v45 = vmax.f32 %v2140_v6, 0.0 }
 0x28f   : > { %v2159_v13 = vmax.f32 %v2143_v3, 0.0  ;;  %v2158_v14 = vmax.f32 %v2142_v4, 0.0  ;;  %v2161_v15 = vmax.f32 %v2145_v27, 0.0  ;;  %v2146_v19 = vadd.f32 %v2113_v56, %v2088_v16 }
 0x290   : > { %v2160_v43 = vmax.f32 %v2144_v8, 0.0  ;;  %v2148_v20 = vadd.f32 %v2121_v58, %v2090_v18  ;;  %v2163_v48 = vmax.f32 %v2147_v11, 0.0  ;;  %v2165_v21 = vmax.f32 %v2149_v17, 0.0 }
 0x291   : > { %2370 = vmatprep.mubr.f32.mxu0 %v2159_v13  ;;  %2445 = vmatprep.mubr.f32.mxu1 %v2161_v15  ;;  %v2162_v22 = vmax.f32 %v2146_v19, 0.0 }
 0x292   : > { %2371 = vmatmul.mubr.f32.gmra.mrb[2].mxu0 %v2158_v14  ;;  %2446 = vmatmul.mubr.f32.gmra.mrb[2].mxu1 %v2160_v43  ;;  %v2164_v23 = vmax.f32 %v2148_v20, 0.0 }
 0x293   : > { %2515 = vmatprep.mubr.f32.mxu0 %v2155_v9  ;;  %2590 = vmatprep.mubr.f32.mxu1 %v2157_v10 }
 0x296   : > { %2516 = vmatmul.mubr.f32.vlgmr.msra.gmra.mrb[4].mxu0 %v2154_v44  ;;  %2591 = vmatmul.mubr.f32.vlgmr.msra.gmra.mrb[4].mxu1 %v2156_v45 }
 0x297   : > { %2520 = vmatprep.mubr.f32.mxu0 %v2163_v48  ;;  %2595 = vmatprep.mubr.f32.mxu1 %v2165_v21 }
 0x29a   : > { %2521 = vmatmul.mubr.f32.gmra.mrb[6].mxu0 %v2162_v22  ;;  %2596 = vmatmul.mubr.f32.gmra.mrb[6].mxu1 %v2164_v23 }
 0x365   : > { %v3592_v24 = vpop.f32.mrb[2].mxu0  ;;  %v3630_v25 = vpop.f32.mrb[2].mxu1 }
 0x366   : > { %v3593_v26 = vpop.f32.mrb[3].mxu0  ;;  %v3631_v28 = vpop.f32.mrb[3].mxu1 }
 0x367   : > { %v3594_v29 = vadd.f32 %v3593_v26, %v3592_v24  ;;  %v3632_v30 = vadd.f32 %v3631_v28, %v3630_v25 }
 0x369   : > { %v2373_v31 = vadd.f32 %v3594_v29, %v4892_v52  ;;  %v3665_v32 = vpop.f32.mrb[4].mxu0  ;;  %v3703_v33 = vpop.f32.mrb[4].mxu1 }
 0x36a   : > { %v3666_v34 = vpop.f32.mrb[5].mxu0  ;;  %v3704_v35 = vpop.f32.mrb[5].mxu1 }
 0x36b   : > { %v2448_v36 = vadd.f32 %v3632_v30, %v2373_v31  ;;  %v3667_v37 = vadd.f32 %v3666_v34, %v3665_v32  ;;  %v3705_v38 = vadd.f32 %v3704_v35, %v3703_v33 }
 0x36d   : > { %v2518_v39 = vadd.f32 %v3667_v37, %v4906_v60  ;;  %v3668_v40 = vpop.f32.mrb[6].mxu0  ;;  %v3706_v41 = vpop.f32.mrb[6].mxu1 }
 0x36e   : > { %v3669_v42 = vpop.f32.mrb[7].mxu0  ;;  %v3707_v46 = vpop.f32.mrb[7].mxu1 }
 0x36f   : > { %v2593_v47 = vadd.f32 %v3705_v38, %v2518_v39  ;;  %v3670_v52 = vadd.f32 %v3669_v42, %v3668_v40  ;;  %v3708_v49 = vadd.f32 %v3707_v46, %v3706_v41 }
 0x371   : > { %2601 = vst [vmem:[%s235_s17] sm:$0xff] %v2593_v47  ;;  %v2523_v50 = vadd.f32 %v3670_v52, %v2448_v36 }
 0x373   : > { %v2598_v51 = vadd.f32 %v3708_v49, %v2523_v50 }
 0x375   : > { %2602 = vst [vmem:[%s235_s17 + $0x8] sm:$0xff] %v2598_v51 }
 0x376   : > { %4060 = shalt.err (!%p4057_p2)
}
 0x377   : > { %s4061_s4 = scalar_lea.hbm %s4953_s2, 256  ;;  %s4065_s18 = scalar_lea.hbm %s5001_s5, 512 }
 0x378   : > { %p4062_p4 = scmp.ne.s32.totalorder %s4953_s2, %s4061_s4  ;;  %p4066_p8 = scmp.lt.u32.totalorder %s4953_s2, %s5001_s5 }
 0x379   : > { %p4067_p12 = scmp.lt.u32.totalorder %s4065_s18, %s4061_s4  ;;  %p4069_p13 = scmp.lt.u32.totalorder %s4061_s4, %s4953_s2 }
 0x37a   : > { %p4063_p3 = pnand %p4062_p4, %p5028_p5 }
 0x37b   : > { %p4068_p1 = por %p4067_p12, %p4066_p8 }
 0x37c   : > { %p4064_p9 = pneg %p4063_p3 }
 0x37d   : > { %p4070_p6 = por %p4069_p13, %p4068_p1 }
 0x37f   : > { %p4071_p7 = pnand %p4070_p6, %p4064_p9 }
 0x381   : > { %4074 = shalt.err (!%p4071_p7)
}
 0x382   : > { %s4135_s9 = smov 128   ;;  %s4136_s10 = smov 8  }
 0x383   : > { %3853 = dma.vmem_to_hbm [thread:$0]  (%p5028_p5), %s4948_s14, 256, %s4953_s2, %s4955_s16, %s4135_s9, %s4135_s9, %s4136_s10  }
 0x384 PF: > { %p3880_p10 = scmp.ge.s32.totalorder %s4123_s6, 2  ;;  %s2632_s27 = sand.u32 1, %s4111_s28  }
 0x385   : > { %p5029_p11 = scmp.ne.s32.totalorder %s5010_s13, 0  ;;  %s2633_s22 = scalar_lea.sflag [#allocation7], %s2632_s27 }
 0x387   : > { %p3869_p0 = pnand %p3880_p10, %p5029_p11 }
 0x389   : > { %4106 = dma.done.wait (!%p3869_p0), %s2633_s22, 256  }
 0x38a   : > { %4108 = vsyncadd (!%p3869_p0), %s2633_s22, 4294967040  ;;  %p22_p2 = scmp.ge.s32.totalorder %s4204_s8, 4   ;;  %s5030_s28 = smov %s4115_s29 }
 0x38b   : > { %s5031_s29 = smov %s4119_s30  ;;  %s5032_s30 = smov %s4215_s11 }
 0x38c   : > { %s5033_s6 = smov %s4204_s8  ;;  %24 = sbr.rel (!%p22_p2) target bundleno = 19 (0x13), region = 228 }
 0x393   :  { %2638 = vsyncpa [#allocation6], 1 }
 0x394   :  { %2640 = vsyncpa [#allocation6 + $0x1], 1 }
 0x395   :  { %2641 = vsyncpa [#allocation9], 1 }
 0x396   :  { %2642 = vsyncpa [#allocation12], 1 }
 0x397   :  { %2643 = vsyncpa [#allocation7], 1 }
 0x398   :  { %2645 = vsyncpa [#allocation7 + $0x1], 1 }

</bundles_post_ra>
